<compile_context>
chip_gen: v7x
topology: tpu7x:2x2x1
jax: 0.10.0
libtpu: 0.0.40
codegen_flags: <defaults>
</compile_context>

<pallas_src>
import numpy as np
import jax
import jax.numpy as jnp
from jax import lax
from jax.experimental import pallas as pl
from jax.experimental.pallas import tpu as pltpu


def _round_up(v, m):
    return (v + m - 1) // m * m


def _shift_w(v, s):
    """Shift a (R, W, C) value along W by s in {-1, 0, +1} with zero fill (SAME pad)."""
    if s == 0:
        return v
    r, w, c = v.shape
    z = jnp.zeros((r, 1, c), v.dtype)
    if s > 0:                                        # shifted[w] = v[w-1]
        return jnp.concatenate([z, v[:, :w - 1, :]], axis=1)
    return jnp.concatenate([v[:, 1:, :], z], axis=1)  # shifted[w] = v[w+1]


def _make_kernel(H_real, TH, W, C):
    R1 = TH + 2   # conv1 output rows needed (includes 1-row halo for conv2)
    R2 = TH       # conv2 output rows == output block rows

    def kernel(xc_ref, xt_ref, xb_ref, w1_ref, w2_ref, bn_ref,
               o_ref, a1_ref, a2_ref, col_ref):
        r = pl.program_id(1)
        row0 = r * TH                                # first output row of this block

        s1, b1 = bn_ref[0:1], bn_ref[1:2]            # (1, C) f32
        s2, b2 = bn_ref[2:3], bn_ref[3:4]
        s3, b3 = bn_ref[4:5], bn_ref[5:6]

        def row_mask(nrows, first_row):
            # True for rows that are inside the real image (others act as conv zero pad).
            gid = first_row + lax.broadcasted_iota(jnp.int32, (nrows, W, C), 0)
            return (gid >= 0) & (gid < H_real)

        # ---- bn1 over the slab + 2-row halos; out-of-image rows -> 0 ----
        x_halo = jnp.concatenate([xt_ref[0], xc_ref[0], xb_ref[0]], axis=0)  # (TH+4, W, C) f32
        a1 = jnp.where(row_mask(TH + 4, row0 - 2), x_halo * s1 + b1, 0.0)
        a1_ref[...] = a1.astype(a1_ref.dtype)

        # ---- 3x3 conv as a single K=9C MXU contraction over im2col columns ----
        def conv3x3(src_ref, nrows, w_ref):
            m = nrows * W
            for t in range(9):
                dh, dw = divmod(t, 3)
                win = _shift_w(src_ref[dh:dh + nrows], 1 - dw)      # (nrows, W, C) bf16
                col_ref[0:m, t * C:(t + 1) * C] = win.reshape(m, C)  # 128-aligned lane store
            return jnp.dot(col_ref[0:m, :], w_ref[...],
                           preferred_element_type=jnp.float32)       # (m, C) f32

        c1 = conv3x3(a1_ref, R1, w1_ref)

        # ---- bn2 + relu; out-of-image rows -> 0 (true zero padding for conv2) ----
        h = jnp.maximum(c1 * s2 + b2, 0.0).reshape(R1, W, C)
        a2_ref[...] = jnp.where(row_mask(R1, row0 - 1), h, 0.0).astype(a2_ref.dtype)

        c2 = conv3x3(a2_ref, R2, w2_ref)

        # ---- bn3 + residual (channel-zero-padded shortcut == padded x), all f32 ----
        out = c2.reshape(R2, W, C) * s3 + b3 + xc_ref[0]
        o_ref[0] = out.astype(o_ref.dtype)

    return kernel


def _vmem_bytes(th, W, C):
    """Rough resident-VMEM estimate (inputs/outputs double-buffered)."""
    f32, bf16 = 4, 2
    io = th * W * C * f32 * 2                     # x slab + out slab
    halo = 2 * 2 * W * C * f32                    # two 2-row halo blocks
    wts = 2 * 9 * C * C * bf16                    # w1 + w2 (resident)
    scratch = ((th + 4) * W * C + (th + 2) * W * C + (th + 2) * W * 9 * C) * bf16
    return 2 * (io + halo + wts) + scratch + 8 * C * f32


def basic_block_forward(x_nchw, params, *, row_tile=32, vmem_budget=20 * 2**20):
    """BasicBlock forward (stride=1, downsample=None).  x_nchw: (N, Cin, H, W)."""
    x = jnp.transpose(x_nchw, (0, 2, 3, 1)).astype(jnp.float32)   # NCHW -> NHWC
    N, H, W, Cin = x.shape

    w1 = params["w1"].astype(jnp.float32)   # (3, 3, Cin, Cout)  HWIO
    w2 = params["w2"].astype(jnp.float32)   # (3, 3, Cout, Cout)
    Cout = w1.shape[-1]
    if Cout < Cin:
        # PyTorch forward would error here (out += shortcut with fewer channels).
        raise ValueError("planes must be >= inplanes for this block")

    # ---- lane-dense channel padding (also realizes `out += cat(shortcut, zeros)`) ----
    C = _round_up(max(Cin, Cout), 128)
    x = jnp.pad(x, ((0, 0), (0, 0), (0, 0), (0, C - Cin)))
    w1 = jnp.pad(w1, ((0, 0), (0, 0), (0, C - Cin), (0, C - Cout)))
    w2 = jnp.pad(w2, ((0, 0), (0, 0), (0, C - Cout), (0, C - Cout)))
    w1f = w1.reshape(9 * C, C).astype(jnp.bfloat16)   # row = (dh*3+dw)*C + cin
    w2f = w2.reshape(9 * C, C).astype(jnp.bfloat16)

    def padc(v, n):
        return jnp.pad(v.astype(jnp.float32), (0, C - n))

    bn = jnp.stack([padc(params["bn1_scale"], Cin),  padc(params["bn1_shift"], Cin),
                    padc(params["bn2_scale"], Cout), padc(params["bn2_shift"], Cout),
                    padc(params["bn3_scale"], Cout), padc(params["bn3_shift"], Cout),
                    jnp.zeros((C,), jnp.float32),    jnp.zeros((C,), jnp.float32)])  # (8, C)

    # ---- row-tile selection: even TH, footprint well under v7x's 64 MiB ----
    TH = max(2, min(row_tile, H + (H % 2)))
    TH -= TH % 2
    while TH > 2 and _vmem_bytes(TH, W, C) > vmem_budget:
        TH -= 2
    Hp = _round_up(H, TH)
    if Hp != H:
        x = jnp.pad(x, ((0, 0), (0, Hp - H), (0, 0), (0, 0)))   # masked inside the kernel
    R = Hp // TH
    HB2 = TH // 2   # stride (in 2-row blocks) between consecutive row slabs

    kernel = _make_kernel(H, TH, W, C)
    vlim = int(max(32 * 2**20, min(48 * 2**20, 2 * _vmem_bytes(TH, W, C))))

    out = pl.pallas_call(
        kernel,
        out_shape=jax.ShapeDtypeStruct((N, Hp, W, C), jnp.float32),
        grid_spec=pltpu.PrefetchScalarGridSpec(
            num_scalar_prefetch=0,
            grid=(N, R),
            in_specs=[
                # current TH-row slab of x (also the residual shortcut)
                pl.BlockSpec((1, TH, W, C), lambda b, r: (b, r, 0, 0)),
                # 2-row halo just above / just below (clamped at the image edge;
                # out-of-image rows are zero-masked inside the kernel)
                pl.BlockSpec((1, 2, W, C),
                             lambda b, r: (b, jnp.maximum(r * HB2 - 1, 0), 0, 0)),
                pl.BlockSpec((1, 2, W, C),
                             lambda b, r: (b, jnp.minimum((r + 1) * HB2, Hp // 2 - 1), 0, 0)),
                pl.BlockSpec((9 * C, C), lambda b, r: (0, 0)),   # w1 (resident across grid)
                pl.BlockSpec((9 * C, C), lambda b, r: (0, 0)),   # w2 (resident across grid)
                pl.BlockSpec((8, C), lambda b, r: (0, 0)),       # packed BN scale/shift
            ],
            out_specs=pl.BlockSpec((1, TH, W, C), lambda b, r: (b, r, 0, 0)),
            scratch_shapes=[
                pltpu.VMEM((TH + 4, W, C), jnp.bfloat16),          # bn1(x) incl. 2-row halos
                pltpu.VMEM((TH + 2, W, C), jnp.bfloat16),          # relu(bn2(conv1)) incl. halo
                pltpu.VMEM(((TH + 2) * W, 9 * C), jnp.bfloat16),   # im2col columns
            ],
        ),
        compiler_params=pltpu.CompilerParams(
            dimension_semantics=("parallel", "parallel"),
            vmem_limit_bytes=vlim,
        ),
    )(x, x, x, w1f, w2f, bn)

    out = out[:, :H, :, :Cout]
    return jnp.transpose(out, (0, 3, 1, 2))   # NHWC -> NCHW


def init_params(key, inplanes, planes):
    """Deterministic synthetic parameters (BatchNorm folded to scale/shift)."""
    ks = jax.random.split(key, 5)

    def bn_params(k, Cn):
        k1, k2, k3, k4 = jax.random.split(k, 4)
        gamma = jax.random.uniform(k1, (Cn,), minval=0.5, maxval=1.5)
        beta = jax.random.normal(k2, (Cn,)) * 0.1
        mean = jax.random.normal(k3, (Cn,)) * 0.1
        var = jax.random.uniform(k4, (Cn,), minval=0.5, maxval=1.5)
        eps = 1e-5
        scale = gamma / jnp.sqrt(var + eps)
        shift = beta - mean * scale
        return scale.astype(jnp.float32), shift.astype(jnp.float32)

    s1, b1 = bn_params(ks[0], inplanes)
    s2, b2 = bn_params(ks[1], planes)
    s3, b3 = bn_params(ks[2], planes)
    w1 = (jax.random.normal(ks[3], (3, 3, inplanes, planes))
          * (1.0 / np.sqrt(9.0 * inplanes))).astype(jnp.float32)
    w2 = (jax.random.normal(ks[4], (3, 3, planes, planes))
          * (1.0 / np.sqrt(9.0 * planes))).astype(jnp.float32)
    return dict(w1=w1, w2=w2,
                bn1_scale=s1, bn1_shift=b1,
                bn2_scale=s2, bn2_shift=b2,
                bn3_scale=s3, bn3_shift=b3)


def reference_forward(x_nchw, params):
    """Pure-JAX f32 reference (same semantics) for the correctness check."""
    x = jnp.transpose(x_nchw, (0, 2, 3, 1)).astype(jnp.float32)

    def bn(v, s, b):
        return v * s + b

    dn = ("NHWC", "HWIO", "NHWC")
    h = bn(x, params["bn1_scale"], params["bn1_shift"])
    h = jax.lax.conv_general_dilated(h, params["w1"], (1, 1), "SAME",
                                     dimension_numbers=dn,
                                     precision=jax.lax.Precision.HIGHEST)
    h = jnp.maximum(bn(h, params["bn2_scale"], params["bn2_shift"]), 0.0)
    h = jax.lax.conv_general_dilated(h, params["w2"], (1, 1), "SAME",
                                     dimension_numbers=dn,
                                     precision=jax.lax.Precision.HIGHEST)
    h = bn(h, params["bn3_scale"], params["bn3_shift"])
    Cin, Cout = x.shape[-1], h.shape[-1]
    shortcut = jnp.pad(x, ((0, 0), (0, 0), (0, 0), (0, Cout - Cin)))
    out = h + shortcut
    return jnp.transpose(out, (0, 3, 1, 2))


if __name__ == "__main__":
    key = jax.random.PRNGKey(0)
    kx, kp = jax.random.split(key)

    N, inplanes, H, W = 2, 4, 16, 16
    planes = 8                       # exercises the channel-pad residual branch

    x = jax.random.normal(kx, (N, inplanes, H, W), dtype=jnp.float32)
    params = init_params(kp, inplanes, planes)

    # row_tile=8 -> two row-blocks per image: exercises the cross-block halo path.
    out = jax.block_until_ready(basic_block_forward(x, params, row_tile=8))
    ref = reference_forward(x, params)

    # Conv operands are bf16 on the MXU (f32 accumulation) -> looser tolerance
    # than the pure-f32 reference.
    np.testing.assert_allclose(np.asarray(out), np.asarray(ref), rtol=1e-1, atol=1e-1)
    assert out.shape == (N, planes, H, W)
    print("KERNEL_OK")
</pallas_src>

<mosaic_0001>
module attributes {stable_mosaic.version = 11 : i64} {
  func.func @kernel(%arg0: i32, %arg1: i32, %arg2: memref<1x8x16x128xf32, #tpu.memory_space<vmem>>, %arg3: memref<1x2x16x128xf32, #tpu.memory_space<vmem>>, %arg4: memref<1x2x16x128xf32, #tpu.memory_space<vmem>>, %arg5: memref<1152x128xbf16, #tpu.memory_space<vmem>>, %arg6: memref<1152x128xbf16, #tpu.memory_space<vmem>>, %arg7: memref<8x128xf32, #tpu.memory_space<vmem>>, %arg8: memref<1x8x16x128xf32, #tpu.memory_space<vmem>>, %arg9: memref<12x16x128xbf16, #tpu.memory_space<vmem>>, %arg10: memref<10x16x128xbf16, #tpu.memory_space<vmem>>, %arg11: memref<160x1152xbf16, #tpu.memory_space<vmem>>) attributes {dimension_semantics = [#tpu.dimension_semantics<parallel>, #tpu.dimension_semantics<parallel>], iteration_bounds = array<i64: 2, 2>, scalar_prefetch = 0 : i64, scratch_operands = 3 : i64, tpu.core_type = #tpu.core_type<tc>, window_params = [{transform_indices = @transform_0, window_bounds = array<i64: 1, 8, 16, 128>}, {transform_indices = @transform_1, window_bounds = array<i64: 1, 2, 16, 128>}, {transform_indices = @transform_2, window_bounds = array<i64: 1, 2, 16, 128>}, {pipeline_mode = #tpu.pipeline_mode<synchronous>, transform_indices = @transform_3, window_bounds = array<i64: 1152, 128>}, {pipeline_mode = #tpu.pipeline_mode<synchronous>, transform_indices = @transform_4, window_bounds = array<i64: 1152, 128>}, {pipeline_mode = #tpu.pipeline_mode<synchronous>, transform_indices = @transform_5, window_bounds = array<i64: 8, 128>}, {transform_indices = @transform_6, window_bounds = array<i64: 1, 8, 16, 128>}]} {
    %c8_i32 = arith.constant 8 : i32
    %0 = arith.muli %arg1, %c8_i32 : i32
    %c0 = arith.constant 0 : index
    %c0_0 = arith.constant 0 : index
    %1 = vector.load %arg7[%c0, %c0_0] : memref<8x128xf32, #tpu.memory_space<vmem>>, vector<1x128xf32>
    %c1 = arith.constant 1 : index
    %c0_1 = arith.constant 0 : index
    %2 = vector.load %arg7[%c1, %c0_1] : memref<8x128xf32, #tpu.memory_space<vmem>>, vector<1x128xf32>
    %c2 = arith.constant 2 : index
    %c0_2 = arith.constant 0 : index
    %3 = vector.load %arg7[%c2, %c0_2] : memref<8x128xf32, #tpu.memory_space<vmem>>, vector<1x128xf32>
    %c3 = arith.constant 3 : index
    %c0_3 = arith.constant 0 : index
    %4 = vector.load %arg7[%c3, %c0_3] : memref<8x128xf32, #tpu.memory_space<vmem>>, vector<1x128xf32>
    %c4 = arith.constant 4 : index
    %c0_4 = arith.constant 0 : index
    %5 = vector.load %arg7[%c4, %c0_4] : memref<8x128xf32, #tpu.memory_space<vmem>>, vector<1x128xf32>
    %c5 = arith.constant 5 : index
    %c0_5 = arith.constant 0 : index
    %6 = vector.load %arg7[%c5, %c0_5] : memref<8x128xf32, #tpu.memory_space<vmem>>, vector<1x128xf32>
    %c0_6 = arith.constant 0 : index
    %c0_7 = arith.constant 0 : index
    %c0_8 = arith.constant 0 : index
    %c0_9 = arith.constant 0 : index
    %7 = vector.load %arg3[%c0_6, %c0_7, %c0_8, %c0_9] : memref<1x2x16x128xf32, #tpu.memory_space<vmem>>, vector<1x2x16x128xf32>
    %8 = vector.shape_cast %7 : vector<1x2x16x128xf32> to vector<2x16x128xf32>
    %c0_10 = arith.constant 0 : index
    %c0_11 = arith.constant 0 : index
    %c0_12 = arith.constant 0 : index
    %c0_13 = arith.constant 0 : index
    %9 = vector.load %arg2[%c0_10, %c0_11, %c0_12, %c0_13] : memref<1x8x16x128xf32, #tpu.memory_space<vmem>>, vector<1x8x16x128xf32>
    %10 = vector.shape_cast %9 : vector<1x8x16x128xf32> to vector<8x16x128xf32>
    %c0_14 = arith.constant 0 : index
    %c0_15 = arith.constant 0 : index
    %c0_16 = arith.constant 0 : index
    %c0_17 = arith.constant 0 : index
    %11 = vector.load %arg4[%c0_14, %c0_15, %c0_16, %c0_17] : memref<1x2x16x128xf32, #tpu.memory_space<vmem>>, vector<1x2x16x128xf32>
    %12 = vector.shape_cast %11 : vector<1x2x16x128xf32> to vector<2x16x128xf32>
    %13 = tpu.concatenate %8, %10, %12 in 0 : vector<2x16x128xf32>, vector<8x16x128xf32>, vector<2x16x128xf32> -> vector<12x16x128xf32>
    %c2_i32 = arith.constant 2 : i32
    %14 = arith.subi %0, %c2_i32 : i32
    %15 = tpu.iota {dimensions = array<i32: 0>} : vector<12x16x128xi32>
    %16 = vector.broadcast %14 : i32 to vector<12x16x128xi32>
    %17 = arith.addi %16, %15 : vector<12x16x128xi32>
    %c0_i32 = arith.constant 0 : i32
    %18 = vector.broadcast %c0_i32 : i32 to vector<12x16x128xi32>
    %19 = arith.cmpi sge, %17, %18 : vector<12x16x128xi32>
    %c16_i32 = arith.constant 16 : i32
    %20 = vector.broadcast %c16_i32 : i32 to vector<12x16x128xi32>
    %21 = arith.cmpi slt, %17, %20 : vector<12x16x128xi32>
    %22 = arith.andi %19, %21 : vector<12x16x128xi1>
    %23 = vector.shape_cast %1 : vector<1x128xf32> to vector<1x1x128xf32>
    %24 = vector.broadcast %23 : vector<1x1x128xf32> to vector<12x16x128xf32>
    %25 = arith.mulf %13, %24 : vector<12x16x128xf32>
    %26 = vector.shape_cast %2 : vector<1x128xf32> to vector<1x1x128xf32>
    %27 = vector.broadcast %26 : vector<1x1x128xf32> to vector<12x16x128xf32>
    %28 = arith.addf %25, %27 : vector<12x16x128xf32>
    %cst = arith.constant 0.000000e+00 : f32
    %29 = vector.broadcast %cst : f32 to vector<12x16x128xf32>
    %30 = arith.select %22, %28, %29 : vector<12x16x128xi1>, vector<12x16x128xf32>
    %31 = arith.truncf %30 : vector<12x16x128xf32> to vector<12x16x128xbf16>
    %c0_18 = arith.constant 0 : index
    %c0_19 = arith.constant 0 : index
    %c0_20 = arith.constant 0 : index
    %32 = vector.load %arg9[%c0_18, %c0_19, %c0_20] : memref<12x16x128xbf16, #tpu.memory_space<vmem>>, vector<12x16x128xbf16>
    tpu.vector_store %arg9[%c0_18, %c0_19, %c0_20], %31 {strides = array<i32>} : memref<12x16x128xbf16, #tpu.memory_space<vmem>>, vector<12x16x128xbf16>,
    %c0_21 = arith.constant 0 : index
    %c0_22 = arith.constant 0 : index
    %c0_23 = arith.constant 0 : index
    %33 = vector.load %arg9[%c0_21, %c0_22, %c0_23] : memref<12x16x128xbf16, #tpu.memory_space<vmem>>, vector<10x16x128xbf16>
    %cst_24 = arith.constant 0.000000e+00 : bf16
    %34 = vector.broadcast %cst_24 : bf16 to vector<10x1x128xbf16>
    %35 = vector.extract_strided_slice %33 {offsets = [0, 0, 0], sizes = [10, 15, 128], strides = [1, 1, 1]} : vector<10x16x128xbf16> to vector<10x15x128xbf16>
    %36 = tpu.concatenate %34, %35 in 1 : vector<10x1x128xbf16>, vector<10x15x128xbf16> -> vector<10x16x128xbf16>
    %37 = vector.shape_cast %36 : vector<10x16x128xbf16> to vector<160x128xbf16>
    %c0_25 = arith.constant 0 : index
    %c0_26 = arith.constant 0 : index
    %38 = vector.load %arg11[%c0_25, %c0_26] : memref<160x1152xbf16, #tpu.memory_space<vmem>>, vector<160x128xbf16>
    tpu.vector_store %arg11[%c0_25, %c0_26], %37 {strides = array<i32>} : memref<160x1152xbf16, #tpu.memory_space<vmem>>, vector<160x128xbf16>,
    %c0_27 = arith.constant 0 : index
    %c0_28 = arith.constant 0 : index
    %c0_29 = arith.constant 0 : index
    %39 = vector.load %arg9[%c0_27, %c0_28, %c0_29] : memref<12x16x128xbf16, #tpu.memory_space<vmem>>, vector<10x16x128xbf16>
    %40 = vector.shape_cast %39 : vector<10x16x128xbf16> to vector<160x128xbf16>
    %c0_30 = arith.constant 0 : index
    %c128 = arith.constant 128 : index
    %41 = vector.load %arg11[%c0_30, %c128] : memref<160x1152xbf16, #tpu.memory_space<vmem>>, vector<160x128xbf16>
    tpu.vector_store %arg11[%c0_30, %c128], %40 {strides = array<i32>} : memref<160x1152xbf16, #tpu.memory_space<vmem>>, vector<160x128xbf16>,
    %c0_31 = arith.constant 0 : index
    %c0_32 = arith.constant 0 : index
    %c0_33 = arith.constant 0 : index
    %42 = vector.load %arg9[%c0_31, %c0_32, %c0_33] : memref<12x16x128xbf16, #tpu.memory_space<vmem>>, vector<10x16x128xbf16>
    %cst_34 = arith.constant 0.000000e+00 : bf16
    %43 = vector.broadcast %cst_34 : bf16 to vector<10x1x128xbf16>
    %44 = vector.extract_strided_slice %42 {offsets = [0, 1, 0], sizes = [10, 15, 128], strides = [1, 1, 1]} : vector<10x16x128xbf16> to vector<10x15x128xbf16>
    %45 = tpu.concatenate %44, %43 in 1 : vector<10x15x128xbf16>, vector<10x1x128xbf16> -> vector<10x16x128xbf16>
    %46 = vector.shape_cast %45 : vector<10x16x128xbf16> to vector<160x128xbf16>
    %c0_35 = arith.constant 0 : index
    %c256 = arith.constant 256 : index
    %47 = vector.load %arg11[%c0_35, %c256] : memref<160x1152xbf16, #tpu.memory_space<vmem>>, vector<160x128xbf16>
    tpu.vector_store %arg11[%c0_35, %c256], %46 {strides = array<i32>} : memref<160x1152xbf16, #tpu.memory_space<vmem>>, vector<160x128xbf16>,
    %c1_36 = arith.constant 1 : index
    %c0_37 = arith.constant 0 : index
    %c0_38 = arith.constant 0 : index
    %48 = vector.load %arg9[%c1_36, %c0_37, %c0_38] : memref<12x16x128xbf16, #tpu.memory_space<vmem>>, vector<10x16x128xbf16>
    %cst_39 = arith.constant 0.000000e+00 : bf16
    %49 = vector.broadcast %cst_39 : bf16 to vector<10x1x128xbf16>
    %50 = vector.extract_strided_slice %48 {offsets = [0, 0, 0], sizes = [10, 15, 128], strides = [1, 1, 1]} : vector<10x16x128xbf16> to vector<10x15x128xbf16>
    %51 = tpu.concatenate %49, %50 in 1 : vector<10x1x128xbf16>, vector<10x15x128xbf16> -> vector<10x16x128xbf16>
    %52 = vector.shape_cast %51 : vector<10x16x128xbf16> to vector<160x128xbf16>
    %c0_40 = arith.constant 0 : index
    %c384 = arith.constant 384 : index
    %53 = vector.load %arg11[%c0_40, %c384] : memref<160x1152xbf16, #tpu.memory_space<vmem>>, vector<160x128xbf16>
    tpu.vector_store %arg11[%c0_40, %c384], %52 {strides = array<i32>} : memref<160x1152xbf16, #tpu.memory_space<vmem>>, vector<160x128xbf16>,
    %c1_41 = arith.constant 1 : index
    %c0_42 = arith.constant 0 : index
    %c0_43 = arith.constant 0 : index
    %54 = vector.load %arg9[%c1_41, %c0_42, %c0_43] : memref<12x16x128xbf16, #tpu.memory_space<vmem>>, vector<10x16x128xbf16>
    %55 = vector.shape_cast %54 : vector<10x16x128xbf16> to vector<160x128xbf16>
    %c0_44 = arith.constant 0 : index
    %c512 = arith.constant 512 : index
    %56 = vector.load %arg11[%c0_44, %c512] : memref<160x1152xbf16, #tpu.memory_space<vmem>>, vector<160x128xbf16>
    tpu.vector_store %arg11[%c0_44, %c512], %55 {strides = array<i32>} : memref<160x1152xbf16, #tpu.memory_space<vmem>>, vector<160x128xbf16>,
    %c1_45 = arith.constant 1 : index
    %c0_46 = arith.constant 0 : index
    %c0_47 = arith.constant 0 : index
    %57 = vector.load %arg9[%c1_45, %c0_46, %c0_47] : memref<12x16x128xbf16, #tpu.memory_space<vmem>>, vector<10x16x128xbf16>
    %cst_48 = arith.constant 0.000000e+00 : bf16
    %58 = vector.broadcast %cst_48 : bf16 to vector<10x1x128xbf16>
    %59 = vector.extract_strided_slice %57 {offsets = [0, 1, 0], sizes = [10, 15, 128], strides = [1, 1, 1]} : vector<10x16x128xbf16> to vector<10x15x128xbf16>
    %60 = tpu.concatenate %59, %58 in 1 : vector<10x15x128xbf16>, vector<10x1x128xbf16> -> vector<10x16x128xbf16>
    %61 = vector.shape_cast %60 : vector<10x16x128xbf16> to vector<160x128xbf16>
    %c0_49 = arith.constant 0 : index
    %c640 = arith.constant 640 : index
    %62 = vector.load %arg11[%c0_49, %c640] : memref<160x1152xbf16, #tpu.memory_space<vmem>>, vector<160x128xbf16>
    tpu.vector_store %arg11[%c0_49, %c640], %61 {strides = array<i32>} : memref<160x1152xbf16, #tpu.memory_space<vmem>>, vector<160x128xbf16>,
    %c2_50 = arith.constant 2 : index
    %c0_51 = arith.constant 0 : index
    %c0_52 = arith.constant 0 : index
    %63 = vector.load %arg9[%c2_50, %c0_51, %c0_52] : memref<12x16x128xbf16, #tpu.memory_space<vmem>>, vector<10x16x128xbf16>
    %cst_53 = arith.constant 0.000000e+00 : bf16
    %64 = vector.broadcast %cst_53 : bf16 to vector<10x1x128xbf16>
    %65 = vector.extract_strided_slice %63 {offsets = [0, 0, 0], sizes = [10, 15, 128], strides = [1, 1, 1]} : vector<10x16x128xbf16> to vector<10x15x128xbf16>
    %66 = tpu.concatenate %64, %65 in 1 : vector<10x1x128xbf16>, vector<10x15x128xbf16> -> vector<10x16x128xbf16>
    %67 = vector.shape_cast %66 : vector<10x16x128xbf16> to vector<160x128xbf16>
    %c0_54 = arith.constant 0 : index
    %c768 = arith.constant 768 : index
    %68 = vector.load %arg11[%c0_54, %c768] : memref<160x1152xbf16, #tpu.memory_space<vmem>>, vector<160x128xbf16>
    tpu.vector_store %arg11[%c0_54, %c768], %67 {strides = array<i32>} : memref<160x1152xbf16, #tpu.memory_space<vmem>>, vector<160x128xbf16>,
    %c2_55 = arith.constant 2 : index
    %c0_56 = arith.constant 0 : index
    %c0_57 = arith.constant 0 : index
    %69 = vector.load %arg9[%c2_55, %c0_56, %c0_57] : memref<12x16x128xbf16, #tpu.memory_space<vmem>>, vector<10x16x128xbf16>
    %70 = vector.shape_cast %69 : vector<10x16x128xbf16> to vector<160x128xbf16>
    %c0_58 = arith.constant 0 : index
    %c896 = arith.constant 896 : index
    %71 = vector.load %arg11[%c0_58, %c896] : memref<160x1152xbf16, #tpu.memory_space<vmem>>, vector<160x128xbf16>
    tpu.vector_store %arg11[%c0_58, %c896], %70 {strides = array<i32>} : memref<160x1152xbf16, #tpu.memory_space<vmem>>, vector<160x128xbf16>,
    %c2_59 = arith.constant 2 : index
    %c0_60 = arith.constant 0 : index
    %c0_61 = arith.constant 0 : index
    %72 = vector.load %arg9[%c2_59, %c0_60, %c0_61] : memref<12x16x128xbf16, #tpu.memory_space<vmem>>, vector<10x16x128xbf16>
    %cst_62 = arith.constant 0.000000e+00 : bf16
    %73 = vector.broadcast %cst_62 : bf16 to vector<10x1x128xbf16>
    %74 = vector.extract_strided_slice %72 {offsets = [0, 1, 0], sizes = [10, 15, 128], strides = [1, 1, 1]} : vector<10x16x128xbf16> to vector<10x15x128xbf16>
    %75 = tpu.concatenate %74, %73 in 1 : vector<10x15x128xbf16>, vector<10x1x128xbf16> -> vector<10x16x128xbf16>
    %76 = vector.shape_cast %75 : vector<10x16x128xbf16> to vector<160x128xbf16>
    %c0_63 = arith.constant 0 : index
    %c1024 = arith.constant 1024 : index
    %77 = vector.load %arg11[%c0_63, %c1024] : memref<160x1152xbf16, #tpu.memory_space<vmem>>, vector<160x128xbf16>
    tpu.vector_store %arg11[%c0_63, %c1024], %76 {strides = array<i32>} : memref<160x1152xbf16, #tpu.memory_space<vmem>>, vector<160x128xbf16>,
    %c0_64 = arith.constant 0 : index
    %c0_65 = arith.constant 0 : index
    %78 = vector.load %arg11[%c0_64, %c0_65] : memref<160x1152xbf16, #tpu.memory_space<vmem>>, vector<160x1152xbf16>
    %c0_66 = arith.constant 0 : index
    %c0_67 = arith.constant 0 : index
    %79 = vector.load %arg5[%c0_66, %c0_67] : memref<1152x128xbf16, #tpu.memory_space<vmem>>, vector<1152x128xbf16>
    %cst_68 = arith.constant dense<0.000000e+00> : vector<160x128xf32>
    %80 = tpu.matmul %78, %79, %cst_68 {dimension_numbers = #tpu.dot_dimension_numbers<[1], [0], [0], [1], [0, 0, 1, 1], [], []>} : vector<160x1152xbf16>, vector<1152x128xbf16>, vector<160x128xf32> -> vector<160x128xf32>
    %81 = vector.broadcast %3 : vector<1x128xf32> to vector<160x128xf32>
    %82 = arith.mulf %80, %81 : vector<160x128xf32>
    %83 = vector.broadcast %4 : vector<1x128xf32> to vector<160x128xf32>
    %84 = arith.addf %82, %83 : vector<160x128xf32>
    %cst_69 = arith.constant 0.000000e+00 : f32
    %85 = vector.broadcast %cst_69 : f32 to vector<160x128xf32>
    %86 = arith.maximumf %84, %85 : vector<160x128xf32>
    %87 = vector.shape_cast %86 : vector<160x128xf32> to vector<10x16x128xf32>
    %c1_i32 = arith.constant 1 : i32
    %88 = arith.subi %0, %c1_i32 : i32
    %89 = tpu.iota {dimensions = array<i32: 0>} : vector<10x16x128xi32>
    %90 = vector.broadcast %88 : i32 to vector<10x16x128xi32>
    %91 = arith.addi %90, %89 : vector<10x16x128xi32>
    %c0_i32_70 = arith.constant 0 : i32
    %92 = vector.broadcast %c0_i32_70 : i32 to vector<10x16x128xi32>
    %93 = arith.cmpi sge, %91, %92 : vector<10x16x128xi32>
    %c16_i32_71 = arith.constant 16 : i32
    %94 = vector.broadcast %c16_i32_71 : i32 to vector<10x16x128xi32>
    %95 = arith.cmpi slt, %91, %94 : vector<10x16x128xi32>
    %96 = arith.andi %93, %95 : vector<10x16x128xi1>
    %cst_72 = arith.constant 0.000000e+00 : f32
    %97 = vector.broadcast %cst_72 : f32 to vector<10x16x128xf32>
    %98 = arith.select %96, %87, %97 : vector<10x16x128xi1>, vector<10x16x128xf32>
    %99 = arith.truncf %98 : vector<10x16x128xf32> to vector<10x16x128xbf16>
    %c0_73 = arith.constant 0 : index
    %c0_74 = arith.constant 0 : index
    %c0_75 = arith.constant 0 : index
    %100 = vector.load %arg10[%c0_73, %c0_74, %c0_75] : memref<10x16x128xbf16, #tpu.memory_space<vmem>>, vector<10x16x128xbf16>
    tpu.vector_store %arg10[%c0_73, %c0_74, %c0_75], %99 {strides = array<i32>} : memref<10x16x128xbf16, #tpu.memory_space<vmem>>, vector<10x16x128xbf16>,
    %c0_76 = arith.constant 0 : index
    %c0_77 = arith.constant 0 : index
    %c0_78 = arith.constant 0 : index
    %101 = vector.load %arg10[%c0_76, %c0_77, %c0_78] : memref<10x16x128xbf16, #tpu.memory_space<vmem>>, vector<8x16x128xbf16>
    %cst_79 = arith.constant 0.000000e+00 : bf16
    %102 = vector.broadcast %cst_79 : bf16 to vector<8x1x128xbf16>
    %103 = vector.extract_strided_slice %101 {offsets = [0, 0, 0], sizes = [8, 15, 128], strides = [1, 1, 1]} : vector<8x16x128xbf16> to vector<8x15x128xbf16>
    %104 = tpu.concatenate %102, %103 in 1 : vector<8x1x128xbf16>, vector<8x15x128xbf16> -> vector<8x16x128xbf16>
    %105 = vector.shape_cast %104 : vector<8x16x128xbf16> to vector<128x128xbf16>
    %c0_80 = arith.constant 0 : index
    %c0_81 = arith.constant 0 : index
    %106 = vector.load %arg11[%c0_80, %c0_81] : memref<160x1152xbf16, #tpu.memory_space<vmem>>, vector<128x128xbf16>
    tpu.vector_store %arg11[%c0_80, %c0_81], %105 {strides = array<i32>} : memref<160x1152xbf16, #tpu.memory_space<vmem>>, vector<128x128xbf16>,
    %c0_82 = arith.constant 0 : index
    %c0_83 = arith.constant 0 : index
    %c0_84 = arith.constant 0 : index
    %107 = vector.load %arg10[%c0_82, %c0_83, %c0_84] : memref<10x16x128xbf16, #tpu.memory_space<vmem>>, vector<8x16x128xbf16>
    %108 = vector.shape_cast %107 : vector<8x16x128xbf16> to vector<128x128xbf16>
    %c0_85 = arith.constant 0 : index
    %c128_86 = arith.constant 128 : index
    %109 = vector.load %arg11[%c0_85, %c128_86] : memref<160x1152xbf16, #tpu.memory_space<vmem>>, vector<128x128xbf16>
    tpu.vector_store %arg11[%c0_85, %c128_86], %108 {strides = array<i32>} : memref<160x1152xbf16, #tpu.memory_space<vmem>>, vector<128x128xbf16>,
    %c0_87 = arith.constant 0 : index
    %c0_88 = arith.constant 0 : index
    %c0_89 = arith.constant 0 : index
    %110 = vector.load %arg10[%c0_87, %c0_88, %c0_89] : memref<10x16x128xbf16, #tpu.memory_space<vmem>>, vector<8x16x128xbf16>
    %cst_90 = arith.constant 0.000000e+00 : bf16
    %111 = vector.broadcast %cst_90 : bf16 to vector<8x1x128xbf16>
    %112 = vector.extract_strided_slice %110 {offsets = [0, 1, 0], sizes = [8, 15, 128], strides = [1, 1, 1]} : vector<8x16x128xbf16> to vector<8x15x128xbf16>
    %113 = tpu.concatenate %112, %111 in 1 : vector<8x15x128xbf16>, vector<8x1x128xbf16> -> vector<8x16x128xbf16>
    %114 = vector.shape_cast %113 : vector<8x16x128xbf16> to vector<128x128xbf16>
    %c0_91 = arith.constant 0 : index
    %c256_92 = arith.constant 256 : index
    %115 = vector.load %arg11[%c0_91, %c256_92] : memref<160x1152xbf16, #tpu.memory_space<vmem>>, vector<128x128xbf16>
    tpu.vector_store %arg11[%c0_91, %c256_92], %114 {strides = array<i32>} : memref<160x1152xbf16, #tpu.memory_space<vmem>>, vector<128x128xbf16>,
    %c1_93 = arith.constant 1 : index
    %c0_94 = arith.constant 0 : index
    %c0_95 = arith.constant 0 : index
    %116 = vector.load %arg10[%c1_93, %c0_94, %c0_95] : memref<10x16x128xbf16, #tpu.memory_space<vmem>>, vector<8x16x128xbf16>
    %cst_96 = arith.constant 0.000000e+00 : bf16
    %117 = vector.broadcast %cst_96 : bf16 to vector<8x1x128xbf16>
    %118 = vector.extract_strided_slice %116 {offsets = [0, 0, 0], sizes = [8, 15, 128], strides = [1, 1, 1]} : vector<8x16x128xbf16> to vector<8x15x128xbf16>
    %119 = tpu.concatenate %117, %118 in 1 : vector<8x1x128xbf16>, vector<8x15x128xbf16> -> vector<8x16x128xbf16>
    %120 = vector.shape_cast %119 : vector<8x16x128xbf16> to vector<128x128xbf16>
    %c0_97 = arith.constant 0 : index
    %c384_98 = arith.constant 384 : index
    %121 = vector.load %arg11[%c0_97, %c384_98] : memref<160x1152xbf16, #tpu.memory_space<vmem>>, vector<128x128xbf16>
    tpu.vector_store %arg11[%c0_97, %c384_98], %120 {strides = array<i32>} : memref<160x1152xbf16, #tpu.memory_space<vmem>>, vector<128x128xbf16>,
    %c1_99 = arith.constant 1 : index
    %c0_100 = arith.constant 0 : index
    %c0_101 = arith.constant 0 : index
    %122 = vector.load %arg10[%c1_99, %c0_100, %c0_101] : memref<10x16x128xbf16, #tpu.memory_space<vmem>>, vector<8x16x128xbf16>
    %123 = vector.shape_cast %122 : vector<8x16x128xbf16> to vector<128x128xbf16>
    %c0_102 = arith.constant 0 : index
    %c512_103 = arith.constant 512 : index
    %124 = vector.load %arg11[%c0_102, %c512_103] : memref<160x1152xbf16, #tpu.memory_space<vmem>>, vector<128x128xbf16>
    tpu.vector_store %arg11[%c0_102, %c512_103], %123 {strides = array<i32>} : memref<160x1152xbf16, #tpu.memory_space<vmem>>, vector<128x128xbf16>,
    %c1_104 = arith.constant 1 : index
    %c0_105 = arith.constant 0 : index
    %c0_106 = arith.constant 0 : index
    %125 = vector.load %arg10[%c1_104, %c0_105, %c0_106] : memref<10x16x128xbf16, #tpu.memory_space<vmem>>, vector<8x16x128xbf16>
    %cst_107 = arith.constant 0.000000e+00 : bf16
    %126 = vector.broadcast %cst_107 : bf16 to vector<8x1x128xbf16>
    %127 = vector.extract_strided_slice %125 {offsets = [0, 1, 0], sizes = [8, 15, 128], strides = [1, 1, 1]} : vector<8x16x128xbf16> to vector<8x15x128xbf16>
    %128 = tpu.concatenate %127, %126 in 1 : vector<8x15x128xbf16>, vector<8x1x128xbf16> -> vector<8x16x128xbf16>
    %129 = vector.shape_cast %128 : vector<8x16x128xbf16> to vector<128x128xbf16>
    %c0_108 = arith.constant 0 : index
    %c640_109 = arith.constant 640 : index
    %130 = vector.load %arg11[%c0_108, %c640_109] : memref<160x1152xbf16, #tpu.memory_space<vmem>>, vector<128x128xbf16>
    tpu.vector_store %arg11[%c0_108, %c640_109], %129 {strides = array<i32>} : memref<160x1152xbf16, #tpu.memory_space<vmem>>, vector<128x128xbf16>,
    %c2_110 = arith.constant 2 : index
    %c0_111 = arith.constant 0 : index
    %c0_112 = arith.constant 0 : index
    %131 = vector.load %arg10[%c2_110, %c0_111, %c0_112] : memref<10x16x128xbf16, #tpu.memory_space<vmem>>, vector<8x16x128xbf16>
    %cst_113 = arith.constant 0.000000e+00 : bf16
    %132 = vector.broadcast %cst_113 : bf16 to vector<8x1x128xbf16>
    %133 = vector.extract_strided_slice %131 {offsets = [0, 0, 0], sizes = [8, 15, 128], strides = [1, 1, 1]} : vector<8x16x128xbf16> to vector<8x15x128xbf16>
    %134 = tpu.concatenate %132, %133 in 1 : vector<8x1x128xbf16>, vector<8x15x128xbf16> -> vector<8x16x128xbf16>
    %135 = vector.shape_cast %134 : vector<8x16x128xbf16> to vector<128x128xbf16>
    %c0_114 = arith.constant 0 : index
    %c768_115 = arith.constant 768 : index
    %136 = vector.load %arg11[%c0_114, %c768_115] : memref<160x1152xbf16, #tpu.memory_space<vmem>>, vector<128x128xbf16>
    tpu.vector_store %arg11[%c0_114, %c768_115], %135 {strides = array<i32>} : memref<160x1152xbf16, #tpu.memory_space<vmem>>, vector<128x128xbf16>,
    %c2_116 = arith.constant 2 : index
    %c0_117 = arith.constant 0 : index
    %c0_118 = arith.constant 0 : index
    %137 = vector.load %arg10[%c2_116, %c0_117, %c0_118] : memref<10x16x128xbf16, #tpu.memory_space<vmem>>, vector<8x16x128xbf16>
    %138 = vector.shape_cast %137 : vector<8x16x128xbf16> to vector<128x128xbf16>
    %c0_119 = arith.constant 0 : index
    %c896_120 = arith.constant 896 : index
    %139 = vector.load %arg11[%c0_119, %c896_120] : memref<160x1152xbf16, #tpu.memory_space<vmem>>, vector<128x128xbf16>
    tpu.vector_store %arg11[%c0_119, %c896_120], %138 {strides = array<i32>} : memref<160x1152xbf16, #tpu.memory_space<vmem>>, vector<128x128xbf16>,
    %c2_121 = arith.constant 2 : index
    %c0_122 = arith.constant 0 : index
    %c0_123 = arith.constant 0 : index
    %140 = vector.load %arg10[%c2_121, %c0_122, %c0_123] : memref<10x16x128xbf16, #tpu.memory_space<vmem>>, vector<8x16x128xbf16>
    %cst_124 = arith.constant 0.000000e+00 : bf16
    %141 = vector.broadcast %cst_124 : bf16 to vector<8x1x128xbf16>
    %142 = vector.extract_strided_slice %140 {offsets = [0, 1, 0], sizes = [8, 15, 128], strides = [1, 1, 1]} : vector<8x16x128xbf16> to vector<8x15x128xbf16>
    %143 = tpu.concatenate %142, %141 in 1 : vector<8x15x128xbf16>, vector<8x1x128xbf16> -> vector<8x16x128xbf16>
    %144 = vector.shape_cast %143 : vector<8x16x128xbf16> to vector<128x128xbf16>
    %c0_125 = arith.constant 0 : index
    %c1024_126 = arith.constant 1024 : index
    %145 = vector.load %arg11[%c0_125, %c1024_126] : memref<160x1152xbf16, #tpu.memory_space<vmem>>, vector<128x128xbf16>
    tpu.vector_store %arg11[%c0_125, %c1024_126], %144 {strides = array<i32>} : memref<160x1152xbf16, #tpu.memory_space<vmem>>, vector<128x128xbf16>,
    %c0_127 = arith.constant 0 : index
    %c0_128 = arith.constant 0 : index
    %146 = vector.load %arg11[%c0_127, %c0_128] : memref<160x1152xbf16, #tpu.memory_space<vmem>>, vector<128x1152xbf16>
    %c0_129 = arith.constant 0 : index
    %c0_130 = arith.constant 0 : index
    %147 = vector.load %arg6[%c0_129, %c0_130] : memref<1152x128xbf16, #tpu.memory_space<vmem>>, vector<1152x128xbf16>
    %cst_131 = arith.constant dense<0.000000e+00> : vector<128x128xf32>
    %148 = tpu.matmul %146, %147, %cst_131 {dimension_numbers = #tpu.dot_dimension_numbers<[1], [0], [0], [1], [0, 0, 1, 1], [], []>} : vector<128x1152xbf16>, vector<1152x128xbf16>, vector<128x128xf32> -> vector<128x128xf32>
    %149 = vector.shape_cast %148 : vector<128x128xf32> to vector<8x16x128xf32>
    %150 = vector.shape_cast %5 : vector<1x128xf32> to vector<1x1x128xf32>
    %151 = vector.broadcast %150 : vector<1x1x128xf32> to vector<8x16x128xf32>
    %152 = arith.mulf %149, %151 : vector<8x16x128xf32>
    %153 = vector.shape_cast %6 : vector<1x128xf32> to vector<1x1x128xf32>
    %154 = vector.broadcast %153 : vector<1x1x128xf32> to vector<8x16x128xf32>
    %155 = arith.addf %152, %154 : vector<8x16x128xf32>
    %c0_132 = arith.constant 0 : index
    %c0_133 = arith.constant 0 : index
    %c0_134 = arith.constant 0 : index
    %c0_135 = arith.constant 0 : index
    %156 = vector.load %arg2[%c0_132, %c0_133, %c0_134, %c0_135] : memref<1x8x16x128xf32, #tpu.memory_space<vmem>>, vector<1x8x16x128xf32>
    %157 = vector.shape_cast %156 : vector<1x8x16x128xf32> to vector<8x16x128xf32>
    %158 = arith.addf %155, %157 : vector<8x16x128xf32>
    %c0_136 = arith.constant 0 : index
    %c0_137 = arith.constant 0 : index
    %c0_138 = arith.constant 0 : index
    %c0_139 = arith.constant 0 : index
    %159 = vector.load %arg8[%c0_136, %c0_137, %c0_138, %c0_139] : memref<1x8x16x128xf32, #tpu.memory_space<vmem>>, vector<1x8x16x128xf32>
    %160 = vector.shape_cast %159 : vector<1x8x16x128xf32> to vector<8x16x128xf32>
    %161 = vector.shape_cast %158 : vector<8x16x128xf32> to vector<1x8x16x128xf32>
    tpu.vector_store %arg8[%c0_136, %c0_137, %c0_138, %c0_139], %161 {strides = array<i32>} : memref<1x8x16x128xf32, #tpu.memory_space<vmem>>, vector<1x8x16x128xf32>,
    return
  }
  func.func @transform_0(%arg0: i32, %arg1: i32) -> (i32, i32, i32, i32) {
    %c0_i32 = arith.constant 0 : i32
    %c0_i32_0 = arith.constant 0 : i32
    %c0_i32_1 = arith.constant 0 : i32
    return %arg0, %arg1, %c0_i32, %c0_i32_0 : i32, i32, i32, i32
  }
  func.func @transform_1(%arg0: i32, %arg1: i32) -> (i32, i32, i32, i32) {
    %c4_i32 = arith.constant 4 : i32
    %0 = arith.muli %arg1, %c4_i32 : i32
    %c1_i32 = arith.constant 1 : i32
    %1 = arith.subi %0, %c1_i32 : i32
    %c0_i32 = arith.constant 0 : i32
    %2 = arith.maxsi %1, %c0_i32 : i32
    %c0_i32_0 = arith.constant 0 : i32
    %c0_i32_1 = arith.constant 0 : i32
    %c0_i32_2 = arith.constant 0 : i32
    return %arg0, %2, %c0_i32_0, %c0_i32_1 : i32, i32, i32, i32
  }
  func.func @transform_2(%arg0: i32, %arg1: i32) -> (i32, i32, i32, i32) {
    %c1_i32 = arith.constant 1 : i32
    %0 = arith.addi %arg1, %c1_i32 : i32
    %c4_i32 = arith.constant 4 : i32
    %1 = arith.muli %0, %c4_i32 : i32
    %c7_i32 = arith.constant 7 : i32
    %2 = arith.minsi %1, %c7_i32 : i32
    %c0_i32 = arith.constant 0 : i32
    %c0_i32_0 = arith.constant 0 : i32
    %c0_i32_1 = arith.constant 0 : i32
    return %arg0, %2, %c0_i32, %c0_i32_0 : i32, i32, i32, i32
  }
  func.func @transform_3(%arg0: i32, %arg1: i32) -> (i32, i32) {
    %c0_i32 = arith.constant 0 : i32
    %c0_i32_0 = arith.constant 0 : i32
    %c0_i32_1 = arith.constant 0 : i32
    return %c0_i32, %c0_i32_0 : i32, i32
  }
  func.func @transform_4(%arg0: i32, %arg1: i32) -> (i32, i32) {
    %c0_i32 = arith.constant 0 : i32
    %c0_i32_0 = arith.constant 0 : i32
    %c0_i32_1 = arith.constant 0 : i32
    return %c0_i32, %c0_i32_0 : i32, i32
  }
  func.func @transform_5(%arg0: i32, %arg1: i32) -> (i32, i32) {
    %c0_i32 = arith.constant 0 : i32
    %c0_i32_0 = arith.constant 0 : i32
    %c0_i32_1 = arith.constant 0 : i32
    return %c0_i32, %c0_i32_0 : i32, i32
  }
  func.func @transform_6(%arg0: i32, %arg1: i32) -> (i32, i32, i32, i32) {
    %c0_i32 = arith.constant 0 : i32
    %c0_i32_0 = arith.constant 0 : i32
    %c0_i32_1 = arith.constant 0 : i32
    return %arg0, %arg1, %c0_i32, %c0_i32_0 : i32, i32, i32, i32
  }
}

</mosaic_0001>

<bundles_post_ra>
// kernel: tpu_custom_call.1
= control target key start
LH: loop header
LB: loop body
LE: loop exit
PB: predicated region body
PF: predicated region fallthrough
CT: control target
= control target key end

     0   :  { %s8521_s0 = inlined_call_operand.hbm [shape: f32[2,16,16,128], index: 0, kind: input, shape index: {}]   ;;  %s8522_s1 = inlined_call_operand.hbm [shape: f32[2,16,16,128], index: 1, kind: input, shape index: {}]   ;;  %s8523_s2 = inlined_call_operand.hbm [shape: f32[2,16,16,128], index: 2, kind: input, shape index: {}]   ;;  %s8524_s3 = inlined_call_operand.hbm [shape: bf16[1152,128], index: 3, kind: input, shape index: {}]   ;;  %s8525_s4 = inlined_call_operand.hbm [shape: bf16[1152,128], index: 4, kind: input, shape index: {}]   ;;  %s8526_s5 = inlined_call_operand.vmem [shape: f32[8,128], index: 5, kind: input, shape index: {}]   ;;  %s8527_s6 = inlined_call_operand.hbm [shape: f32[2,16,16,128], index: 6, kind: output, shape index: {}]  }
   0x1   :  { %8558 = sst [smem:[#allocation34_spill]] %s8521_s0 }
   0x2   :  { %8559 = sst [smem:[#allocation35_spill]] %s8522_s1 }
   0x3   :  { %8560 = sst [smem:[#allocation36_spill]] %s8523_s2 }
   0x4   :  { %8561 = sst [smem:[#allocation37_spill]] %s8524_s3 }
   0x5   :  { %8562 = sst [smem:[#allocation38_spill]] %s8525_s4 }
   0x6   :  { %8563 = sst [smem:[#allocation39_spill]] %s8526_s5 }
   0x7   :  { %8564 = sst [smem:[#allocation40_spill]] %s8527_s6 }
   0x8   :  { %11 = vsyncpa [#allocation6], 0 }
   0x9   :  { %13 = vsyncpa [#allocation6 + $0x1], 0 }
   0xa   :  { %14 = vsyncpa [#allocation9], 0 }
   0xb   :  { %16 = vsyncpa [#allocation9 + $0x1], 0 }
   0xc   :  { %17 = vsyncpa [#allocation12], 0 }
   0xd   :  { %18 = vsyncpa [#allocation7], 0 }
   0xe   :  { %20 = vsyncpa [#allocation7 + $0x1], 0  ;;  %s6399_s21 = smov 0   ;;  %s6401_s22 = smov 0  }
   0xf   :  { %s6403_s23 = smov 0   ;;  %s6405_s24 = smov 0  }
  0x10   :  { %s6407_s25 = smov 0   ;;  %s6409_s26 = smov 0  }
  0x11   :  { %s6411_s27 = smov 0   ;;  %s6413_s28 = smov 0  }
  0x12   :  { %s6415_s29 = smov 0   ;;  %s6417_s30 = smov 0  }
  0x13   :  { %s6419_s7 = smov 0   ;;  %s6421_s8 = smov 0  }
  0x14   :  { %s6423_s9 = smov 0   ;;  %s6425_s10 = smov 0  }
  0x15 LB: > { %8565 = sst [smem:[#allocation20_spill]] %s6298_s21  ;;  %s6470_s11 = sadd.s32 4294967295, %s6350_s10   ;;  %s6350_s10 = sphi %s6425_s10, %s26_s10   ;;  %s6346_s9 = sphi %s6423_s9, %s8722_s9   ;;  %s6342_s8 = sphi %s6421_s8, %s8721_s8   ;;  %s6338_s7 = sphi %s6419_s7, %s8733_s7   ;;  %s6334_s30 = sphi %s6417_s30, %s8732_s30   ;;  %s6330_s29 = sphi %s6415_s29, %s8731_s29   ;;  %s6326_s28 = sphi %s6413_s28, %s8730_s28   ;;  %s6322_s27 = sphi %s6411_s27, %s8729_s27   ;;  %s6318_s26 = sphi %s6409_s26, %s8728_s26   ;;  %s6314_s25 = sphi %s6407_s25, %s8727_s25   ;;  %s6310_s24 = sphi %s6405_s24, %s8726_s24   ;;  %s6306_s23 = sphi %s6403_s23, %s8725_s23   ;;  %s6302_s22 = sphi %s6401_s22, %s8715_s22   ;;  %s6298_s21 = sphi %s6399_s21, %s8724_s21  }
  0x16   : > { %8566 = sst [smem:[#allocation21_spill]] %s6302_s22  ;;  %p4716_p0 = scmp.ge.s32.totalorder %s6350_s10, 1 }
  0x17   : > { %8567 = sst [smem:[#allocation22_spill]] %s6306_s23  ;;  %p8529_p1 = scmp.eq.s32.totalorder %s6470_s11, 0 }
  0x18   : > { %8568 = sst [smem:[#allocation23_spill]] %s6314_s25  ;;  %p234_p3 = scmp.lt.s32.totalorder %s6350_s10, 5 }
  0x19   : > { %8569 = sst [smem:[#allocation24_spill]] %s6334_s30  ;;  %s6352_s13 = smov [#allocation11]  }
  0x1a   : > { %8570 = sst [smem:[#allocation25_spill]] %s6338_s7  ;;  %p6476_p4 = pnand %p4716_p0, %p234_p3 }
  0x1b   : > { %8571 = sst [smem:[#allocation26_spill]] %s6342_s8  ;;  %s246_s14 = sshll.u32 %s6352_s13, 4  ;;  %s247_s14 = int_to_ptr.vmem [resolvable:$true] %s246_s14 }
  0x1c   : > { %8572 = sst [smem:[#allocation27_spill]] %s6346_s9  ;;  %p5755_p5 = pneg %p6476_p4 }
  0x1d   : > { %s8573_s12 = scalar_select %p6476_p4, 1, 0 }
  0x1e   : > { %p6484_p6 = pnand %p5755_p5, %p8529_p1  ;;  %s8576_s3 = sld [smem:[#allocation37_spill]] }
  0x1f   : > { %8574 = sst [smem:[#allocation28_spill]] %s8573_s12 }
  0x20   : > { %p8547_p8 = pneg %p6484_p6 }
  0x24   : > { %s6046_s18 = scalar_lea.hbm %s8576_s3, 9216 }
  0x25   : > { %p6047_p7 = scmp.ne.s32.totalorder %s8576_s3, %s6046_s18  ;;  %p6053_p11 = scmp.lt.u32.totalorder %s6046_s18, %s8576_s3 }
  0x27   : > { %p6049_p9 = pnand %p8547_p8, %p6047_p7 }
  0x29   : > { %p6050_p10 = pneg %p6049_p9 }
  0x2b   : > { %p6055_p12 = pnand %p6053_p11, %p6050_p10 }
  0x2d   : > { %6058 = shalt.err (!%p6055_p12)
}
  0x2e   : > { %s6059_s16 = scalar_lea.vmem %s247_s14, 9216  ;;  %p6067_p5 = scmp.lt.s32.totalorder %s247_s14, %s247_s14 }
  0x2f   : > { %p6060_p13 = scmp.ne.s32.totalorder %s247_s14, %s6059_s16  ;;  %p6068_p2 = scmp.lt.s32.totalorder %s6059_s16, %s6059_s16 }
  0x31   : > { %p6062_p0 = pnand %p6060_p13, %p8547_p8  ;;  %p6069_p1 = por %p6068_p2, %p6067_p5 }
  0x33   : > { %p6063_p3 = pneg %p6062_p0 }
  0x35   : > { %p6070_p4 = pnand %p6069_p1, %p6063_p3 }
  0x37   : > { %6073 = shalt.err (!%p6070_p4)
}
  0x38   : > { %s8533_s17 = smov 64   ;;  %s8534_s6 = smov 4  }
  0x39   : > { %5758 = dma.hbm_to_vmem [thread:$0]  (!%p6484_p6), %s8576_s3, 9216, %s247_s14, [#allocation12], %s8533_s17, %s8533_s17, %s8534_s6  }
  0x3a   : > { %s35_s20 = sadd.s32 1, %s6342_s8  ;;  %s38_s13 = sadd.s32 1, %s6346_s9 }
  0x3b   : > { %p36_p1 = scmp.ge.s32.totalorder %s35_s20, 2  ;;  %p8546_p2 = scmp.eq.s32.totalorder %s6350_s10, 0 }
  0x3c   : > { %s4710_s16 = sshll.u32 %s6342_s8, 2  ;;  %s83_s7 = sadd.s32 1, %s6318_s26 }
  0x3d   : > { %s8735_s20 = smov (%p36_p1, %s35_s20), 0  ;;  %s8737_s13 = smov (!%p36_p1, %s38_s13), %s6346_s9 }
  0x3e   : > { %8577 = sst [smem:[#allocation29_spill]] %s8735_s20  ;;  %s43_s5 = ssub.s32 %s6342_s8, %s8735_s20 }
  0x3f   : > { %s4711_s30 = sadd.s32 4294967295, %s4710_s16  ;;  %p40_p4 = scmp.ge.s32.totalorder %s8737_s13, 2 }
  0x40   : > { %p72_p7 = scmp.gt.s32.totalorder %s4711_s30, 0  ;;  %s4712_s14 = sshll.u32 %s8735_s20, 2 }
  0x41   : > { %p90_p9 = scmp.ne.s32.totalorder %s6318_s26, %s6314_s25  ;;  %s8739_s13 = smov (%p40_p4, %s8737_s13), 0 }
  0x42   : > { %8578 = sst [smem:[#allocation30_spill]] %s8739_s13  ;;  %s8741_s30 = smov (!%p72_p7, %s4711_s30), 0 }
  0x43   : > { %s6530_s18 = ssub.s32 %s6346_s9, %s8739_s13  ;;  %s4713_s19 = sadd.s32 4294967295, %s4712_s14 }
  0x44   : > { %8579 = sst [smem:[#allocation31_spill]] %s6530_s18  ;;  %s6533_s17 = sor.u32 %s43_s5, %s6530_s18 }
  0x45   : > { %p76_p10 = scmp.gt.s32.totalorder %s4713_s19, 0  ;;  %p6538_p12 = por %p90_p9, %p8546_p2 }
  0x46   : > { %p96_p13 = scmp.ne.s32.totalorder %s6314_s25, %s6310_s24  ;;  %s6544_s3 = sadd.s32 4, %s4710_s16 }
  0x47   : > { %s8743_s19 = smov (!%p76_p10, %s4713_s19), 0  ;;  %p8581_p3 = scmp.eq.s32.totalorder %s6470_s11, 0 }
  0x48   : > { %s79_s13 = ssub.s32 %s8741_s30, %s8743_s19  ;;  %s6554_s12 = sadd.s32 4, %s4712_s14 }
  0x49   : > { %s80_s5 = sor.u32 %s79_s13, %s6530_s18  ;;  %p6550_p5 = por %p96_p13, %p8581_p3 }
  0x4a   : > { %p81_p1 = scmp.eq.s32.totalorder %s80_s5, 0  ;;  %p8545_p7 = scmp.lt.s32.totalorder %s6350_s10, 4 }
  0x4b   : > { %s8582_s20 = scalar_select %p6550_p5, 1, 0 }
  0x4c   : > { %s6559_s24 = scalar_select %p81_p1, %s6318_s26, %s83_s7  }
  0x4d   : > { %8583 = sst [smem:[#allocation32_spill]] %s8582_s20  ;;  %s6562_s16 = sshll.u32 %s6346_s9, 5 }
  0x4e   : > { %s300_s19 = sand.u32 1, %s6350_s10   ;;  %s302_s13 = sand.u32 1, %s6318_s26  }
  0x4f   : > { %s4725_s25 = sshll.u32 %s302_s13, 5  ;;  %s4910_s2 = sshll.u32 %s8741_s30, 2 }
  0x50   : > { %s315_s18 = sadd.s32 %s4910_s2, %s6562_s16  ;;  %s304_s20 = scalar_lea.vmem [#allocation8], %s4725_s25 }
  0x51   : > { %s4731_s21 = sshll.u32 %s315_s18, 7  ;;  %s318_s5 = sshll.u32 %s304_s20, 4  ;;  %s6572_s5 = int_to_ptr.vmem [resolvable:$true] %s318_s5 }
  0x52   : > { %s8584_s1 = sld [smem:[#allocation35_spill]]  ;;  %p6578_p9 = pnand %p8545_p7, %p6538_p12 }
  0x53   : > { %s6355_s2 = smov [#allocation13]  }
  0x54   : > { %s259_s25 = sshll.u32 %s6355_s2, 4  ;;  %p6076_p13 = pneg %p6578_p9  ;;  %s6582_s25 = int_to_ptr.vmem [resolvable:$true] %s259_s25 }
  0x58   : > { %s6570_s14 = scalar_lea.hbm %s8584_s1, %s4731_s21  ;;  %s6584_s21 = scalar_lea.sflag [#allocation9], %s300_s19 }
  0x59   : > { %s6074_s22 = scalar_lea.hbm %s6570_s14, 512  ;;  %s6079_s6 = scalar_lea.hbm %s8584_s1, 8192 }
  0x5a   : > { %p6075_p10 = scmp.ne.s32.totalorder %s6570_s14, %s6074_s22  ;;  %p6080_p12 = scmp.lt.u32.totalorder %s6570_s14, %s8584_s1 }
  0x5b   : > { %p6081_p4 = scmp.lt.u32.totalorder %s6079_s6, %s6074_s22  ;;  %p6083_p7 = scmp.lt.u32.totalorder %s6074_s22, %s6570_s14 }
  0x5c   : > { %p6077_p3 = pnand %p6076_p13, %p6075_p10 }
  0x5d   : > { %p6082_p0 = por %p6081_p4, %p6080_p12 }
  0x5e   : > { %p6078_p1 = pneg %p6077_p3 }
  0x5f   : > { %p6084_p2 = por %p6083_p7, %p6082_p0 }
  0x61   : > { %p6085_p11 = pnand %p6084_p2, %p6078_p1 }
  0x63   : > { %6088 = shalt.err (!%p6085_p11)
}
  0x64   : > { %s6089_s19 = scalar_lea.vmem %s6572_s5, 512  ;;  %s6356_s13 = smov [#allocation8]  }
  0x65   : > { %p6090_p10 = scmp.ne.s32.totalorder %s6572_s5, %s6089_s19  ;;  %s6094_s2 = sshll.u32 %s6356_s13, 4  ;;  %s6095_s2 = int_to_ptr.vmem [resolvable:$false] %s6094_s2 }
  0x66   : > { %s6096_s23 = scalar_lea.vmem %s6095_s2, 1024  ;;  %p6097_p5 = scmp.lt.s32.totalorder %s6572_s5, %s6095_s2 }
  0x67   : > { %p6092_p3 = pnand %p6090_p10, %p6076_p13  ;;  %p6098_p4 = scmp.lt.s32.totalorder %s6096_s23, %s6089_s19 }
  0x69   : > { %p6093_p8 = pneg %p6092_p3  ;;  %p6099_p12 = por %p6098_p4, %p6097_p5 }
  0x6b   : > { %p6100_p0 = pnand %p6099_p12, %p6093_p8 }
  0x6d   : > { %6103 = shalt.err (!%p6100_p0)
}
  0x6e   : > { %s8549_s22 = smov 128   ;;  %s8551_s30 = smov 8  }
  0x6f   : > { %5768 = dma.hbm_to_vmem [thread:$0]  (!%p6578_p9), %s6570_s14, 512, %s6572_s5, %s6584_s21, %s8549_s22, %s8549_s22, %s8551_s30  }
  0x70   : > { %s8586_s4 = sld [smem:[#allocation38_spill]]  ;;  %p8587_p2 = pneg %p6484_p6 }
  0x76   : > { %s6104_s18 = scalar_lea.hbm %s8586_s4, 9216 }
  0x77   : > { %p6105_p8 = scmp.ne.s32.totalorder %s8586_s4, %s6104_s18  ;;  %p6111_p7 = scmp.lt.u32.totalorder %s6104_s18, %s8586_s4 }
  0x79   : > { %p6107_p11 = pnand %p6105_p8, %p8587_p2 }
  0x7b   : > { %p6108_p5 = pneg %p6107_p11 }
  0x7d   : > { %p6113_p13 = pnand %p6111_p7, %p6108_p5 }
  0x7f   : > { %6116 = shalt.err (!%p6113_p13)
}
  0x80   : > { %s6117_s5 = scalar_lea.vmem %s6582_s25, 9216  ;;  %p8588_p1 = pmov %p8587_p2 }
  0x81   : > { %p6118_p9 = scmp.ne.s32.totalorder %s6582_s25, %s6117_s5  ;;  %p6125_p4 = scmp.lt.s32.totalorder %s6582_s25, %s6582_s25 }
  0x82   : > { %p6126_p12 = scmp.lt.s32.totalorder %s6117_s5, %s6117_s5 }
  0x83   : > { %p6120_p10 = pnand %p6118_p9, %p8588_p1 }
  0x84   : > { %p6127_p0 = por %p6126_p12, %p6125_p4 }
  0x85   : > { %p6121_p3 = pneg %p6120_p10 }
  0x87   : > { %p6128_p8 = pnand %p6127_p0, %p6121_p3 }
  0x89   : > { %6131 = shalt.err (!%p6128_p8)
}
  0x8a   : > { %s8589_s14 = smov 4   ;;  %s8590_s7 = smov 64  }
  0x8b   : > { %5761 = dma.hbm_to_vmem [thread:$0]  (!%p6484_p6), %s8586_s4, 9216, %s6582_s25, [#allocation12], %s8590_s7, %s8590_s7, %s8589_s14  }
  0x8c   : > { %s4709_s15 = sadd.s32 4294967294, %s6350_s10   ;;  %s47_s18 = sadd.s32 1, %s6330_s29 }
  0x8d   : > { %p54_p2 = scmp.ne.s32.totalorder %s6330_s29, %s6326_s28  ;;  %p8591_p11 = scmp.eq.s32.totalorder %s6533_s17, 0 }
  0x8e   : > { %p8593_p5 = scmp.eq.s32.totalorder %s6350_s10, 0  ;;  %p60_p13 = scmp.ne.s32.totalorder %s6326_s28, %s6322_s27 }
  0x8f   : > { %s6650_s19 = scalar_select %p8591_p11, %s6330_s29, %s47_s18  }
  0x90   : > { %p6654_p7 = por %p8593_p5, %p54_p2  ;;  %p8595_p9 = scmp.eq.s32.totalorder %s6470_s11, 3 }
  0x91   : > { %8592 = sst [smem:[#allocation33_spill]] %s6650_s19  ;;  %p227_p6 = scmp.eq.s32.totalorder %s4709_s15, 3 }
  0x92   : > { %p6662_p1 = por %p8595_p9, %p54_p2  ;;  %p8597_p10 = scmp.eq.s32.totalorder %s6470_s11, 0 }
  0x93   : > { %s276_s17 = sand.u32 1, %s6330_s29   ;;  %p6673_p4 = por %p227_p6, %p60_p13 }
  0x94   : > { %s8596_s2 = scalar_select %p6662_p1, 1, 0 }
  0x95   : > { %p6668_p3 = por %p8597_p10, %p60_p13  ;;  %s4720_s5 = sshll.u32 %s276_s17, 7 }
  0x96   : > { %s8599_s23 = scalar_select %p6673_p4, 1, 0 }
  0x97   : > { %s4909_s14 = sshll.u32 %s6342_s8, 4  ;;  %s280_s20 = scalar_lea.vmem [#allocation5], %s4720_s5 }
  0x98   : > { %s287_s7 = sadd.s32 %s4909_s14, %s6562_s16  ;;  %s290_s18 = sshll.u32 %s280_s20, 4  ;;  %s6684_s18 = int_to_ptr.vmem [resolvable:$true] %s290_s18 }
  0x99   : > { %s4724_s6 = sshll.u32 %s287_s7, 7  ;;  %s8600_s0 = sld [smem:[#allocation34_spill]] }
  0x9a   : > { %p8601_p12 = scmp.lt.s32.totalorder %s6350_s10, 4  ;;  %s6694_s5 = scalar_lea.sflag [#allocation6], %s276_s17 }
  0x9c   : > { %p6690_p0 = pnand %p8601_p12, %p6654_p7 }
  0x9e   : > { %p6134_p2 = pneg %p6690_p0 }
  0x9f   : > { %s6682_s15 = scalar_lea.hbm %s8600_s0, %s4724_s6  ;;  %s6137_s13 = scalar_lea.hbm %s8600_s0, 8192 }
  0xa0   : > { %s6132_s14 = scalar_lea.hbm %s6682_s15, 2048  ;;  %p6138_p7 = scmp.lt.u32.totalorder %s6682_s15, %s8600_s0 }
  0xa1   : > { %p6133_p8 = scmp.ne.s32.totalorder %s6682_s15, %s6132_s14  ;;  %p6139_p13 = scmp.lt.u32.totalorder %s6137_s13, %s6132_s14 }
  0xa2   : > { %p6141_p6 = scmp.lt.u32.totalorder %s6132_s14, %s6682_s15 }
  0xa3   : > { %p6135_p11 = pnand %p6134_p2, %p6133_p8  ;;  %p6140_p9 = por %p6139_p13, %p6138_p7 }
  0xa5   : > { %p6136_p5 = pneg %p6135_p11  ;;  %p6142_p10 = por %p6141_p6, %p6140_p9 }
  0xa7   : > { %p6143_p12 = pnand %p6142_p10, %p6136_p5 }
  0xa9   : > { %6146 = shalt.err (!%p6143_p12)
}
  0xaa   : > { %s6147_s17 = scalar_lea.vmem %s6684_s18, 2048  ;;  %s6359_s20 = smov [#allocation5]  }
  0xab   : > { %p6148_p8 = scmp.ne.s32.totalorder %s6684_s18, %s6147_s17  ;;  %s6152_s22 = sshll.u32 %s6359_s20, 4  ;;  %s6153_s22 = int_to_ptr.vmem [resolvable:$false] %s6152_s22 }
  0xac   : > { %s6154_s30 = scalar_lea.vmem %s6153_s22, 4096  ;;  %p6155_p1 = scmp.lt.s32.totalorder %s6684_s18, %s6153_s22 }
  0xad   : > { %p6150_p11 = pnand %p6148_p8, %p6134_p2  ;;  %p6156_p7 = scmp.lt.s32.totalorder %s6154_s30, %s6147_s17 }
  0xaf   : > { %p6151_p4 = pneg %p6150_p11  ;;  %p6157_p13 = por %p6156_p7, %p6155_p1 }
  0xb1   : > { %p6158_p9 = pnand %p6157_p13, %p6151_p4 }
  0xb3   : > { %6161 = shalt.err (!%p6158_p9)
}
  0xb4   : > { %s8603_s14 = smov 8   ;;  %s8604_s13 = smov 128  }
  0xb5   : > { %s8605_s7 = sld [smem:[#allocation22_spill]]  ;;  %s8606_s6 = sld [smem:[#allocation21_spill]] }
  0xb6   : > { %s8607_s20 = sld [smem:[#allocation20_spill]]  ;;  %s8608_s17 = sld [smem:[#allocation31_spill]] }
  0xb7   : > { %5765 = dma.hbm_to_vmem [thread:$0]  (!%p6690_p0), %s6682_s15, 2048, %s6684_s18, %s6694_s5, %s8604_s13, %s8604_s13, %s8603_s14  }
  0xb8   : > { %p8609_p1 = scmp.lt.s32.totalorder %s6544_s3, 7  ;;  %p8610_p4 = scmp.lt.s32.totalorder %s6554_s12, 7 }
  0xb9   : > { %p8611_p6 = scmp.eq.s32.totalorder %s6350_s10, 0  ;;  %p8613_p8 = scmp.eq.s32.totalorder %s6470_s11, 0 }
  0xba   : > { %s8745_s3 = smov (!%p8609_p1, %s6544_s3), 7  ;;  %s8747_s12 = smov (!%p8610_p4, %s6554_s12), 7 }
  0xbb   : > { %s119_s1 = sadd.s32 1, %s8605_s7  ;;  %p126_p2 = scmp.ne.s32.totalorder %s8605_s7, %s8606_s6 }
  0xbc   : > { %s115_s22 = ssub.s32 %s8745_s3, %s8747_s12  ;;  %p132_p5 = scmp.ne.s32.totalorder %s8606_s6, %s8607_s20 }
  0xbd   : > { %s116_s30 = sor.u32 %s115_s22, %s8608_s17  ;;  %p6739_p10 = por %p126_p2, %p8611_p6 }
  0xbe   : > { %p117_p12 = scmp.eq.s32.totalorder %s116_s30, 0  ;;  %p6745_p11 = por %p132_p5, %p8613_p8 }
  0xbf   : > { %s330_s15 = sand.u32 1, %s8605_s7   ;;  %s4913_s5 = sshll.u32 %s8745_s3, 2 }
  0xc0   : > { %s8614_s18 = scalar_select %p6745_p11, 1, 0 }
  0xc1   : > { %s8749_s7 = smov (!%p117_p12, %s8605_s7), %s119_s1  ;;  %s4732_s12 = sshll.u32 %s330_s15, 5 }
  0xc2   : > { %s343_s4 = sadd.s32 %s4913_s5, %s6562_s16  ;;  %s8615_s22 = sld [smem:[#allocation36_spill]] }
  0xc3   : > { %s4737_s6 = sshll.u32 %s343_s4, 7  ;;  %s332_s30 = scalar_lea.vmem [#allocation10], %s4732_s12 }
  0xc4   : > { %s346_s8 = sshll.u32 %s332_s30, 4  ;;  %p8617_p0 = scmp.lt.s32.totalorder %s6350_s10, 4  ;;  %s6759_s8 = int_to_ptr.vmem [resolvable:$true] %s346_s8 }
  0xc6   : > { %p6765_p7 = pnand %p8617_p0, %p6739_p10 }
  0xc8   : > { %s8616_s19 = smov %s8615_s22  ;;  %s6757_s9 = scalar_lea.hbm %s8615_s22, %s4737_s6 }
  0xc9   : > { %s6162_s4 = scalar_lea.hbm %s6757_s9, 512  ;;  %p6164_p9 = pneg %p6765_p7 }
  0xca   : > { %p6163_p13 = scmp.ne.s32.totalorder %s6757_s9, %s6162_s4  ;;  %s6167_s15 = scalar_lea.hbm %s8616_s19, 8192 }
  0xcb   : > { %p6168_p2 = scmp.lt.u32.totalorder %s6757_s9, %s8616_s19  ;;  %p6169_p5 = scmp.lt.u32.totalorder %s6167_s15, %s6162_s4 }
  0xcc   : > { %p6165_p1 = pnand %p6164_p9, %p6163_p13  ;;  %p6171_p10 = scmp.lt.u32.totalorder %s6162_s4, %s6757_s9 }
  0xcd   : > { %p6170_p6 = por %p6169_p5, %p6168_p2 }
  0xce   : > { %p6166_p4 = pneg %p6165_p1 }
  0xcf   : > { %p6172_p12 = por %p6171_p10, %p6170_p6 }
  0xd1   : > { %p6173_p8 = pnand %p6172_p12, %p6166_p4 }
  0xd3   : > { %6176 = shalt.err (!%p6173_p8)
}
  0xd4   : > { %s6177_s12 = scalar_lea.vmem %s6759_s8, 512  ;;  %s6360_s6 = smov [#allocation10]  }
  0xd5   : > { %p6178_p0 = scmp.ne.s32.totalorder %s6759_s8, %s6177_s12  ;;  %s6182_s20 = sshll.u32 %s6360_s6, 4  ;;  %s6183_s20 = int_to_ptr.vmem [resolvable:$false] %s6182_s20 }
  0xd6   : > { %s6184_s17 = scalar_lea.vmem %s6183_s20, 1024  ;;  %p6185_p11 = scmp.lt.s32.totalorder %s6759_s8, %s6183_s20 }
  0xd7   : > { %p6180_p13 = pnand %p6178_p0, %p6164_p9  ;;  %p6186_p2 = scmp.lt.s32.totalorder %s6184_s17, %s6177_s12 }
  0xd9   : > { %p6181_p1 = pneg %p6180_p13  ;;  %p6187_p5 = por %p6186_p2, %p6185_p11 }
  0xdb   : > { %p6188_p6 = pnand %p6187_p5, %p6181_p1 }
  0xdd   : > { %6191 = shalt.err (!%p6188_p6)
}
  0xde   : > { %5771 = dma.hbm_to_vmem [thread:$0]  (!%p6765_p7), %s6757_s9, 512, %s6759_s8, %s6584_s21, %s8604_s13, %s8604_s13, %s8603_s14  }
  0xdf   : > { %s8619_s22 = sld [smem:[#allocation28_spill]] }
  0xe5   : > { %p8620_p9 = scmp.ne.s32.totalorder %s8619_s22, 0 }
  0xe6   : > { %s6801_s30 = sand.u32 (!%p8620_p9), 1, %s6326_s28  }
  0xe7   : > { %358 = sbr.rel (%p8620_p9) target bundleno = 1081 (0x439), region = 44  ;;  %s4739_s4 = sshll.u32 (!%p8620_p9), %s6801_s30, 7 }
  0xe8   : > { %s361_s16 = scalar_lea.sflag (!%p8620_p9), [#allocation6], %s6801_s30  ;;  %s6807_s3 = scalar_lea.vmem (!%p8620_p9), [#allocation5], %s4739_s4 }
  0xee   : > { %6277 = dma.done.wait (%p6668_p3), %s361_s16, 2048  }
  0xef   : > { %6279 = vsyncadd (%p6668_p3), %s361_s16, 4294965248  ;;  %s8621_s8 = sld [smem:[#allocation23_spill]]  ;;  %s8622_s9 = sld [smem:[#allocation32_spill]] }
  0xf0   : > { %s369_s21 = sand.u32 1, %s6470_s11  }
  0xf1   : > { %s370_s1 = scalar_lea.sflag [#allocation9], %s369_s21 }
  0xf5   : > { %s371_s14 = sand.u32 1, %s8621_s8   ;;  %p8623_p11 = scmp.ne.s32.totalorder %s8622_s9, 0 }
  0xf6   : > { %s4740_s13 = sshll.u32 %s371_s14, 5 }
  0xf7   : > { %s6815_s15 = scalar_lea.vmem [#allocation8], %s4740_s13 }
  0xf8   : > { %6281 = dma.done.wait (%p8623_p11), %s370_s1, 512  }
  0xf9   : > { %6283 = vsyncadd (%p8623_p11), %s370_s1, 4294966784  ;;  %s8624_s0 = sld [smem:[#allocation21_spill]]  ;;  %p8625_p3 = scmp.ne.s32.totalorder %s8614_s18, 0 }
  0xff   : > { %s380_s5 = sand.u32 1, %s8624_s0  }
 0x100   : > { %s4741_s12 = sshll.u32 %s380_s5, 5 }
 0x101   : > { %s6822_s25 = scalar_lea.vmem [#allocation10], %s4741_s12 }
 0x102   : > { %6285 = dma.done.wait (%p8625_p3), %s370_s1, 512  }
 0x103   : > { %6287 = vsyncadd (%p8625_p3), %s370_s1, 4294966784  ;;  %p8626_p7 = scmp.eq.s32.totalorder %s6470_s11, 0 }
 0x105   : > { %6289 = dma.done.wait (%p8626_p7), [#allocation12], 18432   ;;  %p8627_p4 = pmov %p8626_p7 }
 0x106   : > { %v5902_v0 = vld [vmem:[#allocation11 + $0x40] sm:$0xff]   ;;  %v5906_v4 = vld [vmem:[#allocation11 + $0x48] sm:$0xff]   ;;  %s8628_s18 = sld [smem:[#allocation24_spill]]  ;;  %v5910_v8 = vld [vmem:[#allocation11 + $0x50] sm:$0xff]   ;;  %vm716_vm4 = vcmask 1040384   ;;  %s8631_s22 = sld [smem:[#allocation39_spill]] }
 0x107   : > { %6291 = vsyncadd (%p8627_p4), [#allocation12], 4294948864  ;;  %v5903_v1 = vld [vmem:[#allocation11 + $0xc0] sm:$0xff]   ;;  %5077 = vmatprep.subr.bf16.mxu0 %v5902_v0  ;;  %v5907_v5 = vld [vmem:[#allocation11 + $0xc8] sm:$0xff]   ;;  %vm717_vm5 = vsmask.f32 256 }
 0x108   : > { %v5904_v2 = vld [vmem:[#allocation11] sm:$0xff]   ;;  %5153 = vmatprep.subr.bf16.mxu1 %v5903_v1  ;;  %v5908_v6 = vld [vmem:[#allocation11 + $0x8] sm:$0xff]   ;;  %v5911_v9 = vld [vmem:[#allocation11 + $0xd0] sm:$0xff]   ;;  %vm849_vm7 = vcmask 1047552   ;;  %vm850_vm8 = vsmask.f32 7424 }
 0x109   : > { %v5905_v3 = vld [vmem:[#allocation11 + $0x80] sm:$0xff]   ;;  %5078 = vmatpush3.bf16.msra.mxu0 %v5904_v2  ;;  %v5909_v7 = vld [vmem:[#allocation11 + $0x88] sm:$0xff]   ;;  %v5912_v10 = vld [vmem:[#allocation11 + $0x10] sm:$0xff]   ;;  %p8711_p12 = scmp.ne.s32.totalorder %s8596_s2, 0 }
 0x10a   : > { %5154 = vmatpush3.bf16.msra.mxu1 %v5905_v3  ;;  %5079 = vmatprep.subr.bf16.mxu0 %v5906_v4  ;;  %v5913_v11 = vld [vmem:[#allocation11 + $0x90] sm:$0xff]   ;;  %v5914_v12 = vld [vmem:[#allocation11 + $0x58] sm:$0xff]   ;;  %v5918_v16 = vld [vmem:[#allocation11 + $0x60] sm:$0xff]  }
 0x10b   : > { %5155 = vmatprep.subr.bf16.mxu1 %v5907_v5  ;;  %v5915_v13 = vld [vmem:[#allocation11 + $0xd8] sm:$0xff]   ;;  %v5919_v17 = vld [vmem:[#allocation11 + $0xe0] sm:$0xff]   ;;  %v5922_v20 = vld [vmem:[#allocation11 + $0x68] sm:$0xff]  }
 0x10c   : > { %v5916_v14 = vld [vmem:[#allocation11 + $0x18] sm:$0xff]   ;;  %s4745_s11 = sshll.u32 %s8628_s18, 3  ;;  %v5920_v18 = vld [vmem:[#allocation11 + $0x20] sm:$0xff]   ;;  %v5923_v21 = vld [vmem:[#allocation11 + $0xe8] sm:$0xff]   ;;  %s8632_s16 = smov %s8631_s22 }
 0x10d   : > { %5080 = vmatpush3.bf16.msra.mxu0 %v5908_v6  ;;  %v5917_v15 = vld [vmem:[#allocation11 + $0x98] sm:$0xff]   ;;  %s4746_s6 = sadd.s32 4294967294, %s4745_s11  ;;  %v5921_v19 = vld [vmem:[#allocation11 + $0xa0] sm:$0xff]   ;;  %v5924_v23 = vld [vmem:[#allocation11 + $0x28] sm:$0xff]   ;;  %s4823_s21 = sadd.s32 4294967295, %s4745_s11 }
 0x10e   : > { %5156 = vmatpush3.bf16.msra.mxu1 %v5909_v7  ;;  %5081 = vmatprep.subr.bf16.mxu0 %v5910_v8  ;;  %v6835_v22 = vstv %s4746_s6  ;;  %v5925_v24 = vld [vmem:[#allocation11 + $0xa8] sm:$0xff]   ;;  %v5926_v25 = vld [vmem:[#allocation11 + $0x70] sm:$0xff]   ;;  %v5930_v31 = vld [vmem:[#allocation11 + $0x78] sm:$0xff]   ;;  %s8369_s11 = scalar_lea.vmem [#allocation14], %s4739_s4  ;;  %s8708_s4 = sld [smem:[#allocation25_spill]] }
 0x10f   : > { %5157 = vmatprep.subr.bf16.mxu1 %v5911_v9  ;;  %vm486_vm0 = vcmp.ge.s32.totalorder %v6835_v22, 0  ;;  %vm498_vm1 = vcmp.lt.s32.totalorder %v6835_v22, 16  ;;  %v5927_v26 = vld [vmem:[#allocation11 + $0xf0] sm:$0xff]   ;;  %v475_v30 = vadd.s32 1, %v6835_v22  ;;  %v5931_v32 = vld [vmem:[#allocation11 + $0xf8] sm:$0xff]   ;;  %v476_v33 = vadd.s32 2, %v6835_v22 }
 0x110   : > { %v5928_v27 = vld [vmem:[#allocation11 + $0x30] sm:$0xff]   ;;  %vm6839_vm2 = vmand %vm486_vm0, %vm498_vm1  ;;  %v5932_v34 = vld [vmem:[#allocation11 + $0x38] sm:$0xff]   ;;  %v6846_v35 = vadd.s32 3, %v6835_v22  ;;  %v6864_v44 = vadd.s32 4, %v6835_v22  ;;  %v6867_v45 = vadd.s32 5, %v6835_v22  ;;  %v6870_v46 = vadd.s32 6, %v6835_v22 }
 0x111   : > { %5082 = vmatpush3.bf16.msra.mxu0 %v5912_v10  ;;  %v5929_v29 = vld [vmem:[#allocation11 + $0xb0] sm:$0xff]   ;;  %v5933_v36 = vld [vmem:[#allocation11 + $0xb8] sm:$0xff]   ;;  %vm487_vm3 = vcmp.ge.s32.totalorder %v475_v30, 0  ;;  %v6851_v37 = vld [vmem:[%s8631_s22] ss:$0 sm:$0xff]  ;;  %vm499_vm6 = vcmp.lt.s32.totalorder %v475_v30, 16 }
 0x112   : > { %5158 = vmatpush3.bf16.msra.mxu1 %v5913_v11  ;;  %5083 = vmatprep.subr.bf16.mxu0 %v5914_v12  ;;  %v6856_v38 = vld [vmem:[%s8632_s16 + $0x1] ss:$0 sm:$0xff]  ;;  %v450_v40 = vld [vmem:[%s6815_s15 + $0x8] sm:$0xff]  ;;  %v451_v42 = vld [vmem:[%s6815_s15 + $0x10] sm:$0xff]  ;;  %vm488_vm9 = vcmp.ge.s32.totalorder %v476_v33, 0  ;;  %vm500_vm11 = vcmp.lt.s32.totalorder %v476_v33, 16 }
 0x113   : > { %5159 = vmatprep.subr.bf16.mxu1 %v5915_v13  ;;  %v449_v39 = vld [vmem:[%s6815_s15] sm:$0xff]  ;;  %v452_v43 = vld [vmem:[%s6815_s15 + $0x18] sm:$0xff]  ;;  %v527_v47 = vmul.f32 %v6851_v37, %v450_v40  ;;  %v528_v48 = vmul.f32 %v6851_v37, %v451_v42  ;;  %vm6878_vm10 = vmand %vm487_vm3, %vm499_vm6  ;;  %vm489_vm12 = vcmp.ge.s32.totalorder %v6846_v35, 0  ;;  %vm501_vm13 = vcmp.lt.s32.totalorder %v6846_v35, 16  ;;  %s4914_s6 = sshll.u32 %s8628_s18, 4  ;;  %s4550_s17 = sshll.u32 %s8369_s11, 4  ;;  %s8435_s17 = int_to_ptr.vmem [resolvable:$true] %s4550_s17 }
 0x114   : > { %v526_v41 = vmul.f32 %v6851_v37, %v449_v39  ;;  %v529_v49 = vmul.f32 %v6851_v37, %v452_v43  ;;  %v5934_v50 = vld [vmem:[#allocation11 + $0x140] sm:$0xff]   ;;  %v454_v57 = vld [vmem:[%s6807_s3 + $0x8] sm:$0xff]  ;;  %vm4915_vm14 = vmpackc.low %vm6839_vm2, %vm6839_vm2  ;;  %vm490_vm15 = vcmp.ge.s32.totalorder %v6864_v44, 0  ;;  %vm502_vm1 = vcmp.lt.s32.totalorder %v6864_v44, 16  ;;  %s4901_s20 = sshll.u32 %s8708_s4, 5  ;;  %s6192_s1 = scalar_lea.vmem %s8435_s17, 2048 }
 0x115   : > { %5084 = vmatpush3.bf16.msra.mxu0 %v5916_v14  ;;  %v555_v53 = vadd.f32 %v6856_v38, %v527_v47  ;;  %v556_v54 = vadd.f32 %v6856_v38, %v528_v48  ;;  %v453_v56 = vld [vmem:[%s6807_s3] sm:$0xff]  ;;  %v531_v60 = vmul.f32 %v6851_v37, %v454_v57  ;;  %vm6905_vm0 = vmand %vm488_vm9, %vm500_vm11  ;;  %v455_v5 = vld [vmem:[%s6807_s3 + $0x10] sm:$0xff]  ;;  %vm503_vm3 = vcmp.lt.s32.totalorder %v6867_v45, 16  ;;  %s4547_s18 = sadd.s32 %s4914_s6, %s4901_s20  ;;  %p6193_p10 = scmp.ne.s32.totalorder %s8435_s17, %s6192_s1 }
 0x116   : > { %5160 = vmatpush3.bf16.msra.mxu1 %v5917_v15  ;;  %5085 = vmatprep.subr.bf16.mxu0 %v5918_v16  ;;  %v554_v51 = vadd.f32 %v6856_v38, %v526_v41  ;;  %v557_v55 = vadd.f32 %v6856_v38, %v529_v49  ;;  %v530_v59 = vmul.f32 %v6851_v37, %v453_v56  ;;  %v456_v7 = vld [vmem:[%s6807_s3 + $0x18] sm:$0xff]  ;;  %vm6923_vm6 = vmand %vm716_vm4, %vm717_vm5  ;;  %v5935_v33 = vld [vmem:[#allocation11 + $0x100] sm:$0xff]   ;;  %vm492_vm11 = vcmp.ge.s32.totalorder %v6870_v46, 0  ;;  %s4902_s22 = sshll.u32 %s4547_s18, 7  ;;  %s6361_s15 = smov [#allocation14]  }
 0x117   : > { %5161 = vmatprep.subr.bf16.mxu1 %v5919_v17  ;;  %v579_v61 = vsel %vm6839_vm2, %v555_v53, 0.0  ;;  %v580_v63 = vsel %vm6878_vm10, %v556_v54, 0.0  ;;  %v6915_v6 = vadd.f32 %v6856_v38, %v531_v60  ;;  %v532_v8 = vmul.f32 %v6851_v37, %v455_v5  ;;  %vm6943_vm4 = vmand %vm489_vm12, %vm501_vm13  ;;  %v5936_v35 = vld [vmem:[#allocation11 + $0x148] sm:$0xff]   ;;  %v459_v43 = vld [vmem:[%s6807_s3 + $0x30] sm:$0xff]  ;;  %p6194_p8 = pnand %p6193_p10, %p8711_p12  ;;  %s6196_s0 = sshll.u32 %s6361_s15, 4  ;;  %s6197_s0 = int_to_ptr.vmem [resolvable:$false] %s6196_s0 }
 0x118   : > { %v578_v58 = vsel %vm6839_vm2, %v554_v51, 0.0  ;;  %v4916_v62 = vpack.c.bf16 %v555_v53, %v554_v51  ;;  %v581_v0 = vsel %vm6878_vm10, %v557_v55, 0.0  ;;  %v6910_v4 = vadd.f32 %v6856_v38, %v530_v59  ;;  %vm6950_vm5 = vmand %vm849_vm7, %vm850_vm8  ;;  %v460_v56 = vld [vmem:[%s6807_s3 + $0x38] sm:$0xff]  ;;  %v5970_v52 = vld [vmem:[#allocation11 + $0x220] sm:$0xff]   ;;  %s6198_s5 = scalar_lea.vmem %s6197_s0, 4096  ;;  %p6199_p13 = scmp.lt.s32.totalorder %s8435_s17, %s6197_s0 }
 0x119   : > { %5086 = vmatpush3.bf16.msra.mxu0 %v5920_v18  ;;  %v602_v1 = vpack.c.bf16 %v579_v61, %v578_v58  ;;  %v603_v2 = vpack.c.bf16 %v581_v0, %v580_v63  ;;  %vm491_vm2 = vcmp.ge.s32.totalorder %v6867_v45, 0  ;;  %v583_v15 = vsel %vm6905_vm0, %v6915_v6, 0.0  ;;  %vm4918_vm7 = vmpackc.low %vm6878_vm10, %vm6878_vm10  ;;  %v5937_v58 = vld [vmem:[#allocation11 + $0x108] sm:$0xff]   ;;  %v5938_v63 = vld [vmem:[#allocation11 + $0x150] sm:$0xff]   ;;  %p6195_p0 = pneg %p6194_p8  ;;  %p6200_p1 = scmp.lt.s32.totalorder %s6198_s5, %s6192_s1 }
 0x11a   : > { %5162 = vmatpush3.bf16.msra.mxu1 %v5921_v19  ;;  %5087 = vmatprep.subr.bf16.mxu0 %v5922_v20  ;;  %v582_v14 = vsel %vm6905_vm0, %v6910_v4, 0.0  ;;  %v533_v16 = vmul.f32 %v6851_v37, %v456_v7  ;;  %v6935_v17 = vadd.s32 7, %v6835_v22  ;;  %v6966_v39 = vpack.c.bf16 %v557_v55, %v556_v54  ;;  %vm6987_vm8 = vmpackc.low %vm6905_vm0, %vm6905_vm0  ;;  %v5951_v55 = vld [vmem:[#allocation11 + $0x190] sm:$0xff]  }
 0x11b   : > { %5163 = vmatprep.subr.bf16.mxu1 %v5923_v21  ;;  %4917 = vmatprep.mubr.msk.bf16.mxu0 %vm4915_vm14, %v4916_v62  ;;  %v644_v9 = vshrl.u32 %v603_v2, 16  ;;  %v647_v10 = vshll.u32 %v603_v2, 16  ;;  %v637_v11 = vshrl.u32 %v602_v1, 16  ;;  %v640_v12 = vshll.u32 %v602_v1, 16  ;;  %vm6997_vm9 = vmand %vm490_vm15, %vm502_vm1  ;;  %v461_v1 = vld [vmem:[%s6807_s3 + $0x40] sm:$0xff]  ;;  %v5963_v7 = vld [vmem:[#allocation11 + $0x1b0] sm:$0xff]   ;;  %p6201_p2 = por %p6200_p1, %p6199_p13 }
 0x11c   : > { %v6937_v21 = vpack.c.bf16 %v583_v15, %v582_v14  ;;  %v6958_v28 = vadd.f32 %v6856_v38, %v533_v16  ;;  %vm504_vm12 = vcmp.lt.s32.totalorder %v6870_v46, 16  ;;  %v7009_v44 = vadd.s32 8, %v6835_v22  ;;  %vm7037_vm15 = vmand %vm491_vm2, %vm503_vm3  ;;  %v462_v14 = vld [vmem:[%s6807_s3 + $0x48] sm:$0xff]  ;;  %v5972_v51 = vld [vmem:[#allocation11 + $0x230] sm:$0xff]  }
 0x11d   : > { %5088 = vmatpush3.bf16.msra.mxu0 %v5924_v23  ;;  %v646_v18 = vrot.slane %v644_v9, 7  ;;  %v639_v19 = vrot.slane %v637_v11, 7  ;;  %v774_v20 = vrot.slane %v640_v12, 1  ;;  %v536_v0 = vmul.f32 %v6851_v37, %v459_v43  ;;  %vm7057_vm0 = vmand %vm492_vm11, %vm504_vm12  ;;  %v5943_v23 = vld [vmem:[#allocation11 + $0x120] sm:$0xff]   ;;  %p6202_p5 = pnand %p6201_p2, %p6195_p0 }
 0x11e   : > { %5164 = vmatpush3.bf16.msra.mxu1 %v5925_v24  ;;  %5089 = vmatprep.subr.bf16.mxu0 %v5926_v25  ;;  %v457_v24 = vld [vmem:[%s6807_s3 + $0x20] sm:$0xff]  ;;  %v654_v40 = vshll.u32 %v6937_v21, 16  ;;  %v585_v42 = vsel %vm6943_vm4, %v6958_v28, 0.0  ;;  %vm493_vm13 = vcmp.ge.s32.totalorder %v6935_v17, 0  ;;  %vm505_vm14 = vcmp.lt.s32.totalorder %v6935_v17, 16  ;;  %vm7119_vm3 = vmpackc.low %vm6943_vm4, %vm6943_vm4 }
 0x11f   : > { %5165 = vmatprep.subr.bf16.mxu1 %v5927_v26  ;;  %v781_v26 = vrot.slane %v647_v10, 1  ;;  %v649_v30 = vor.u32 %v647_v10, %v646_v18  ;;  %v7050_v45 = vadd.f32 %v6856_v38, %v536_v0  ;;  %v7063_v16 = vpack.c.bf16 %v6915_v6, %v6910_v4  ;;  %v5945_v6 = vld [vmem:[#allocation11 + $0x1c0] sm:$0xff]   ;;  %vm7157_vm11 = vmpackc.low %vm6997_vm9, %vm6997_vm9 }
 0x120   : > { %v538_v46 = vmul.f32 %v6851_v37, %v461_v1  ;;  %vm494_vm1 = vcmp.ge.s32.totalorder %v7009_v44, 0  ;;  %vm506_vm2 = vcmp.lt.s32.totalorder %v7009_v44, 16  ;;  %v5949_v1 = vld [vmem:[#allocation11 + $0x188] sm:$0xff]  }
 0x121   : > { %5090 = vmatpush3.bf16.msra.mxu0 %v5928_v27  ;;  %v6955_v27 = vadd.f32 %v6856_v38, %v532_v8  ;;  %v720_v47 = vsel %vm6923_vm6, 0, %v649_v30  ;;  %v782_v53 = vor.u32 %v781_v26, %v644_v9  ;;  %v537_v8 = vmul.f32 %v6851_v37, %v460_v56  ;;  %v5948_v56 = vld [vmem:[#allocation11 + $0x1c8] sm:$0xff]  }
 0x122   : > { %5166 = vmatpush3.bf16.msra.mxu1 %v5929_v29  ;;  %5091 = vmatprep.subr.bf16.mxu0 %v5930_v31  ;;  %v534_v29 = vmul.f32 %v6851_v37, %v457_v24  ;;  %v642_v31 = vor.u32 %v640_v12, %v639_v19  ;;  %v5939_v12 = vld [vmem:[#allocation11 + $0x110] sm:$0xff]   ;;  %v5940_v19 = vld [vmem:[#allocation11 + $0x158] sm:$0xff]   ;;  %v588_v4 = vsel %vm7037_vm15, %v7050_v45, 0.0 }
 0x123   : > { %5167 = vmatprep.subr.bf16.mxu1 %v5931_v32  ;;  %v775_v32 = vor.u32 %v774_v20, %v637_v11  ;;  %v584_v41 = vsel %vm6943_vm4, %v6955_v27, 0.0  ;;  %2165 = vmatprep.mubr.bf16.mxu1 %v720_v47  ;;  %v7045_v9 = vsel %vm6950_vm5, %v782_v53, 0  ;;  %v788_v11 = vrot.slane %v654_v40, 1  ;;  %v463_v24 = vld [vmem:[%s6807_s3 + $0x50] sm:$0xff]  ;;  %vm7144_vm4 = vmand %vm493_vm13, %vm505_vm14 }
 0x124   : > { %v719_v48 = vsel %vm6923_vm6, 0, %v642_v31  ;;  %v6991_v54 = vpack.c.bf16 %v585_v42, %v584_v41  ;;  %v7006_v60 = vadd.f32 %v6856_v38, %v534_v29  ;;  %v7069_v20 = vadd.f32 %v6856_v38, %v537_v8 }
 0x125   : > { %5092 = vmatpush3.bf16.msra.mxu0 %v5932_v34  ;;  %v651_v34 = vshrl.u32 %v6937_v21, 16  ;;  %v852_v49 = vsel %vm6950_vm5, %v775_v32, 0  ;;  %v539_v31 = vmul.f32 %v6851_v37, %v462_v14  ;;  %v7084_v32 = vadd.f32 %v6856_v38, %v538_v46  ;;  %v5944_v46 = vld [vmem:[#allocation11 + $0x168] sm:$0xff]  }
 0x126   : > { %5168 = vmatpush3.bf16.msra.mxu1 %v5933_v36  ;;  %5229 = vmatprep.subr.bf16.mxu0 %v5934_v50  ;;  %v458_v36 = vld [vmem:[%s6807_s3 + $0x28] sm:$0xff]  ;;  %v658_v61 = vshrl.u32 %v6991_v54, 16  ;;  %v661_v62 = vshll.u32 %v6991_v54, 16  ;;  %v586_v5 = vsel %vm6997_vm9, %v7006_v60, 0.0  ;;  %v589_v30 = vsel %vm7037_vm15, %v7069_v20, 0.0 }
 0x127   : > { %v653_v50 = vrot.slane %v651_v34, 7  ;;  %v535_v59 = vmul.f32 %v6851_v37, %v458_v36  ;;  %v789_v36 = vor.u32 %v788_v11, %v651_v34  ;;  %5305 = vmatprep.subr.bf16.mxu1 %v5945_v6  ;;  %v7099_v42 = vpack.c.bf16 %v589_v30, %v588_v4 }
 0x128   : > { %2053 = vmatmul.mubr.bf16.vlgmr.msra.gmra.mrb[0].mxu0 %v719_v48  ;;  %v660_v10 = vrot.slane %v658_v61, 7  ;;  %v7102_v43 = vadd.f32 %v6856_v38, %v539_v31  ;;  %v590_v21 = vsel %vm7057_vm0, %v7084_v32, 0.0  ;;  %v540_v34 = vmul.f32 %v6851_v37, %v463_v24  ;;  %v465_v24 = vld [vmem:[%s6807_s3 + $0x60] sm:$0xff] }
 0x129   : > { %2166 = vmatmul.mubr.bf16.vlgmr.msra.gmra.mrb[0].mxu1 %v852_v49  ;;  %5230 = vmatpush3.bf16.msra.mxu0 %v5935_v33  ;;  %v656_v57 = vor.u32 %v654_v40, %v653_v50  ;;  %v7028_v3 = vadd.f32 %v6856_v38, %v535_v59  ;;  %v464_v33 = vld [vmem:[%s6807_s3 + $0x58] sm:$0xff]  ;;  %v5942_v50 = vld [vmem:[#allocation11 + $0x160] sm:$0xff]   ;;  %v795_v59 = vrot.slane %v661_v62, 1  ;;  %v7138_v11 = vpack.c.bf16 %v6958_v28, %v6955_v27 }
 0x12a   : > { %4920 = vmatprep.mubr.msk.bf16.mxu0 %vm4918_vm7, %v6966_v39  ;;  %5231 = vmatprep.subr.bf16.mxu0 %v5936_v35  ;;  %v663_v26 = vor.u32 %v661_v62, %v660_v10  ;;  %v5941_v49 = vld [vmem:[#allocation11 + $0x118] sm:$0xff]   ;;  %v541_v53 = vmul.f32 %v6851_v37, %v464_v33  ;;  %v591_v0 = vsel %vm7057_vm0, %v7102_v43, 0.0  ;;  %v7130_v10 = vadd.f32 %v6856_v38, %v540_v34  ;;  %v5946_v33 = vld [vmem:[#allocation11 + $0x128] sm:$0xff]   ;;  %v467_v34 = vld [vmem:[%s6807_s3 + $0x70] sm:$0xff] }
 0x12b   : > { %v7025_v2 = vsel %vm6923_vm6, 0, %v656_v57  ;;  %v587_v18 = vsel %vm6997_vm9, %v7028_v3, 0.0  ;;  %v7114_v57 = vadd.s32 9, %v6835_v22  ;;  %v7127_v8 = vpack.c.bf16 %v591_v0, %v590_v21  ;;  %vm7181_vm9 = vmand %vm494_vm1, %vm506_vm2  ;;  %v5955_v0 = vld [vmem:[#allocation11 + $0x198] sm:$0xff]  }
 0x12c   : > { %2173 = vmatprep.mubr.bf16.mxu1 %v7025_v2  ;;  %v7074_v29 = vpack.c.bf16 %v587_v18, %v586_v5  ;;  %v7089_v35 = vsel %vm6923_vm6, 0, %v663_v26  ;;  %v7134_v62 = vsel %vm6950_vm5, %v789_v36, 0  ;;  %v7149_v14 = vadd.f32 %v6856_v38, %v541_v53  ;;  %v5950_v18 = vld [vmem:[#allocation11 + $0x1d0] sm:$0xff]   ;;  %v466_v36 = vld [vmem:[%s6807_s3 + $0x68] sm:$0xff] }
 0x12d   : > { %5232 = vmatpush3.bf16.msra.mxu0 %v5937_v58  ;;  %v675_v28 = vshll.u32 %v7099_v42, 16  ;;  %v796_v4 = vor.u32 %v795_v59, %v658_v61  ;;  %v679_v30 = vshrl.u32 %v7127_v8, 16  ;;  %v592_v31 = vsel %vm7144_vm4, %v7130_v10, 0.0  ;;  %v5952_v61 = vld [vmem:[#allocation11 + $0x170] sm:$0xff]  }
 0x12e   : > { %5233 = vmatprep.subr.bf16.mxu0 %v5938_v63  ;;  %v665_v40 = vshrl.u32 %v7074_v29, 16  ;;  %v668_v41 = vshll.u32 %v7074_v29, 16  ;;  %v672_v63 = vshrl.u32 %v7099_v42, 16  ;;  %v593_v54 = vsel %vm7144_vm4, %v7149_v14, 0.0  ;;  %v5953_v59 = vld [vmem:[#allocation11 + $0x130] sm:$0xff]   ;;  %v5958_v29 = vld [vmem:[#allocation11 + $0x178] sm:$0xff]  }
 0x12f   : > { %v542_v44 = vmul.f32 %v6851_v37, %v465_v24  ;;  %vm495_vm12 = vcmp.ge.s32.totalorder %v7114_v57, 0  ;;  %vm507_vm13 = vcmp.lt.s32.totalorder %v7114_v57, 16  ;;  %v682_v53 = vshll.u32 %v7127_v8, 16 }
 0x130   : > { %2061 = vmatmul.mubr.bf16.gmra.mrb[4].mxu0 %v720_v47  ;;  %v5947_v47 = vld [vmem:[#allocation11 + $0x180] sm:$0xff]   ;;  %v667_v48 = vrot.slane %v665_v40, 7  ;;  %v674_v17 = vrot.slane %v672_v63, 7  ;;  %v802_v6 = vrot.slane %v668_v41, 1  ;;  %v544_v24 = vmul.f32 %v6851_v37, %v467_v34  ;;  %vm7236_vm2 = vmand %vm495_vm12, %vm507_vm13 }
 0x131   : > { %2174 = vmatmul.mubr.bf16.gmra.mrb[4].mxu1 %v7045_v9  ;;  %4923 = vmatprep.mubr.msk.bf16.mxu0 %vm6987_vm8, %v7063_v16  ;;  %v809_v57 = vrot.slane %v675_v28, 1  ;;  %vm7291_vm13 = vmpackc.low %vm7037_vm15, %vm7037_vm15 }
 0x132   : > { %2181 = vmatprep.mubr.bf16.mxu1 %v7089_v35  ;;  %5234 = vmatpush3.bf16.msra.mxu0 %v5939_v12  ;;  %v670_v5 = vor.u32 %v668_v41, %v667_v48  ;;  %v5954_v41 = vld [vmem:[#allocation11 + $0x1d8] sm:$0xff]   ;;  %v543_v48 = vmul.f32 %v6851_v37, %v466_v36  ;;  %v469_v36 = vld [vmem:[%s6822_s25] sm:$0xff]  ;;  %vm7350_vm15 = vmpackc.low %vm7057_vm0, %vm7057_vm0 }
 0x133   : > { %5235 = vmatprep.subr.bf16.mxu0 %v5940_v19  ;;  %5306 = vmatpush3.bf16.msra.mxu1 %v5947_v47  ;;  %v7152_v19 = vadd.s32 10, %v6835_v22  ;;  %v677_v47 = vor.u32 %v675_v28, %v674_v17  ;;  %v5957_v17 = vld [vmem:[#allocation11 + $0x1a0] sm:$0xff]   ;;  %v546_v34 = vmul.f32 %v6851_v37, %v469_v36 }
 0x134   : > { %5307 = vmatprep.subr.bf16.mxu1 %v5948_v56  ;;  %v7167_v26 = vsel %vm6923_vm6, 0, %v670_v5  ;;  %v7207_v56 = vpack.c.bf16 %v593_v54, %v592_v31  ;;  %v7212_v5 = vpack.c.bf16 %v7028_v3, %v7006_v60  ;;  %v7228_v3 = vadd.f32 %v6856_v38, %v543_v48  ;;  %v470_v54 = vld [vmem:[%s6822_s25 + $0x8] sm:$0xff]  ;;  %v5975_v28 = vld [vmem:[#allocation13] sm:$0xff]  }
 0x135   : > { %vm496_vm14 = vcmp.ge.s32.totalorder %v7152_v19, 0  ;;  %vm508_vm1 = vcmp.lt.s32.totalorder %v7152_v19, 16  ;;  %v7225_v60 = vsel %vm6923_vm6, 0, %v677_v47  ;;  %v547_v48 = vmul.f32 %v6851_v37, %v470_v54  ;;  %v5964_v54 = vld [vmem:[#allocation11 + $0x1f8] sm:$0xff]  }
 0x136   : > { %5236 = vmatpush3.bf16.msra.mxu0 %v5941_v49  ;;  %v468_v49 = vld [vmem:[%s6807_s3 + $0x78] sm:$0xff]  ;;  %vm7268_vm12 = vmand %vm496_vm14, %vm508_vm1  ;;  %v595_v47 = vsel %vm7181_vm9, %v7228_v3, 0.0  ;;  %v689_v19 = vshll.u32 %v7207_v56, 16 }
 0x137   : > { %5237 = vmatprep.subr.bf16.mxu0 %v5942_v50  ;;  %5308 = vmatpush3.bf16.msra.mxu1 %v5949_v1  ;;  %v7204_v50 = vsel %vm6950_vm5, %v796_v4, 0  ;;  %v5956_v1 = vld [vmem:[#allocation11 + $0x1e0] sm:$0xff]   ;;  %v5967_v4 = vld [vmem:[#allocation11 + $0x208] sm:$0xff]   ;;  %vm4972_vm10 = vmpackc.low %vm7268_vm12, %vm7268_vm12 }
 0x138   : > { %2069 = vmatmul.mubr.bf16.gmra.mrb[8].mxu0 %v7025_v2  ;;  %5309 = vmatprep.subr.bf16.mxu1 %v5950_v18  ;;  %v681_v18 = vrot.slane %v679_v30, 7  ;;  %v823_v8 = vrot.slane %v689_v19, 1 }
 0x139   : > { %2182 = vmatmul.mubr.bf16.gmra.mrb[8].mxu1 %v7134_v62  ;;  %4926 = vmatprep.mubr.msk.bf16.mxu0 %vm7119_vm3, %v7138_v11 }
 0x13a   : > { %2189 = vmatprep.mubr.bf16.mxu1 %v7167_v26  ;;  %5238 = vmatpush3.bf16.msra.mxu0 %v5943_v23  ;;  %v803_v23 = vor.u32 %v802_v6, %v665_v40  ;;  %v686_v40 = vshrl.u32 %v7207_v56, 16  ;;  %v684_v31 = vor.u32 %v682_v53, %v681_v18  ;;  %v810_v18 = vor.u32 %v809_v57, %v672_v63 }
 0x13b   : > { %5239 = vmatprep.subr.bf16.mxu0 %v5944_v46  ;;  %5310 = vmatpush3.bf16.msra.mxu1 %v5951_v55  ;;  %v7219_v46 = vadd.f32 %v6856_v38, %v542_v44  ;;  %v545_v55 = vmul.f32 %v6851_v37, %v468_v49  ;;  %v7259_v44 = vadd.f32 %v6856_v38, %v544_v24  ;;  %v5960_v49 = vld [vmem:[#allocation11 + $0x138] sm:$0xff]  }
 0x13c   : > { %5311 = vmatprep.subr.bf16.mxu1 %v5954_v41  ;;  %v7246_v6 = vsel %vm6950_vm5, %v803_v23, 0  ;;  %v7282_v23 = vpack.c.bf16 %v7069_v20, %v7050_v45  ;;  %v575_v24 = vadd.f32 %v6856_v38, %v547_v48 }
 0x13d   : > { %v7262_v41 = vadd.f32 %v6856_v38, %v545_v55  ;;  %v596_v20 = vsel %vm7236_vm2, %v7259_v44, 0.0  ;;  %v5979_v55 = vld [vmem:[#allocation13 + $0x10] sm:$0xff]  }
 0x13e   : > { %5240 = vmatpush3.bf16.msra.mxu0 %v5946_v33  ;;  %v5959_v33 = vld [vmem:[#allocation11 + $0x1e8] sm:$0xff]   ;;  %v599_v57 = vsel %vm7268_vm12, %v575_v24, 0.0 }
 0x13f   : > { %5241 = vmatprep.subr.bf16.mxu0 %v5952_v61  ;;  %5312 = vmatpush3.bf16.msra.mxu1 %v5955_v0  ;;  %v594_v61 = vsel %vm7181_vm9, %v7219_v46, 0.0  ;;  %v5961_v0 = vld [vmem:[#allocation11 + $0x1a8] sm:$0xff]   ;;  %v597_v42 = vsel %vm7236_vm2, %v7262_v41, 0.0 }
 0x140   : > { %2077 = vmatmul.mubr.bf16.gmra.mrb[12].mxu0 %v7089_v35  ;;  %5313 = vmatprep.subr.bf16.mxu1 %v5956_v1  ;;  %v5962_v1 = vld [vmem:[#allocation11 + $0x1f0] sm:$0xff]   ;;  %v7299_v45 = vpack.c.bf16 %v595_v47, %v594_v61  ;;  %v816_v61 = vrot.slane %v682_v53, 1  ;;  %v7327_v47 = vsel %vm6950_vm5, %v810_v18, 0  ;;  %v7342_v18 = vpack.c.bf16 %v7102_v43, %v7084_v32 }
 0x141   : > { %2190 = vmatmul.mubr.bf16.gmra.mrb[12].mxu1 %v7204_v50  ;;  %4929 = vmatprep.mubr.msk.bf16.mxu0 %vm7157_vm11, %v7212_v5  ;;  %v471_v43 = vld [vmem:[%s6822_s25 + $0x10] sm:$0xff] }
 0x142   : > { %2197 = vmatprep.mubr.bf16.mxu1 %v7225_v60  ;;  %5242 = vmatpush3.bf16.msra.mxu0 %v5953_v59  ;;  %v688_v59 = vrot.slane %v686_v40, 7  ;;  %v693_v48 = vshrl.u32 %v7299_v45, 16 }
 0x143   : > { %5314 = vmatpush3.bf16.msra.mxu1 %v5957_v17  ;;  %5243 = vmatprep.subr.bf16.mxu0 %v5958_v29  ;;  %v574_v17 = vadd.f32 %v6856_v38, %v546_v34  ;;  %v7297_v29 = vsel %vm6923_vm6, 0, %v684_v31  ;;  %v7322_v34 = vld [vmem:[#allocation11 + $0x200] sm:$0xff]  }
 0x144   : > { %5315 = vmatprep.subr.bf16.mxu1 %v5959_v33  ;;  %v691_v33 = vor.u32 %v689_v19, %v688_v59  ;;  %v485_v59 = vadd.s32 11, %v6835_v22  ;;  %v817_v22 = vor.u32 %v816_v61, %v679_v30 }
 0x145   : > { %v598_v63 = vsel %vm7268_vm12, %v574_v17, 0.0  ;;  %v7311_v31 = vpack.c.bf16 %v575_v24, %v574_v17  ;;  %v696_v17 = vshll.u32 %v7299_v45, 16  ;;  %v695_v45 = vrot.slane %v693_v48, 7 }
 0x146   : > { %5244 = vmatpush3.bf16.msra.mxu0 %v5960_v49  ;;  %v7314_v36 = vpack.c.bf16 %v599_v57, %v598_v63  ;;  %v7330_v49 = vpack.c.bf16 %v597_v42, %v596_v20  ;;  %v7337_v53 = vsel %vm6923_vm6, 0, %v691_v33  ;;  %vm497_vm14 = vcmp.ge.s32.totalorder %v485_v59, 0  ;;  %v472_v57 = vld [vmem:[%s6822_s25 + $0x18] sm:$0xff] }
 0x147   : > { %5316 = vmatpush3.bf16.msra.mxu1 %v5961_v0  ;;  %5671 = vmatprep.subr.bf16.mxu0 %v7322_v34  ;;  %vm509_vm1 = vcmp.lt.s32.totalorder %v485_v59, 16  ;;  %v7364_v15 = vsel %vm6950_vm5, %v817_v22, 0  ;;  %v549_v61 = vmul.f32 %v6851_v37, %v472_v57  ;;  %v830_v22 = vrot.slane %v696_v17, 1 }
 0x148   : > { %2085 = vmatmul.mubr.bf16.gmra.mrb[16].mxu0 %v7167_v26  ;;  %5317 = vmatprep.subr.bf16.mxu1 %v5962_v1  ;;  %v950_v0 = vshll.u32 %v7314_v36, 16  ;;  %v5965_v1 = vld [vmem:[#allocation11 + $0x1b8] sm:$0xff]   ;;  %v947_v24 = vshrl.u32 %v7314_v36, 16  ;;  %v703_v63 = vshll.u32 %v7330_v49, 16  ;;  %vm7370_vm0 = vmand %vm497_vm14, %vm509_vm1  ;;  %v548_v36 = vmul.f32 %v6851_v37, %v471_v43 }
 0x149   : > { %2198 = vmatmul.mubr.bf16.gmra.mrb[16].mxu1 %v7246_v6  ;;  %4932 = vmatprep.mubr.msk.bf16.mxu0 %vm7291_vm13, %v7282_v23  ;;  %v7384_v19 = vadd.f32 %v6856_v38, %v549_v61  ;;  %vm7389_vm14 = vmpackc.low %vm7144_vm4, %vm7144_vm4  ;;  %v824_v37 = vor.u32 %v823_v8, %v686_v40  ;;  %v831_v57 = vor.u32 %v830_v22, %v693_v48  ;;  %v5980_v61 = vld [vmem:[#allocation13 + $0x58] sm:$0xff]  }
 0x14a   : > { %2205 = vmatprep.mubr.bf16.mxu1 %v7297_v29  ;;  %v1081_v20 = vrot.slane %v950_v0, 1  ;;  %v7377_v59 = vadd.f32 %v6856_v38, %v548_v36  ;;  %vm7422_vm4 = vmpackc.low %vm7181_vm9, %vm7181_vm9  ;;  %v949_v8 = vrot.slane %v947_v24, 7 }
 0x14b   : > { %5318 = vmatpush3.bf16.msra.mxu1 %v5963_v7  ;;  %v700_v7 = vshrl.u32 %v7330_v49, 16  ;;  %v601_v38 = vsel %vm7370_vm0, %v7384_v19, 0.0  ;;  %v7417_v40 = vsel %vm6950_vm5, %v824_v37, 0  ;;  %v7441_v21 = vsel %vm6950_vm5, %v831_v57, 0  ;;  %vm7447_vm9 = vmpackc.low %vm7236_vm2, %vm7236_vm2 }
 0x14c   : > { %5319 = vmatprep.subr.bf16.mxu1 %v5964_v54  ;;  %v7355_v32 = vor.u32 %v1081_v20, %v947_v24  ;;  %v698_v54 = vor.u32 %v696_v17, %v695_v45  ;;  %v600_v20 = vsel %vm7370_vm0, %v7377_v59, 0.0  ;;  %v5003_v12 = vpack.c.bf16 %v7384_v19, %v7377_v59  ;;  %v5981_v59 = vld [vmem:[#allocation13 + $0x18] sm:$0xff]  }
 0x14d   : > { %v702_v30 = vrot.slane %v700_v7, 7  ;;  %v7408_v56 = vpack.c.bf16 %v601_v38, %v600_v20  ;;  %v837_v17 = vrot.slane %v703_v63, 1 }
 0x14f   : > { %5320 = vmatpush3.bf16.msra.mxu1 %v5965_v1  ;;  %v7381_v1 = vpack.c.bf16 %v7149_v14, %v7130_v10  ;;  %v7400_v10 = vsel %vm6923_vm6, 0, %v698_v54  ;;  %v705_v14 = vor.u32 %v703_v63, %v702_v30  ;;  %v7432_v30 = vpack.c.bf16 %v7228_v3, %v7219_v46 }
 0x150   : > { %2093 = vmatmul.mubr.bf16.gmra.mrb[20].mxu0 %v7225_v60  ;;  %v952_v63 = vor.u32 %v950_v0, %v949_v8  ;;  %v838_v36 = vor.u32 %v837_v17, %v700_v7  ;;  %v7453_v3 = vpack.c.bf16 %v7262_v41, %v7259_v44  ;;  %v5968_v44 = vld [vmem:[#allocation11 + $0x210] sm:$0xff]   ;;  %v5974_v41 = vld [vmem:[#allocation13 + $0x40] sm:$0xff]  }
 0x151   : > { %2206 = vmatmul.mubr.bf16.gmra.mrb[20].mxu1 %v7327_v47  ;;  %4935 = vmatprep.mubr.msk.bf16.mxu0 %vm7350_vm15, %v7342_v18  ;;  %v7428_v43 = vsel %vm6923_vm6, 0, %v705_v14  ;;  %v5983_v8 = vld [vmem:[#allocation13 + $0x20] sm:$0xff]  }
 0x152   : > { %2213 = vmatprep.mubr.bf16.mxu1 %v7337_v53  ;;  %v7457_v48 = vsel %vm6923_vm6, 0, %v952_v63  ;;  %v7461_v0 = vsel %vm6950_vm5, %v838_v36, 0  ;;  %5399 = vmatprep.subr.bf16.mxu1 %v5974_v41 }
 0x158   : > { %2101 = vmatmul.mubr.bf16.gmra.mrb[24].mxu0 %v7297_v29 }
 0x159   : > { %2214 = vmatmul.mubr.bf16.gmra.mrb[24].mxu1 %v7364_v15  ;;  %4938 = vmatprep.mubr.msk.bf16.mxu0 %vm7389_vm14, %v7381_v1 }
 0x15a   : > { %2221 = vmatprep.mubr.bf16.mxu1 %v7400_v10 }
 0x160   : > { %2109 = vmatmul.mubr.bf16.gmra.mrb[28].mxu0 %v7337_v53 }
 0x161   : > { %2222 = vmatmul.mubr.bf16.gmra.mrb[28].mxu1 %v7417_v40  ;;  %4941 = vmatprep.mubr.msk.bf16.mxu0 %vm7422_vm4, %v7432_v30 }
 0x162   : > { %2229 = vmatprep.mubr.bf16.mxu1 %v7428_v43 }
 0x168   : > { %2117 = vmatmul.mubr.bf16.gmra.mrb[32].mxu0 %v7400_v10 }
 0x169   : > { %2230 = vmatmul.mubr.bf16.gmra.mrb[32].mxu1 %v7441_v21  ;;  %4944 = vmatprep.mubr.msk.bf16.mxu0 %vm7447_vm9, %v7453_v3 }
 0x16a   : > { %2237 = vmatprep.mubr.bf16.mxu1 %v7457_v48 }
 0x170   : > { %2125 = vmatmul.mubr.bf16.gmra.mrb[36].mxu0 %v7428_v43 }
 0x171   : > { %2238 = vmatmul.mubr.bf16.gmra.mrb[36].mxu1 %v7461_v0  ;;  %2278 = vmatprep.mubr.bf16.mxu0 %v7045_v9  ;;  %v5969_v9 = vld [vmem:[#allocation11 + $0x218] sm:$0xff]  }
 0x172   : > { %4977 = vmatprep.mubr.msk.bf16.mxu1 %vm6987_vm8, %v7063_v16 }
 0x178   : > { %4947 = vmatmul.mubr.msk.bf16.vlgmr.msra.gmra.mrb[40].mxu0 %vm4918_vm7, %v6966_v39  ;;  %v5971_v39 = vld [vmem:[#allocation11 + $0x228] sm:$0xff]   ;;  %vm5002_vm7 = vmpackc.low %vm7370_vm0, %vm7370_vm0 }
 0x179   : > { %5672 = vmatpush3.bf16.msra.mxu0 %v7322_v34  ;;  %2392 = vmatmul.mubr.bf16.vlgmr.msra.gmra.mrb[40].mxu1 %v7025_v2  ;;  %v5973_v2 = vld [vmem:[#allocation11 + $0x238] sm:$0xff]  }
 0x17a   : > { %2286 = vmatprep.mubr.bf16.mxu0 %v7134_v62  ;;  %4980 = vmatprep.mubr.msk.bf16.mxu1 %vm7119_vm3, %v7138_v11 }
 0x17b   : > { %5673 = vmatprep.subr.bf16.mxu0 %v5967_v4  ;;  %5400 = vmatpush3.bf16.msra.mxu1 %v5975_v28  ;;  %v5989_v28 = vld [vmem:[#allocation13 + $0x88] sm:$0xff]  }
 0x17d   : > { %5674 = vmatpush3.bf16.msra.mxu0 %v5967_v4 }
 0x17e   : > { %5675 = vmatprep.subr.bf16.mxu0 %v5968_v44 }
 0x180   : > { %4950 = vmatmul.mubr.msk.bf16.gmra.mrb[44].mxu0 %vm6987_vm8, %v7063_v16  ;;  %v1188_v16 = vshrl.u32 %v7408_v56, 16 }
 0x181   : > { %2400 = vmatmul.mubr.bf16.gmra.mrb[44].mxu1 %v7089_v35  ;;  %2294 = vmatprep.mubr.bf16.mxu0 %v7204_v50  ;;  %v1102_v35 = vsel %vm6950_vm5, %v7355_v32, 0 }
 0x182   : > { %4983 = vmatprep.mubr.msk.bf16.mxu1 %vm7157_vm11, %v7212_v5  ;;  %5676 = vmatpush3.bf16.msra.mxu0 %v5968_v44  ;;  %v1190_v58 = vrot.slane %v1188_v16, 7 }
 0x183   : > { %5677 = vmatprep.subr.bf16.mxu0 %v5969_v9 }
 0x186   : > { %5678 = vmatpush3.bf16.msra.mxu0 %v5969_v9 }
 0x187   : > { %5679 = vmatprep.subr.bf16.mxu0 %v5970_v52 }
 0x188   : > { %4953 = vmatmul.mubr.msk.bf16.gmra.mrb[48].mxu0 %vm7119_vm3, %v7138_v11  ;;  %v1191_v11 = vshll.u32 %v7408_v56, 16 }
 0x189   : > { %2408 = vmatmul.mubr.bf16.gmra.mrb[48].mxu1 %v7167_v26  ;;  %2302 = vmatprep.mubr.bf16.mxu0 %v7246_v6 }
 0x18a   : > { %4986 = vmatprep.mubr.msk.bf16.mxu1 %vm7291_vm13, %v7282_v23  ;;  %5680 = vmatpush3.bf16.msra.mxu0 %v5970_v52  ;;  %v1193_v27 = vor.u32 %v1191_v11, %v1190_v58  ;;  %v5986_v58 = vld [vmem:[#allocation13 + $0x68] sm:$0xff]  }
 0x18b   : > { %5681 = vmatprep.subr.bf16.mxu0 %v5971_v39 }
 0x18c   : > { %v1213_v26 = vsel %vm6923_vm6, 0, %v1193_v27 }
 0x18e   : > { %5682 = vmatpush3.bf16.msra.mxu0 %v5971_v39 }
 0x18f   : > { %5683 = vmatprep.subr.bf16.mxu0 %v5972_v51 }
 0x190   : > { %4956 = vmatmul.mubr.msk.bf16.gmra.mrb[52].mxu0 %vm7157_vm11, %v7212_v5  ;;  %v1322_v5 = vrot.slane %v1191_v11, 1 }
 0x191   : > { %2416 = vmatmul.mubr.bf16.gmra.mrb[52].mxu1 %v7225_v60  ;;  %2310 = vmatprep.mubr.bf16.mxu0 %v7327_v47 }
 0x192   : > { %4989 = vmatprep.mubr.msk.bf16.mxu1 %vm7350_vm15, %v7342_v18  ;;  %5684 = vmatpush3.bf16.msra.mxu0 %v5972_v51  ;;  %v1323_v60 = vor.u32 %v1322_v5, %v1188_v16  ;;  %v5984_v51 = vld [vmem:[#allocation13 + $0xc0] sm:$0xff]  }
 0x193   : > { %5685 = vmatprep.subr.bf16.mxu0 %v5973_v2 }
 0x196   : > { %5686 = vmatpush3.bf16.msra.mxu0 %v5973_v2  ;;  %v5985_v2 = vld [vmem:[#allocation13 + $0x80] sm:$0xff]  }
 0x197   : > { %5463 = vmatprep.subr.bf16.mxu0 %v5984_v51 }
 0x198   : > { %4959 = vmatmul.mubr.msk.bf16.gmra.mrb[56].mxu0 %vm7291_vm13, %v7282_v23  ;;  %v5978_v23 = vld [vmem:[#allocation13 + $0x50] sm:$0xff]  }
 0x199   : > { %2424 = vmatmul.mubr.bf16.gmra.mrb[56].mxu1 %v7297_v29  ;;  %2318 = vmatprep.mubr.bf16.mxu0 %v7364_v15 }
 0x19a   : > { %4992 = vmatprep.mubr.msk.bf16.mxu1 %vm7389_vm14, %v7381_v1 }
 0x1a0   : > { %4962 = vmatmul.mubr.msk.bf16.gmra.mrb[60].mxu0 %vm7350_vm15, %v7342_v18 }
 0x1a1   : > { %2432 = vmatmul.mubr.bf16.gmra.mrb[60].mxu1 %v7337_v53  ;;  %2326 = vmatprep.mubr.bf16.mxu0 %v7417_v40 }
 0x1a2   : > { %4995 = vmatprep.mubr.msk.bf16.mxu1 %vm7422_vm4, %v7432_v30 }
 0x1a8   : > { %4965 = vmatmul.mubr.msk.bf16.gmra.mrb[64].mxu0 %vm7389_vm14, %v7381_v1 }
 0x1a9   : > { %2440 = vmatmul.mubr.bf16.gmra.mrb[64].mxu1 %v7400_v10  ;;  %2334 = vmatprep.mubr.bf16.mxu0 %v7441_v21 }
 0x1aa   : > { %4998 = vmatprep.mubr.msk.bf16.mxu1 %vm7447_vm9, %v7453_v3 }
 0x1b0   : > { %4968 = vmatmul.mubr.msk.bf16.gmra.mrb[68].mxu0 %vm7422_vm4, %v7432_v30 }
 0x1b1   : > { %2448 = vmatmul.mubr.bf16.gmra.mrb[68].mxu1 %v7428_v43  ;;  %2342 = vmatprep.mubr.bf16.mxu0 %v7461_v0  ;;  %v5982_v43 = vld [vmem:[#allocation13 + $0x60] sm:$0xff]  }
 0x1b2   : > { %5001 = vmatprep.mubr.msk.bf16.mxu1 %vm4972_vm10, %v7311_v31 }
 0x1b8   : > { %4971 = vmatmul.mubr.msk.bf16.gmra.mrb[72].mxu0 %vm7447_vm9, %v7453_v3 }
 0x1b9   : > { %2456 = vmatmul.mubr.bf16.gmra.mrb[72].mxu1 %v7457_v48  ;;  %2350 = vmatprep.mubr.bf16.mxu0 %v1102_v35 }
 0x1ba   : > { %5004 = vmatprep.mubr.msk.bf16.mxu1 %vm5002_vm7, %v5003_v12 }
 0x1c0   : > { %4974 = vmatmul.mubr.msk.bf16.gmra.mrb[76].mxu0 %vm4972_vm10, %v7311_v31 }
 0x1c1   : > { %2464 = vmatmul.mubr.bf16.gmra.mrb[76].mxu1 %v1213_v26  ;;  %5687 = vmatprep.mubr.bf16.mxu0 %v7134_v62  ;;  %v1343_v62 = vsel %vm6950_vm5, %v1323_v60, 0  ;;  %v5988_v26 = vld [vmem:[#allocation13 + $0xc8] sm:$0xff]  }
 0x1c8   : > { %5688 = vmatmul.mubr.bf16.vlgmr.msra.gmra.mrb[80].mxu0 %v7204_v50  ;;  %v5976_v50 = vld [vmem:[#allocation13 + $0x48] sm:$0xff]  }
 0x1c9   : > { %5691 = vmatprep.mubr.bf16.mxu0 %v7246_v6  ;;  %5401 = vmatprep.subr.bf16.mxu1 %v5976_v50  ;;  %v5977_v6 = vld [vmem:[#allocation13 + $0x8] sm:$0xff]  }
 0x1ca   : > { %5402 = vmatpush3.bf16.msra.mxu1 %v5977_v6  ;;  %5464 = vmatpush3.bf16.msra.mxu0 %v5985_v2  ;;  %v6002_v2 = vld [vmem:[#allocation13 + $0xf0] sm:$0xff]  }
 0x1cb   : > { %5403 = vmatprep.subr.bf16.mxu1 %v5978_v23  ;;  %5465 = vmatprep.subr.bf16.mxu0 %v5988_v26 }
 0x1ce   : > { %5404 = vmatpush3.bf16.msra.mxu1 %v5979_v55  ;;  %5466 = vmatpush3.bf16.msra.mxu0 %v5989_v28 }
 0x1cf   : > { %5405 = vmatprep.subr.bf16.mxu1 %v5980_v61 }
 0x1d0   : > { %5692 = vmatmul.mubr.bf16.gmra.mrb[84].mxu0 %v7327_v47 }
 0x1d1   : > { %5695 = vmatprep.mubr.bf16.mxu0 %v7364_v15 }
 0x1d2   : > { %5406 = vmatpush3.bf16.msra.mxu1 %v5981_v59  ;;  %v5995_v59 = vld [vmem:[#allocation13 + $0x98] sm:$0xff]  }
 0x1d3   : > { %5407 = vmatprep.subr.bf16.mxu1 %v5982_v43 }
 0x1d6   : > { %5408 = vmatpush3.bf16.msra.mxu1 %v5983_v8  ;;  %v5998_v8 = vld [vmem:[#allocation13 + $0xe8] sm:$0xff]  }
 0x1d7   : > { %5409 = vmatprep.subr.bf16.mxu1 %v5986_v58 }
 0x1d8   : > { %5696 = vmatmul.mubr.bf16.gmra.mrb[88].mxu0 %v7417_v40 }
 0x1d9   : > { %5699 = vmatprep.mubr.bf16.mxu0 %v7441_v21 }
 0x1e0   : > { %5700 = vmatmul.mubr.bf16.gmra.mrb[92].mxu0 %v7461_v0 }
 0x1e1   : > { %5703 = vmatprep.mubr.bf16.mxu0 %v1102_v35 }
 0x1e8   : > { %5704 = vmatmul.mubr.bf16.gmra.mrb[96].mxu0 %v1343_v62 }
 0x1fb   : > { %v5093_v29 = vpop.f32.mrb[0].mxu0 }
 0x1fc   : > { %v5169_v31 = vpop.f32.mrb[0].mxu1  ;;  %v5094_v34 = vpop.f32.mrb[1].mxu0 }
 0x1fd   : > { %v5095_v47 = vadd.f32 %v5094_v34, %v5093_v29  ;;  %v5170_v53 = vpop.f32.mrb[1].mxu1  ;;  %v5096_v18 = vpop.f32.mrb[2].mxu0  ;;  %v5987_v29 = vld [vmem:[#allocation13 + $0x28] sm:$0xff]  }
 0x1fe   : > { %v5171_v24 = vadd.f32 %v5170_v53, %v5169_v31  ;;  %v5172_v42 = vpop.f32.mrb[2].mxu1  ;;  %v5097_v7 = vpop.f32.mrb[3].mxu0  ;;  %5410 = vmatpush3.bf16.msra.mxu1 %v5987_v29  ;;  %v5991_v53 = vld [vmem:[#allocation13 + $0x90] sm:$0xff]  }
 0x1ff   : > { %v5098_v32 = vadd.f32 %v5097_v7, %v5096_v18  ;;  %v5173_v15 = vpop.f32.mrb[3].mxu1 }
 0x200   : > { %v7582_v33 = vadd.f32 %v5171_v24, %v5095_v47  ;;  %v5174_v54 = vadd.f32 %v5173_v15, %v5172_v42  ;;  %v5990_v47 = vld [vmem:[#allocation13 + $0xd0] sm:$0xff]  }
 0x201   : > { %5467 = vmatprep.subr.bf16.mxu0 %v5990_v47 }
 0x202   : > { %v7584_v1 = vadd.f32 %v5174_v54, %v5098_v32  ;;  %5468 = vmatpush3.bf16.msra.mxu0 %v5991_v53  ;;  %v5993_v32 = vld [vmem:[#allocation13 + $0xd8] sm:$0xff]  }
 0x203   : > { %v5099_v19 = vpop.f32.mrb[4].mxu0  ;;  %5469 = vmatprep.subr.bf16.mxu0 %v5993_v32 }
 0x204   : > { %v5175_v49 = vpop.f32.mrb[4].mxu1  ;;  %v5100_v37 = vpop.f32.mrb[5].mxu0 }
 0x205   : > { %v5101_v22 = vadd.f32 %v5100_v37, %v5099_v19  ;;  %v5176_v20 = vpop.f32.mrb[5].mxu1  ;;  %v5102_v10 = vpop.f32.mrb[6].mxu0 }
 0x206   : > { %v5177_v38 = vadd.f32 %v5176_v20, %v5175_v49  ;;  %v5178_v12 = vpop.f32.mrb[6].mxu1  ;;  %v5103_v14 = vpop.f32.mrb[7].mxu0  ;;  %5470 = vmatpush3.bf16.msra.mxu0 %v5995_v59 }
 0x207   : > { %v5104_v56 = vadd.f32 %v5103_v14, %v5102_v10  ;;  %v5179_v40 = vpop.f32.mrb[7].mxu1  ;;  %v5997_v14 = vld [vmem:[#allocation13 + $0xa0] sm:$0xff]  }
 0x208   : > { %v7586_v17 = vadd.f32 %v5177_v38, %v5101_v22  ;;  %v5180_v45 = vadd.f32 %v5179_v40, %v5178_v12  ;;  %v5996_v12 = vld [vmem:[#allocation13 + $0xe0] sm:$0xff]  }
 0x209   : > { %5471 = vmatprep.subr.bf16.mxu0 %v5996_v12 }
 0x20a   : > { %v7588_v30 = vadd.f32 %v5180_v45, %v5104_v56  ;;  %5472 = vmatpush3.bf16.msra.mxu0 %v5997_v14 }
 0x20b   : > { %v5105_v57 = vpop.f32.mrb[8].mxu0  ;;  %5473 = vmatprep.subr.bf16.mxu0 %v5998_v8 }
 0x20c   : > { %v5181_v21 = vpop.f32.mrb[8].mxu1  ;;  %v5106_v63 = vpop.f32.mrb[9].mxu0 }
 0x20d   : > { %v5107_v36 = vadd.f32 %v5106_v63, %v5105_v57  ;;  %v5182_v46 = vpop.f32.mrb[9].mxu1  ;;  %v5108_v3 = vpop.f32.mrb[10].mxu0 }
 0x20e   : > { %v5183_v48 = vadd.f32 %v5182_v46, %v5181_v21  ;;  %v5184_v0 = vpop.f32.mrb[10].mxu1  ;;  %v5109_v4 = vpop.f32.mrb[11].mxu0 }
 0x20f   : > { %v5110_v44 = vadd.f32 %v5109_v4, %v5108_v3  ;;  %v5185_v9 = vpop.f32.mrb[11].mxu1 }
 0x210   : > { %v7590_v52 = vadd.f32 %v5183_v48, %v5107_v36  ;;  %v5186_v39 = vadd.f32 %v5185_v9, %v5184_v0  ;;  %v5999_v36 = vld [vmem:[#allocation13 + $0xa8] sm:$0xff]   ;;  %v5992_v0 = vld [vmem:[#allocation13 + $0x70] sm:$0xff]  }
 0x211   : > { %v5994_v9 = vld [vmem:[#allocation13 + $0x30] sm:$0xff]   ;;  %5474 = vmatpush3.bf16.msra.mxu0 %v5999_v36  ;;  %5411 = vmatprep.subr.bf16.mxu1 %v5992_v0 }
 0x212   : > { %v7592_v16 = vadd.f32 %v5186_v39, %v5110_v44  ;;  %5412 = vmatpush3.bf16.msra.mxu1 %v5994_v9  ;;  %5475 = vmatprep.subr.bf16.mxu0 %v6002_v2 }
 0x213   : > { %v5111_v35 = vpop.f32.mrb[12].mxu0 }
 0x214   : > { %v5187_v11 = vpop.f32.mrb[12].mxu1  ;;  %v5112_v27 = vpop.f32.mrb[13].mxu0 }
 0x215   : > { %v5113_v5 = vadd.f32 %v5112_v27, %v5111_v35  ;;  %v5188_v60 = vpop.f32.mrb[13].mxu1  ;;  %v5114_v41 = vpop.f32.mrb[14].mxu0  ;;  %v6003_v35 = vld [vmem:[#allocation13 + $0xb0] sm:$0xff]  }
 0x216   : > { %v5189_v62 = vadd.f32 %v5188_v60, %v5187_v11  ;;  %v5190_v50 = vpop.f32.mrb[14].mxu1  ;;  %v5115_v6 = vpop.f32.mrb[15].mxu0  ;;  %5476 = vmatpush3.bf16.msra.mxu0 %v6003_v35  ;;  %v6004_v60 = vld [vmem:[#allocation13 + $0xf8] sm:$0xff]  }
 0x217   : > { %v5116_v23 = vadd.f32 %v5115_v6, %v5114_v41  ;;  %v5191_v55 = vpop.f32.mrb[15].mxu1  ;;  %v6005_v6 = vld [vmem:[#allocation13 + $0xb8] sm:$0xff]   ;;  %5477 = vmatprep.subr.bf16.mxu0 %v6004_v60 }
 0x218   : > { %v7594_v31 = vadd.f32 %v5189_v62, %v5113_v5  ;;  %v5192_v34 = vadd.f32 %v5191_v55, %v5190_v50  ;;  %v6000_v5 = vld [vmem:[#allocation13 + $0x78] sm:$0xff]  }
 0x219   : > { %v6001_v50 = vld [vmem:[#allocation13 + $0x38] sm:$0xff]   ;;  %5413 = vmatprep.subr.bf16.mxu1 %v6000_v5 }
 0x21a   : > { %v7596_v18 = vadd.f32 %v5192_v34, %v5116_v23  ;;  %5414 = vmatpush3.bf16.msra.mxu1 %v6001_v50  ;;  %5478 = vmatpush3.bf16.msra.mxu0 %v6005_v6 }
 0x21b   : > { %v5117_v24 = vpop.f32.mrb[16].mxu0 }
 0x21c   : > { %v5193_v42 = vpop.f32.mrb[16].mxu1  ;;  %v5118_v7 = vpop.f32.mrb[17].mxu0 }
 0x21d   : > { %v5119_v15 = vadd.f32 %v5118_v7, %v5117_v24  ;;  %v5194_v54 = vpop.f32.mrb[17].mxu1  ;;  %v5120_v61 = vpop.f32.mrb[18].mxu0 }
 0x21e   : > { %v5195_v19 = vadd.f32 %v5194_v54, %v5193_v42  ;;  %v5196_v49 = vpop.f32.mrb[18].mxu1  ;;  %v5121_v37 = vpop.f32.mrb[19].mxu0 }
 0x21f   : > { %v5122_v22 = vadd.f32 %v5121_v37, %v5120_v61  ;;  %v5197_v20 = vpop.f32.mrb[19].mxu1 }
 0x220   : > { %v7598_v10 = vadd.f32 %v5195_v19, %v5119_v15  ;;  %v5198_v38 = vadd.f32 %v5197_v20, %v5196_v49 }
 0x222   : > { %v7600_v56 = vadd.f32 %v5198_v38, %v5122_v22  ;;  %v6006_v38 = vld [vmem:[#allocation13 + $0x140] sm:$0xff]  }
 0x223   : > { %v5123_v40 = vpop.f32.mrb[20].mxu0  ;;  %5527 = vmatprep.subr.bf16.mxu1 %v6006_v38 }
 0x224   : > { %v5199_v45 = vpop.f32.mrb[20].mxu1  ;;  %v5124_v43 = vpop.f32.mrb[21].mxu0 }
 0x225   : > { %v5125_v57 = vadd.f32 %v5124_v43, %v5123_v40  ;;  %v5200_v21 = vpop.f32.mrb[21].mxu1  ;;  %v5126_v63 = vpop.f32.mrb[22].mxu0 }
 0x226   : > { %v5201_v46 = vadd.f32 %v5200_v21, %v5199_v45  ;;  %v5202_v3 = vpop.f32.mrb[22].mxu1  ;;  %v5127_v48 = vpop.f32.mrb[23].mxu0 }
 0x227   : > { %v5128_v4 = vadd.f32 %v5127_v48, %v5126_v63  ;;  %v5203_v44 = vpop.f32.mrb[23].mxu1 }
 0x228   : > { %v7602_v39 = vadd.f32 %v5201_v46, %v5125_v57  ;;  %v5204_v51 = vadd.f32 %v5203_v44, %v5202_v3 }
 0x22a   : > { %v7604_v58 = vadd.f32 %v5204_v51, %v5128_v4 }
 0x22b   : > { %v5129_v11 = vpop.f32.mrb[24].mxu0 }
 0x22c   : > { %v5205_v27 = vpop.f32.mrb[24].mxu1  ;;  %v5130_v26 = vpop.f32.mrb[25].mxu0 }
 0x22d   : > { %v5131_v41 = vadd.f32 %v5130_v26, %v5129_v11  ;;  %v5206_v28 = vpop.f32.mrb[25].mxu1  ;;  %v5132_v62 = vpop.f32.mrb[26].mxu0 }
 0x22e   : > { %v5207_v23 = vadd.f32 %v5206_v28, %v5205_v27  ;;  %v5208_v55 = vpop.f32.mrb[26].mxu1  ;;  %v5133_v29 = vpop.f32.mrb[27].mxu0 }
 0x22f   : > { %v5134_v34 = vadd.f32 %v5133_v29, %v5132_v62  ;;  %v5209_v47 = vpop.f32.mrb[27].mxu1 }
 0x230   : > { %v7606_v53 = vadd.f32 %v5207_v23, %v5131_v41  ;;  %v5210_v24 = vadd.f32 %v5209_v47, %v5208_v55 }
 0x232   : > { %v7608_v42 = vadd.f32 %v5210_v24, %v5134_v34 }
 0x233   : > { %v5135_v7 = vpop.f32.mrb[28].mxu0 }
 0x234   : > { %v5211_v32 = vpop.f32.mrb[28].mxu1  ;;  %v5136_v15 = vpop.f32.mrb[29].mxu0 }
 0x235   : > { %v5137_v54 = vadd.f32 %v5136_v15, %v5135_v7  ;;  %v5212_v61 = vpop.f32.mrb[29].mxu1  ;;  %v5138_v59 = vpop.f32.mrb[30].mxu0 }
 0x236   : > { %v5213_v19 = vadd.f32 %v5212_v61, %v5211_v32  ;;  %v5214_v49 = vpop.f32.mrb[30].mxu1  ;;  %v5139_v37 = vpop.f32.mrb[31].mxu0 }
 0x237   : > { %v5140_v22 = vadd.f32 %v5139_v37, %v5138_v59  ;;  %v5215_v20 = vpop.f32.mrb[31].mxu1 }
 0x238   : > { %v7610_v12 = vadd.f32 %v5213_v19, %v5137_v54  ;;  %v5216_v14 = vadd.f32 %v5215_v20, %v5214_v49  ;;  %v6014_v49 = vld [vmem:[#allocation13 + $0x1c0] sm:$0xff]  }
 0x239   : > { %5591 = vmatprep.subr.bf16.mxu0 %v6014_v49 }
 0x23a   : > { %v7612_v40 = vadd.f32 %v5216_v14, %v5140_v22 }
 0x23b   : > { %v5141_v45 = vpop.f32.mrb[32].mxu0 }
 0x23c   : > { %v5217_v43 = vpop.f32.mrb[32].mxu1  ;;  %v5142_v8 = vpop.f32.mrb[33].mxu0 }
 0x23d   : > { %v5143_v57 = vadd.f32 %v5142_v8, %v5141_v45  ;;  %v5218_v21 = vpop.f32.mrb[33].mxu1  ;;  %v5144_v63 = vpop.f32.mrb[34].mxu0 }
 0x23e   : > { %v5219_v36 = vadd.f32 %v5218_v21, %v5217_v43  ;;  %v5220_v46 = vpop.f32.mrb[34].mxu1  ;;  %v5145_v3 = vpop.f32.mrb[35].mxu0 }
 0x23f   : > { %v5146_v48 = vadd.f32 %v5145_v3, %v5144_v63  ;;  %v5221_v0 = vpop.f32.mrb[35].mxu1 }
 0x240   : > { %v7614_v4 = vadd.f32 %v5219_v36, %v5143_v57  ;;  %v5222_v44 = vadd.f32 %v5221_v0, %v5220_v46 }
 0x242   : > { %v7616_v9 = vadd.f32 %v5222_v44, %v5146_v48 }
 0x243   : > { %v5147_v51 = vpop.f32.mrb[36].mxu0 }
 0x244   : > { %v5223_v2 = vpop.f32.mrb[36].mxu1  ;;  %v5148_v35 = vpop.f32.mrb[37].mxu0 }
 0x245   : > { %v5149_v11 = vadd.f32 %v5148_v35, %v5147_v51  ;;  %v5224_v27 = vpop.f32.mrb[37].mxu1  ;;  %v5150_v26 = vpop.f32.mrb[38].mxu0 }
 0x246   : > { %v5225_v5 = vadd.f32 %v5224_v27, %v5223_v2  ;;  %v5226_v60 = vpop.f32.mrb[38].mxu1  ;;  %v5151_v41 = vpop.f32.mrb[39].mxu0 }
 0x247   : > { %v5152_v28 = vadd.f32 %v5151_v41, %v5150_v26  ;;  %v5227_v62 = vpop.f32.mrb[39].mxu1 }
 0x248   : > { %v7618_v50 = vadd.f32 %v5225_v5, %v5149_v11  ;;  %v5228_v6 = vadd.f32 %v5227_v62, %v5226_v60 }
 0x24a   : > { %v7620_v23 = vadd.f32 %v5228_v6, %v5152_v28 }
 0x24b   : > { %v5245_v55 = vpop.f32.mrb[40].mxu0 }
 0x24c   : > { %v5246_v29 = vpop.f32.mrb[41].mxu0  ;;  %v5321_v34 = vpop.f32.mrb[40].mxu1 }
 0x24d   : > { %v5247_v47 = vadd.f32 %v5246_v29, %v5245_v55  ;;  %v5248_v24 = vpop.f32.mrb[42].mxu0  ;;  %v5322_v7 = vpop.f32.mrb[41].mxu1 }
 0x24e   : > { %v5249_v32 = vpop.f32.mrb[43].mxu0  ;;  %v5323_v15 = vadd.f32 %v5322_v7, %v5321_v34  ;;  %v5324_v54 = vpop.f32.mrb[42].mxu1 }
 0x24f   : > { %v2281_v61 = vadd.f32 %v5247_v47, %v7582_v33  ;;  %v5250_v59 = vadd.f32 %v5249_v32, %v5248_v24  ;;  %v5325_v19 = vpop.f32.mrb[43].mxu1 }
 0x250   : > { %v5326_v37 = vadd.f32 %v5325_v19, %v5324_v54 }
 0x251   : > { %v2284_v22 = vadd.f32 %v5250_v59, %v7584_v1  ;;  %v7624_v20 = vadd.f32 %v5323_v15, %v2281_v61 }
 0x253   : > { %v5251_v38 = vpop.f32.mrb[44].mxu0  ;;  %v7626_v14 = vadd.f32 %v5326_v37, %v2284_v22 }
 0x254   : > { %v5252_v45 = vpop.f32.mrb[45].mxu0  ;;  %v5327_v43 = vpop.f32.mrb[44].mxu1 }
 0x255   : > { %v5253_v8 = vadd.f32 %v5252_v45, %v5251_v38  ;;  %v5254_v57 = vpop.f32.mrb[46].mxu0  ;;  %v5328_v21 = vpop.f32.mrb[45].mxu1 }
 0x256   : > { %v5255_v63 = vpop.f32.mrb[47].mxu0  ;;  %v5329_v36 = vadd.f32 %v5328_v21, %v5327_v43  ;;  %v5330_v33 = vpop.f32.mrb[46].mxu1 }
 0x257   : > { %v2289_v46 = vadd.f32 %v5253_v8, %v7586_v17  ;;  %v5256_v3 = vadd.f32 %v5255_v63, %v5254_v57  ;;  %v5331_v48 = vpop.f32.mrb[47].mxu1 }
 0x258   : > { %v5332_v0 = vadd.f32 %v5331_v48, %v5330_v33 }
 0x259   : > { %v2292_v1 = vadd.f32 %v5256_v3, %v7588_v30  ;;  %v7630_v44 = vadd.f32 %v5329_v36, %v2289_v46 }
 0x25b   : > { %v5257_v51 = vpop.f32.mrb[48].mxu0  ;;  %v7632_v2 = vadd.f32 %v5332_v0, %v2292_v1 }
 0x25c   : > { %v5258_v35 = vpop.f32.mrb[49].mxu0  ;;  %v5333_v11 = vpop.f32.mrb[48].mxu1 }
 0x25d   : > { %v5259_v27 = vadd.f32 %v5258_v35, %v5257_v51  ;;  %v5260_v26 = vpop.f32.mrb[50].mxu0  ;;  %v5334_v5 = vpop.f32.mrb[49].mxu1 }
 0x25e   : > { %v5261_v60 = vpop.f32.mrb[51].mxu0  ;;  %v5335_v41 = vadd.f32 %v5334_v5, %v5333_v11  ;;  %v5336_v28 = vpop.f32.mrb[50].mxu1 }
 0x25f   : > { %v2297_v17 = vadd.f32 %v5259_v27, %v7590_v52  ;;  %v5262_v62 = vadd.f32 %v5261_v60, %v5260_v26  ;;  %v5337_v6 = vpop.f32.mrb[51].mxu1 }
 0x260   : > { %v5338_v55 = vadd.f32 %v5337_v6, %v5336_v28 }
 0x261   : > { %v2300_v30 = vadd.f32 %v5262_v62, %v7592_v16  ;;  %v7636_v29 = vadd.f32 %v5335_v41, %v2297_v17 }
 0x263   : > { %v5263_v34 = vpop.f32.mrb[52].mxu0  ;;  %v7638_v47 = vadd.f32 %v5338_v55, %v2300_v30 }
 0x264   : > { %v5264_v24 = vpop.f32.mrb[53].mxu0  ;;  %v5339_v7 = vpop.f32.mrb[52].mxu1 }
 0x265   : > { %v5265_v32 = vadd.f32 %v5264_v24, %v5263_v34  ;;  %v5266_v15 = vpop.f32.mrb[54].mxu0  ;;  %v5340_v54 = vpop.f32.mrb[53].mxu1 }
 0x266   : > { %v5267_v61 = vpop.f32.mrb[55].mxu0  ;;  %v5341_v59 = vadd.f32 %v5340_v54, %v5339_v7  ;;  %v5342_v19 = vpop.f32.mrb[54].mxu1 }
 0x267   : > { %v2305_v52 = vadd.f32 %v5265_v32, %v7594_v31  ;;  %v5268_v49 = vadd.f32 %v5267_v61, %v5266_v15  ;;  %v5343_v37 = vpop.f32.mrb[55].mxu1 }
 0x268   : > { %v5344_v22 = vadd.f32 %v5343_v37, %v5342_v19 }
 0x269   : > { %v2308_v16 = vadd.f32 %v5268_v49, %v7596_v18  ;;  %v7642_v38 = vadd.f32 %v5341_v59, %v2305_v52 }
 0x26b   : > { %v5269_v45 = vpop.f32.mrb[56].mxu0  ;;  %v7644_v43 = vadd.f32 %v5344_v22, %v2308_v16 }
 0x26c   : > { %v5270_v8 = vpop.f32.mrb[57].mxu0  ;;  %v5345_v57 = vpop.f32.mrb[56].mxu1 }
 0x26d   : > { %v5271_v21 = vadd.f32 %v5270_v8, %v5269_v45  ;;  %v5272_v63 = vpop.f32.mrb[58].mxu0  ;;  %v5346_v36 = vpop.f32.mrb[57].mxu1 }
 0x26e   : > { %v5273_v33 = vpop.f32.mrb[59].mxu0  ;;  %v5347_v46 = vadd.f32 %v5346_v36, %v5345_v57  ;;  %v5348_v3 = vpop.f32.mrb[58].mxu1 }
 0x26f   : > { %v2313_v31 = vadd.f32 %v5271_v21, %v7598_v10  ;;  %v5274_v48 = vadd.f32 %v5273_v33, %v5272_v63  ;;  %v5349_v0 = vpop.f32.mrb[59].mxu1 }
 0x270   : > { %v5350_v1 = vadd.f32 %v5349_v0, %v5348_v3 }
 0x271   : > { %v2316_v18 = vadd.f32 %v5274_v48, %v7600_v56  ;;  %v7648_v51 = vadd.f32 %v5347_v46, %v2313_v31 }
 0x273   : > { %v5275_v35 = vpop.f32.mrb[60].mxu0  ;;  %v7650_v11 = vadd.f32 %v5350_v1, %v2316_v18 }
 0x274   : > { %v5276_v27 = vpop.f32.mrb[61].mxu0  ;;  %v5351_v26 = vpop.f32.mrb[60].mxu1 }
 0x275   : > { %v5277_v5 = vadd.f32 %v5276_v27, %v5275_v35  ;;  %v5278_v60 = vpop.f32.mrb[62].mxu0  ;;  %v5352_v41 = vpop.f32.mrb[61].mxu1 }
 0x276   : > { %v5279_v28 = vpop.f32.mrb[63].mxu0  ;;  %v5353_v17 = vadd.f32 %v5352_v41, %v5351_v26  ;;  %v5354_v62 = vpop.f32.mrb[62].mxu1 }
 0x277   : > { %v2321_v10 = vadd.f32 %v5277_v5, %v7602_v39  ;;  %v5280_v6 = vadd.f32 %v5279_v28, %v5278_v60  ;;  %v5355_v55 = vpop.f32.mrb[63].mxu1 }
 0x278   : > { %v5356_v30 = vadd.f32 %v5355_v55, %v5354_v62 }
 0x279   : > { %v2324_v56 = vadd.f32 %v5280_v6, %v7604_v58  ;;  %v7654_v34 = vadd.f32 %v5353_v17, %v2321_v10 }
 0x27b   : > { %v5281_v24 = vpop.f32.mrb[64].mxu0  ;;  %v7656_v7 = vadd.f32 %v5356_v30, %v2324_v56 }
 0x27c   : > { %v5282_v32 = vpop.f32.mrb[65].mxu0  ;;  %v5357_v15 = vpop.f32.mrb[64].mxu1 }
 0x27d   : > { %v5283_v54 = vadd.f32 %v5282_v32, %v5281_v24  ;;  %v5284_v61 = vpop.f32.mrb[66].mxu0  ;;  %v5358_v59 = vpop.f32.mrb[65].mxu1 }
 0x27e   : > { %v5285_v19 = vpop.f32.mrb[67].mxu0  ;;  %v5359_v52 = vadd.f32 %v5358_v59, %v5357_v15  ;;  %v5360_v49 = vpop.f32.mrb[66].mxu1 }
 0x27f   : > { %v2329_v39 = vadd.f32 %v5283_v54, %v7606_v53  ;;  %v5286_v37 = vadd.f32 %v5285_v19, %v5284_v61  ;;  %v5361_v22 = vpop.f32.mrb[67].mxu1 }
 0x280   : > { %v5362_v16 = vadd.f32 %v5361_v22, %v5360_v49 }
 0x281   : > { %v2332_v58 = vadd.f32 %v5286_v37, %v7608_v42  ;;  %v7660_v45 = vadd.f32 %v5359_v52, %v2329_v39  ;;  %v7678_v37 = vstv %s4823_s21  ;;  %s8709_s21 = sld [smem:[#allocation40_spill]] }
 0x282   : > { %vm2664_vm11 = vcmp.ge.s32.totalorder %v7678_v37, 0  ;;  %vm2674_vm2 = vcmp.lt.s32.totalorder %v7678_v37, 16 }
 0x283   : > { %v5287_v8 = vpop.f32.mrb[68].mxu0  ;;  %v7662_v57 = vadd.f32 %v5362_v16, %v2332_v58  ;;  %vm7715_vm13 = vmand %vm2664_vm11, %vm2674_vm2 }
 0x284   : > { %v5288_v21 = vpop.f32.mrb[69].mxu0  ;;  %v5363_v63 = vpop.f32.mrb[68].mxu1  ;;  %vm5005_vm0 = vmpackc.low %vm7715_vm13, %vm7715_vm13 }
 0x285   : > { %v5289_v36 = vadd.f32 %v5288_v21, %v5287_v8  ;;  %v5290_v33 = vpop.f32.mrb[70].mxu0  ;;  %v5364_v46 = vpop.f32.mrb[69].mxu1  ;;  %v2655_v21 = vadd.s32 1, %v7678_v37 }
 0x286   : > { %v5291_v3 = vpop.f32.mrb[71].mxu0  ;;  %v5365_v31 = vadd.f32 %v5364_v46, %v5363_v63  ;;  %v5366_v48 = vpop.f32.mrb[70].mxu1 }
 0x287   : > { %v2337_v53 = vadd.f32 %v5289_v36, %v7610_v12  ;;  %v5292_v0 = vadd.f32 %v5291_v3, %v5290_v33  ;;  %v5367_v1 = vpop.f32.mrb[71].mxu1  ;;  %v7688_v36 = vld [vmem:[%s8632_s16 + $0x2] ss:$0 sm:$0xff]  ;;  %vm2665_vm8 = vcmp.ge.s32.totalorder %v2655_v21, 0  ;;  %vm2675_vm3 = vcmp.lt.s32.totalorder %v2655_v21, 16  ;;  %s8710_s14 = smov %s8709_s21  ;;  %s8441_s13 = scalar_lea.hbm %s8709_s21, %s4902_s22 }
 0x288   : > { %v5368_v18 = vadd.f32 %v5367_v1, %v5366_v48  ;;  %vm7708_vm12 = vmand %vm2665_vm8, %vm2675_vm3 }
 0x289   : > { %v2340_v42 = vadd.f32 %v5292_v0, %v7612_v40  ;;  %v7666_v35 = vadd.f32 %v5365_v31, %v2337_v53  ;;  %v7696_v31 = vld [vmem:[%s8632_s16 + $0x3] ss:$0 sm:$0xff]  ;;  %vm8557_vm2 = vmpackc.low %vm7708_vm12, %vm7708_vm12 }
 0x28b   : > { %v5293_v27 = vpop.f32.mrb[72].mxu0  ;;  %v7668_v26 = vadd.f32 %v5368_v18, %v2340_v42  ;;  %v2656_v42 = vadd.s32 2, %v7678_v37 }
 0x28c   : > { %v5294_v5 = vpop.f32.mrb[73].mxu0  ;;  %v5369_v60 = vpop.f32.mrb[72].mxu1 }
 0x28d   : > { %v5295_v41 = vadd.f32 %v5294_v5, %v5293_v27  ;;  %v5296_v28 = vpop.f32.mrb[74].mxu0  ;;  %v5370_v17 = vpop.f32.mrb[73].mxu1  ;;  %vm2666_vm15 = vcmp.ge.s32.totalorder %v2656_v42, 0  ;;  %vm2676_vm1 = vcmp.lt.s32.totalorder %v2656_v42, 16  ;;  %v6042_v5 = vld [vmem:[#allocation13 + $0x220] sm:$0xff]  }
 0x28e   : > { %v5297_v62 = vpop.f32.mrb[75].mxu0  ;;  %v5371_v10 = vadd.f32 %v5370_v17, %v5369_v60  ;;  %v5372_v6 = vpop.f32.mrb[74].mxu1  ;;  %vm7758_vm9 = vmand %vm2666_vm15, %vm2676_vm1 }
 0x28f   : > { %v2345_v12 = vadd.f32 %v5295_v41, %v7614_v4  ;;  %v5298_v55 = vadd.f32 %v5297_v62, %v5296_v28  ;;  %v5373_v30 = vpop.f32.mrb[75].mxu1 }
 0x290   : > { %v5374_v56 = vadd.f32 %v5373_v30, %v5372_v6  ;;  %v2657_v6 = vadd.s32 3, %v7678_v37 }
 0x291   : > { %v2348_v40 = vadd.f32 %v5298_v55, %v7616_v9  ;;  %v7672_v24 = vadd.f32 %v5371_v10, %v2345_v12 }
 0x292   : > { %vm2667_vm14 = vcmp.ge.s32.totalorder %v2657_v6, 0  ;;  %vm2677_vm4 = vcmp.lt.s32.totalorder %v2657_v6, 16 }
 0x293   : > { %v5299_v32 = vpop.f32.mrb[76].mxu0  ;;  %v7676_v15 = vadd.f32 %v5374_v56, %v2348_v40  ;;  %v7723_v56 = vadd.s32 5, %v7678_v37  ;;  %vm7790_vm8 = vmand %vm2667_vm14, %vm2677_vm4 }
 0x294   : > { %v5300_v54 = vpop.f32.mrb[77].mxu0  ;;  %v5375_v61 = vpop.f32.mrb[76].mxu1 }
 0x295   : > { %v5301_v59 = vadd.f32 %v5300_v54, %v5299_v32  ;;  %v5302_v19 = vpop.f32.mrb[78].mxu0  ;;  %v5376_v52 = vpop.f32.mrb[77].mxu1  ;;  %vm2669_vm10 = vcmp.ge.s32.totalorder %v7723_v56, 0  ;;  %vm2679_vm7 = vcmp.lt.s32.totalorder %v7723_v56, 16 }
 0x296   : > { %v5303_v49 = vpop.f32.mrb[79].mxu0  ;;  %v5377_v39 = vadd.f32 %v5376_v52, %v5375_v61  ;;  %v5378_v4 = vpop.f32.mrb[78].mxu1  ;;  %vm7863_vm1 = vmand %vm2669_vm10, %vm2679_vm7 }
 0x297   : > { %v2353_v22 = vadd.f32 %v5301_v59, %v7618_v50  ;;  %v5304_v9 = vadd.f32 %v5303_v49, %v5302_v19  ;;  %v5379_v16 = vpop.f32.mrb[79].mxu1 }
 0x298   : > { %v5380_v58 = vadd.f32 %v5379_v16, %v5378_v4 }
 0x299   : > { %v2356_v8 = vadd.f32 %v5304_v9, %v7620_v23  ;;  %v7683_v63 = vadd.f32 %v5377_v39, %v2353_v22 }
 0x29b   : > { %v5689_v33 = vpop.f32.mrb[80].mxu0  ;;  %v7690_v46 = vadd.f32 %v5380_v58, %v2356_v8 }
 0x29c   : > { %v2515_v3 = vadd.f32 %v5689_v33, %v7630_v44  ;;  %v2506_v50 = vpop.f32.mrb[81].mxu0 }
 0x29d   : > { %v2507_v23 = vadd.f32 %v2506_v50, %v7624_v20  ;;  %v5690_v48 = vpop.f32.mrb[82].mxu0  ;;  %v7753_v50 = vadd.s32 4, %v7678_v37 }
 0x29e   : > { %v2591_v53 = vmul.f32 %v7688_v36, %v2515_v3  ;;  %v2518_v0 = vadd.f32 %v5690_v48, %v7632_v2  ;;  %v2509_v1 = vpop.f32.mrb[83].mxu0 }
 0x29f   : > { %v2589_v44 = vmul.f32 %v7688_v36, %v2507_v23  ;;  %v2510_v18 = vadd.f32 %v2509_v1, %v7626_v14  ;;  %vm2668_vm3 = vcmp.ge.s32.totalorder %v7753_v50, 0  ;;  %vm2678_vm11 = vcmp.lt.s32.totalorder %v7753_v50, 16  ;;  %v6013_v50 = vld [vmem:[#allocation13 + $0x118] sm:$0xff]  }
 0x2a0   : > { %v2615_v27 = vadd.f32 %v7696_v31, %v2591_v53  ;;  %v2592_v20 = vmul.f32 %v7688_v36, %v2518_v0  ;;  %vm7921_vm7 = vmand %vm2668_vm3, %vm2678_vm11 }
 0x2a1   : > { %v2613_v2 = vadd.f32 %v7696_v31, %v2589_v44  ;;  %v2590_v60 = vmul.f32 %v7688_v36, %v2510_v18  ;;  %v7764_v18 = vadd.s32 6, %v7678_v37 }
 0x2a2   : > { %v2635_v41 = vmax.f32 %v2615_v27, 0.0  ;;  %v2616_v28 = vadd.f32 %v7696_v31, %v2592_v20 }
 0x2a3   : > { %v2633_v17 = vmax.f32 %v2613_v2, 0.0  ;;  %v2614_v62 = vadd.f32 %v7696_v31, %v2590_v60  ;;  %v5693_v10 = vpop.f32.mrb[84].mxu0  ;;  %vm2680_vm15 = vcmp.lt.s32.totalorder %v7764_v18, 16 }
 0x2a4   : > { %v2636_v12 = vmax.f32 %v2616_v28, 0.0  ;;  %v2531_v55 = vadd.f32 %v5693_v10, %v7642_v38  ;;  %v2522_v30 = vpop.f32.mrb[85].mxu0  ;;  %v2696_v40 = vsel %vm7708_vm12, %v2635_v41, 0.0 }
 0x2a5   : > { %v2634_v32 = vmax.f32 %v2614_v62, 0.0  ;;  %v2523_v54 = vadd.f32 %v2522_v30, %v7636_v29  ;;  %v5694_v61 = vpop.f32.mrb[86].mxu0  ;;  %v2694_v59 = vsel %vm7715_vm13, %v2633_v17, 0.0 }
 0x2a6   : > { %v2697_v19 = vsel %vm7708_vm12, %v2636_v12, 0.0  ;;  %v7732_v52 = vpack.c.bf16 %v2636_v12, %v2635_v41  ;;  %v2595_v38 = vmul.f32 %v7688_v36, %v2531_v55  ;;  %v2534_v49 = vadd.f32 %v5694_v61, %v7644_v43  ;;  %v2525_v39 = vpop.f32.mrb[87].mxu0 }
 0x2a7   : > { %v5006_v4 = vpack.c.bf16 %v2634_v32, %v2633_v17  ;;  %v2593_v29 = vmul.f32 %v7688_v36, %v2523_v54  ;;  %v2526_v22 = vadd.f32 %v2525_v39, %v7638_v47  ;;  %v2695_v9 = vsel %vm7715_vm13, %v2634_v32, 0.0 }
 0x2a8   : > { %v2619_v16 = vadd.f32 %v7696_v31, %v2595_v38  ;;  %v2596_v58 = vmul.f32 %v7688_v36, %v2534_v49  ;;  %v2714_v8 = vpack.c.bf16 %v2695_v9, %v2694_v59  ;;  %v7745_v21 = vpack.c.bf16 %v2697_v19, %v2696_v40  ;;  %v6007_v49 = vld [vmem:[#allocation13 + $0x100] sm:$0xff]  }
 0x2a9   : > { %v2617_v43 = vadd.f32 %v7696_v31, %v2593_v29  ;;  %v2594_v33 = vmul.f32 %v7688_v36, %v2526_v22  ;;  %5007 = vmatprep.mubr.msk.bf16.mxu1 %vm5005_vm0, %v5006_v4  ;;  %v6008_v29 = vld [vmem:[#allocation13 + $0x148] sm:$0xff]   ;;  %vm2670_vm13 = vcmp.ge.s32.totalorder %v7764_v18, 0  ;;  %vm7891_vm0 = vmpackc.low %vm7758_vm9, %vm7758_vm9 }
 0x2aa   : > { %v7750_v3 = vadd.f32 %v7696_v31, %v2596_v58  ;;  %v2743_v47 = vshrl.u32 %v2714_v8, 16  ;;  %v2750_v23 = vshrl.u32 %v7745_v21, 16  ;;  %v2639_v48 = vmax.f32 %v2619_v16, 0.0 }
 0x2ab   : > { %v2637_v53 = vmax.f32 %v2617_v43, 0.0  ;;  %v2618_v1 = vadd.f32 %v7696_v31, %v2594_v33  ;;  %v5697_v44 = vpop.f32.mrb[88].mxu0  ;;  %v2753_v60 = vshll.u32 %v7745_v21, 16  ;;  %v2746_v62 = vshll.u32 %v2714_v8, 16  ;;  %v6035_v21 = vld [vmem:[#allocation13 + $0x1b0] sm:$0xff]  }
 0x2ac   : > { %v2640_v27 = vmax.f32 %v7750_v3, 0.0  ;;  %v2547_v20 = vadd.f32 %v5697_v44, %v7654_v34  ;;  %v2538_v2 = vpop.f32.mrb[89].mxu0  ;;  %v2752_v42 = vrot.slane %v2750_v23, 7  ;;  %v2745_v17 = vrot.slane %v2743_v47, 7  ;;  %v6015_v44 = vld [vmem:[#allocation13 + $0x180] sm:$0xff]  }
 0x2ad   : > { %v2638_v41 = vmax.f32 %v2618_v1, 0.0  ;;  %v2539_v28 = vadd.f32 %v2538_v2, %v7648_v51  ;;  %v5698_v14 = vpop.f32.mrb[90].mxu0  ;;  %v2698_v10 = vsel %vm7758_vm9, %v2637_v53, 0.0  ;;  %v2851_v6 = vrot.slane %v2746_v62, 1 }
 0x2ae   : > { %v7778_v34 = vpack.c.bf16 %v2640_v27, %v2639_v48  ;;  %v2599_v12 = vmul.f32 %v7688_v36, %v2547_v20  ;;  %v2550_v55 = vadd.f32 %v5698_v14, %v7656_v7  ;;  %v2541_v30 = vpop.f32.mrb[91].mxu0  ;;  %v2755_v19 = vor.u32 %v2753_v60, %v2752_v42 }
 0x2af   : > { %v2699_v40 = vsel %vm7758_vm9, %v2638_v41, 0.0  ;;  %v7784_v32 = vpack.c.bf16 %v2638_v41, %v2637_v53  ;;  %v2597_v51 = vmul.f32 %v7688_v36, %v2539_v28  ;;  %v2542_v54 = vadd.f32 %v2541_v30, %v7650_v11  ;;  %v6009_v41 = vld [vmem:[#allocation13 + $0x108] sm:$0xff]  }
 0x2b0   : > { %v7795_v59 = vadd.f32 %v7696_v31, %v2599_v12  ;;  %v2600_v7 = vmul.f32 %v7688_v36, %v2550_v55  ;;  %v2748_v38 = vor.u32 %v2746_v62, %v2745_v17  ;;  %v7809_v4 = vpack.c.bf16 %v2699_v40, %v2698_v10  ;;  %v6018_v28 = vld [vmem:[#allocation13 + $0x1c8] sm:$0xff]  }
 0x2b1   : > { %v7801_v39 = vadd.f32 %v7696_v31, %v2597_v51  ;;  %v2598_v11 = vmul.f32 %v7688_v36, %v2542_v54  ;;  %v7816_v9 = vsel %vm6923_vm6, 0, %v2755_v19  ;;  %v7821_v58 = vadd.s32 7, %v7678_v37 }
 0x2b2   : > { %v7812_v22 = vadd.f32 %v7696_v31, %v2600_v7  ;;  %v2806_v16 = vsel %vm6923_vm6, 0, %v2748_v38  ;;  %v2700_v8 = vsel %vm7790_vm8, %v2639_v48, 0.0  ;;  %4089 = vmatprep.mubr.bf16.mxu0 %v7816_v9  ;;  %v2852_v33 = vor.u32 %v2851_v6, %v2743_v47  ;;  %v6019_v7 = vld [vmem:[#allocation13 + $0x188] sm:$0xff]  }
 0x2b3   : > { %v7826_v43 = vadd.f32 %v7696_v31, %v2598_v11  ;;  %3993 = vmatmul.mubr.bf16.vlgmr.msra.gmra.mrb[80].mxu1 %v2806_v16  ;;  %v5701_v53 = vpop.f32.mrb[92].mxu0  ;;  %v7830_v1 = vadd.s32 8, %v7678_v37  ;;  %v2643_v20 = vmax.f32 %v7795_v59, 0.0  ;;  %v2757_v42 = vshrl.u32 %v7809_v4, 16  ;;  %v6011_v11 = vld [vmem:[#allocation13 + $0x110] sm:$0xff]  }
 0x2b4   : > { %v2644_v2 = vmax.f32 %v7812_v22, 0.0  ;;  %5010 = vmatprep.mubr.msk.bf16.mxu1 %vm8557_vm2, %v7732_v52  ;;  %5528 = vmatpush3.bf16.msra.mxu1 %v6007_v49  ;;  %v2563_v48 = vadd.f32 %v5701_v53, %v7666_v35  ;;  %v2554_v47 = vpop.f32.mrb[93].mxu0  ;;  %v2641_v14 = vmax.f32 %v7801_v39, 0.0  ;;  %v2910_v62 = vsel %vm6950_vm5, %v2852_v33, 0  ;;  %v6010_v35 = vld [vmem:[#allocation13 + $0x150] sm:$0xff]   ;;  %v6012_v33 = vld [vmem:[#allocation13 + $0x158] sm:$0xff]   ;;  %vm7969_vm2 = vmand %vm2670_vm13, %vm2680_vm15 }
 0x2b5   : > { %v2642_v17 = vmax.f32 %v7826_v43, 0.0  ;;  %v2555_v10 = vadd.f32 %v2554_v47, %v7660_v45  ;;  %v5702_v12 = vpop.f32.mrb[94].mxu0  ;;  %5529 = vmatprep.subr.bf16.mxu1 %v6008_v29  ;;  %v2701_v55 = vsel %vm7790_vm8, %v2640_v27, 0.0  ;;  %4090 = vmatmul.mubr.bf16.vlgmr.msra.gmra.mrb[100].mxu0 %v2910_v62  ;;  %v2759_v38 = vrot.slane %v2757_v42, 7  ;;  %v6023_v62 = vld [vmem:[#allocation13 + $0x190] sm:$0xff]   ;;  %vm7992_vm13 = vmpackc.low %vm7790_vm8, %vm7790_vm8  ;;  %v6020_v22 = vld [vmem:[#allocation13 + $0x168] sm:$0xff]  }
 0x2b6   : > { %v7855_v30 = vpack.c.bf16 %v2644_v2, %v2643_v20  ;;  %v2603_v40 = vmul.f32 %v7688_v36, %v2563_v48  ;;  %v2566_v45 = vadd.f32 %v5702_v12, %v7668_v26  ;;  %v2557_v51 = vpop.f32.mrb[95].mxu0  ;;  %v2760_v26 = vshll.u32 %v7809_v4, 16  ;;  %5592 = vmatpush3.bf16.msra.mxu0 %v6015_v44  ;;  %v6022_v48 = vld [vmem:[#allocation13 + $0x1d0] sm:$0xff]   ;;  %v6045_v29 = vld [vmem:[#allocation13 + $0x238] sm:$0xff]  }
 0x2b7   : > { %v7871_v3 = vpack.c.bf16 %v2642_v17, %v2641_v14  ;;  %v2601_v27 = vmul.f32 %v7688_v36, %v2555_v10  ;;  %v2558_v59 = vadd.f32 %v2557_v51, %v7662_v57  ;;  %v2858_v49 = vrot.slane %v2753_v60, 1  ;;  %5593 = vmatprep.subr.bf16.mxu0 %v6018_v28 }
 0x2b8   : > { %v7877_v56 = vadd.f32 %v7696_v31, %v2603_v40  ;;  %v2604_v19 = vmul.f32 %v7688_v36, %v2566_v45  ;;  %5530 = vmatpush3.bf16.msra.mxu1 %v6009_v41  ;;  %v7895_v16 = vpack.c.bf16 %v2701_v55, %v2700_v8  ;;  %v7898_v60 = vadd.s32 9, %v7678_v37 }
 0x2b9   : > { %v7885_v57 = vadd.f32 %v7696_v31, %v2601_v27  ;;  %v2602_v6 = vmul.f32 %v7688_v36, %v2558_v59  ;;  %5531 = vmatprep.subr.bf16.mxu1 %v6010_v35  ;;  %v7902_v53 = vsel %vm7863_vm1, %v2643_v20, 0.0  ;;  %vm2671_vm14 = vcmp.ge.s32.totalorder %v7821_v58, 0  ;;  %v6016_v59 = vld [vmem:[#allocation13 + $0x160] sm:$0xff]  }
 0x2ba   : > { %vm2681_vm4 = vcmp.lt.s32.totalorder %v7821_v58, 16  ;;  %v7907_v0 = vadd.f32 %v7696_v31, %v2604_v19  ;;  %v2762_v44 = vor.u32 %v2760_v26, %v2759_v38  ;;  %v2859_v8 = vor.u32 %v2858_v49, %v2750_v23  ;;  %5594 = vmatpush3.bf16.msra.mxu0 %v6019_v7 }
 0x2bb   : > { %v2647_v47 = vmax.f32 %v7877_v56, 0.0  ;;  %v2626_v37 = vadd.f32 %v7696_v31, %v2602_v6  ;;  %4001 = vmatmul.mubr.bf16.gmra.mrb[84].mxu1 %v7816_v9  ;;  %v5705_v20 = vpop.f32.mrb[96].mxu0  ;;  %v2764_v41 = vshrl.u32 %v7895_v16, 16  ;;  %vm2672_vm9 = vcmp.ge.s32.totalorder %v7830_v1, 0  ;;  %5595 = vmatprep.subr.bf16.mxu0 %v6022_v48  ;;  %v6025_v6 = vld [vmem:[#allocation13 + $0x198] sm:$0xff]   ;;  %vm8024_vm8 = vmand %vm2671_vm14, %vm2681_vm4 }
 0x2bc   : > { %vm2682_vm10 = vcmp.lt.s32.totalorder %v7830_v1, 16  ;;  %v2865_v28 = vrot.slane %v2760_v26, 1  ;;  %v2645_v23 = vmax.f32 %v7885_v57, 0.0  ;;  %v2648_v9 = vmax.f32 %v7907_v0, 0.0  ;;  %5013 = vmatprep.mubr.msk.bf16.mxu1 %vm7891_vm0, %v7784_v32  ;;  %v2570_v35 = vpop.f32.mrb[97].mxu0  ;;  %5532 = vmatpush3.bf16.msra.mxu1 %v6011_v11  ;;  %v6024_v26 = vld [vmem:[#allocation13 + $0x1d8] sm:$0xff]   ;;  %vm8077_vm4 = vmpackc.low %vm7921_vm7, %vm7921_vm7 }
 0x2bd   : > { %v7929_v10 = vsel %vm6923_vm6, 0, %v2762_v44  ;;  %v2767_v12 = vshll.u32 %v7895_v16, 16  ;;  %v2646_v55 = vmax.f32 %v2626_v37, 0.0  ;;  %v7938_v40 = vsel %vm6950_vm5, %v2859_v8, 0  ;;  %v5706_v27 = vpop.f32.mrb[98].mxu0  ;;  %5533 = vmatprep.subr.bf16.mxu1 %v6012_v33  ;;  %v6017_v44 = vld [vmem:[#allocation13 + $0x120] sm:$0xff]   ;;  %vm8037_vm15 = vmand %vm2672_vm9, %vm2682_vm10 }
 0x2be   : > { %4097 = vmatprep.mubr.bf16.mxu0 %v7929_v10  ;;  %v2579_v45 = vadd.f32 %v5705_v20, %v7683_v63  ;;  %v2766_v51 = vrot.slane %v2764_v41, 7  ;;  %vm2673_vm3 = vcmp.ge.s32.totalorder %v7898_v60, 0  ;;  %vm2683_vm11 = vcmp.lt.s32.totalorder %v7898_v60, 16  ;;  %v2573_v49 = vpop.f32.mrb[99].mxu0  ;;  %5596 = vmatpush3.bf16.msra.mxu0 %v6023_v62  ;;  %vm8111_vm9 = vmpackc.low %vm7863_vm1, %vm7863_vm1 }
 0x2bf   : > { %v2703_v7 = vsel %vm7921_vm7, %v2642_v17, 0.0  ;;  %v7953_v63 = vpack.c.bf16 %v2648_v9, %v2647_v47  ;;  %4098 = vmatmul.mubr.bf16.gmra.mrb[104].mxu0 %v7938_v40  ;;  %v2571_v19 = vadd.f32 %v2570_v35, %v7672_v24  ;;  %v2582_v38 = vadd.f32 %v5706_v27, %v7690_v46  ;;  %5597 = vmatprep.subr.bf16.mxu0 %v6024_v26  ;;  %vm8060_vm14 = vmand %vm2673_vm3, %vm2683_vm11 }
 0x2c0   : > { %v2702_v43 = vsel %vm7921_vm7, %v2641_v14, 0.0  ;;  %v7962_v17 = vpack.c.bf16 %v2646_v55, %v2645_v23  ;;  %v2607_v11 = vmul.f32 %v7688_v36, %v2579_v45  ;;  %v2769_v57 = vor.u32 %v2767_v12, %v2766_v51  ;;  %5534 = vmatpush3.bf16.msra.mxu1 %v6013_v50  ;;  %vm8707_vm10 = vmpackc.low %vm7708_vm12, %vm7708_vm12 }
 0x2c1   : > { %v2605_v46 = vmul.f32 %v7688_v36, %v2571_v19  ;;  %v2608_v39 = vmul.f32 %v7688_v36, %v2582_v38  ;;  %v2574_v14 = vadd.f32 %v2573_v49, %v7676_v15  ;;  %v2866_v33 = vor.u32 %v2865_v28, %v2757_v42  ;;  %5535 = vmatprep.subr.bf16.mxu1 %v6016_v59  ;;  %v6030_v59 = vld [vmem:[#allocation13 + $0x1e8] sm:$0xff]   ;;  %vm5050_vm12 = vmpackc.low %vm8037_vm15, %vm8037_vm15 }
 0x2c2   : > { %v2705_v18 = vsel %vm7863_vm1, %v2644_v2, 0.0  ;;  %v7983_v8 = vadd.f32 %v7696_v31, %v2607_v11  ;;  %v7987_v48 = vsel %vm6923_vm6, 0, %v2769_v57  ;;  %v7996_v4 = vpack.c.bf16 %v2703_v7, %v2702_v43  ;;  %v6028_v2 = vld [vmem:[#allocation13 + $0x1e0] sm:$0xff]   ;;  %5598 = vmatpush3.bf16.msra.mxu0 %v6025_v6  ;;  %v6031_v6 = vld [vmem:[#allocation13 + $0x1a8] sm:$0xff]   ;;  %vm8138_vm1 = vmpackc.low %vm7969_vm2, %vm7969_vm2 }
 0x2c3   : > { %v2707_v42 = vsel %vm7969_vm2, %v2646_v55, 0.0  ;;  %4105 = vmatprep.mubr.bf16.mxu0 %v7987_v48  ;;  %v2629_v37 = vadd.f32 %v7696_v31, %v2605_v46  ;;  %v2632_v61 = vadd.f32 %v7696_v31, %v2608_v39  ;;  %v2606_v20 = vmul.f32 %v7688_v36, %v2574_v14  ;;  %4009 = vmatmul.mubr.bf16.gmra.mrb[88].mxu1 %v7929_v10  ;;  %v6029_v55 = vld [vmem:[#allocation13 + $0x1a0] sm:$0xff]  }
 0x2c4   : > { %v2706_v28 = vsel %vm7969_vm2, %v2645_v23, 0.0  ;;  %v8009_v62 = vsel %vm6950_vm5, %v2866_v33, 0  ;;  %v2771_v35 = vshrl.u32 %v7996_v4, 16  ;;  %v2872_v50 = vrot.slane %v2767_v12, 1  ;;  %5016 = vmatprep.mubr.msk.bf16.mxu1 %vm7992_vm13, %v7778_v34  ;;  %5536 = vmatpush3.bf16.msra.mxu1 %v6017_v44  ;;  %v6021_v23 = vld [vmem:[#allocation13 + $0x128] sm:$0xff]   ;;  %v6027_v33 = vld [vmem:[#allocation13 + $0x130] sm:$0xff]   ;;  %vm8161_vm2 = vmpackc.low %vm8024_vm8, %vm8024_vm8 }
 0x2c5   : > { %v2651_v45 = vmax.f32 %v7983_v8, 0.0  ;;  %v2652_v51 = vmax.f32 %v2632_v61, 0.0  ;;  %v2630_v27 = vadd.f32 %v7696_v31, %v2606_v20  ;;  %v8018_v36 = vpack.c.bf16 %v2705_v18, %v7902_v53  ;;  %5537 = vmatprep.subr.bf16.mxu1 %v6020_v22  ;;  %v6026_v53 = vld [vmem:[#allocation13 + $0x170] sm:$0xff]   ;;  %5599 = vmatprep.subr.bf16.mxu0 %v6028_v2  ;;  %v6032_v8 = vld [vmem:[#allocation13 + $0x178] sm:$0xff]  }
 0x2c6   : > { %v2649_v26 = vmax.f32 %v2629_v37, 0.0  ;;  %v2773_v31 = vrot.slane %v2771_v35, 7  ;;  %v2774_v7 = vshll.u32 %v7996_v4, 16  ;;  %v8031_v19 = vpack.c.bf16 %v2707_v42, %v2706_v28  ;;  %5600 = vmatpush3.bf16.msra.mxu0 %v6029_v55  ;;  %v6036_v20 = vld [vmem:[#allocation13 + $0x1f8] sm:$0xff]  }
 0x2c7   : > { %v8041_v38 = vpack.c.bf16 %v2652_v51, %v2651_v45  ;;  %v2650_v49 = vmax.f32 %v2630_v27, 0.0  ;;  %4106 = vmatmul.mubr.bf16.gmra.mrb[108].mxu0 %v8009_v62  ;;  %v2778_v43 = vshrl.u32 %v8018_v36, 16  ;;  %v2709_v11 = vsel %vm8024_vm8, %v2648_v9, 0.0  ;;  %5601 = vmatprep.subr.bf16.mxu0 %v6030_v59  ;;  %v6038_v27 = vld [vmem:[#allocation13 + $0x200] sm:$0xff]  }
 0x2c8   : > { %v2776_v57 = vor.u32 %v2774_v7, %v2773_v31  ;;  %v2781_v14 = vshll.u32 %v8018_v36, 16  ;;  %5538 = vmatpush3.bf16.msra.mxu1 %v6021_v23  ;;  %v2708_v9 = vsel %vm8024_vm8, %v2647_v47, 0.0  ;;  %v2710_v44 = vsel %vm8037_vm15, %v2649_v26, 0.0  ;;  %v6034_v47 = vld [vmem:[#allocation13 + $0x1f0] sm:$0xff]  }
 0x2c9   : > { %v2711_v1 = vsel %vm8037_vm15, %v2650_v49, 0.0  ;;  %v8051_v46 = vpack.c.bf16 %v2650_v49, %v2649_v26  ;;  %v2780_v39 = vrot.slane %v2778_v43, 7  ;;  %v2873_v56 = vor.u32 %v2872_v50, %v2764_v41  ;;  %5539 = vmatprep.subr.bf16.mxu1 %v6026_v53  ;;  %v6033_v41 = vld [vmem:[#allocation13 + $0x138] sm:$0xff]  }
 0x2ca   : > { %v8072_v18 = vsel %vm6923_vm6, 0, %v2776_v57  ;;  %v2785_v2 = vshrl.u32 %v8031_v19, 16  ;;  %v8085_v42 = vpack.c.bf16 %v2709_v11, %v2708_v9  ;;  %v2722_v37 = vpack.c.bf16 %v2711_v1, %v2710_v44  ;;  %5602 = vmatpush3.bf16.msra.mxu0 %v6031_v6  ;;  %v6037_v26 = vld [vmem:[#allocation13 + $0x1b8] sm:$0xff]  }
 0x2cb   : > { %4113 = vmatprep.mubr.bf16.mxu0 %v8072_v18  ;;  %v2783_v22 = vor.u32 %v2781_v14, %v2780_v39  ;;  %4017 = vmatmul.mubr.bf16.gmra.mrb[92].mxu1 %v7987_v48  ;;  %v2712_v61 = vsel %vm8060_vm14, %v2651_v45, 0.0  ;;  %v2713_v16 = vsel %vm8060_vm14, %v2652_v51, 0.0  ;;  %v8097_v28 = vsel %vm6950_vm5, %v2873_v56, 0 }
 0x2cc   : > { %5019 = vmatprep.mubr.msk.bf16.mxu1 %vm8077_vm4, %v7871_v3  ;;  %5540 = vmatpush3.bf16.msra.mxu1 %v6027_v33  ;;  %v2879_v50 = vrot.slane %v2774_v7, 1  ;;  %v2988_v55 = vshll.u32 %v2722_v37, 16  ;;  %v2787_v51 = vrot.slane %v2785_v2, 7  ;;  %v8104_v23 = vpack.c.bf16 %v2713_v16, %v2712_v61 }
 0x2cd   : > { %5541 = vmatprep.subr.bf16.mxu1 %v6032_v8  ;;  %5603 = vmatprep.subr.bf16.mxu0 %v6034_v47  ;;  %v8102_v45 = vsel %vm6923_vm6, 0, %v2783_v22  ;;  %v2985_v59 = vshrl.u32 %v2722_v37, 16  ;;  %v2788_v7 = vshll.u32 %v8031_v19, 16  ;;  %v2792_v6 = vshrl.u32 %v8085_v42, 16  ;;  %v6039_v37 = vld [vmem:[#allocation13 + $0x208] sm:$0xff]  }
 0x2ce   : > { %5604 = vmatpush3.bf16.msra.mxu0 %v6035_v21  ;;  %v3093_v31 = vrot.slane %v2988_v55, 1  ;;  %v2880_v49 = vor.u32 %v2879_v50, %v2771_v35  ;;  %v2886_v19 = vrot.slane %v2781_v14, 1  ;;  %v2795_v1 = vshll.u32 %v8085_v42, 16  ;;  %v6041_v21 = vld [vmem:[#allocation13 + $0x218] sm:$0xff]  }
 0x2cf   : > { %4114 = vmatmul.mubr.bf16.gmra.mrb[112].mxu0 %v8097_v28  ;;  %5605 = vmatprep.subr.bf16.mxu0 %v6036_v20  ;;  %v2790_v57 = vor.u32 %v2788_v7, %v2787_v51  ;;  %v2794_v35 = vrot.slane %v2792_v6, 7  ;;  %v2893_v24 = vrot.slane %v2788_v7, 1  ;;  %v2987_v36 = vrot.slane %v2985_v59, 7 }
 0x2d0   : > { %4121 = vmatprep.mubr.bf16.mxu0 %v8102_v45  ;;  %5542 = vmatpush3.bf16.msra.mxu1 %v6033_v41  ;;  %v8117_v11 = vor.u32 %v3093_v31, %v2985_v59  ;;  %v8126_v54 = vsel %vm6950_vm5, %v2880_v49, 0  ;;  %v2887_v14 = vor.u32 %v2886_v19, %v2778_v43  ;;  %v2900_v22 = vrot.slane %v2795_v1, 1 }
 0x2d1   : > { %5707 = vmatprep.subr.bf16.mxu1 %v6038_v27  ;;  %v8131_v4 = vsel %vm6923_vm6, 0, %v2790_v57  ;;  %v2797_v33 = vor.u32 %v2795_v1, %v2794_v35  ;;  %v2894_v56 = vor.u32 %v2893_v24, %v2785_v2  ;;  %v2990_v8 = vor.u32 %v2988_v55, %v2987_v36 }
 0x2d2   : > { %5606 = vmatpush3.bf16.msra.mxu0 %v6037_v26  ;;  %v8150_v9 = vsel %vm6950_vm5, %v2887_v14, 0  ;;  %v2901_v42 = vor.u32 %v2900_v22, %v2792_v6 }
 0x2d3   : > { %4025 = vmatmul.mubr.bf16.gmra.mrb[96].mxu1 %v8072_v18  ;;  %v8155_v44 = vsel %vm6923_vm6, 0, %v2797_v33  ;;  %v8171_v47 = vsel %vm6950_vm5, %v2894_v56, 0  ;;  %v3006_v12 = vsel %vm6923_vm6, 0, %v2990_v8 }
 0x2d4   : > { %5022 = vmatprep.mubr.msk.bf16.mxu1 %vm8111_vm9, %v7855_v30  ;;  %v8180_v2 = vsel %vm6950_vm5, %v2901_v42, 0 }
 0x2d7   : > { %4122 = vmatmul.mubr.bf16.gmra.mrb[116].mxu0 %v8126_v54 }
 0x2d8   : > { %4129 = vmatprep.mubr.bf16.mxu0 %v8131_v4 }
 0x2db   : > { %4033 = vmatmul.mubr.bf16.gmra.mrb[100].mxu1 %v8102_v45 }
 0x2dc   : > { %5025 = vmatprep.mubr.msk.bf16.mxu1 %vm8138_vm1, %v7962_v17 }
 0x2df   : > { %4130 = vmatmul.mubr.bf16.gmra.mrb[120].mxu0 %v8150_v9 }
 0x2e0   : > { %4137 = vmatprep.mubr.bf16.mxu0 %v8155_v44 }
 0x2e3   : > { %4041 = vmatmul.mubr.bf16.gmra.mrb[104].mxu1 %v8131_v4 }
 0x2e4   : > { %5028 = vmatprep.mubr.msk.bf16.mxu1 %vm8161_vm2, %v7953_v63 }
 0x2e7   : > { %4138 = vmatmul.mubr.bf16.gmra.mrb[124].mxu0 %v8171_v47 }
 0x2e8   : > { %4145 = vmatprep.mubr.bf16.mxu0 %v3006_v12 }
 0x2eb   : > { %4049 = vmatmul.mubr.bf16.gmra.mrb[108].mxu1 %v8155_v44 }
 0x2ec   : > { %4186 = vmatprep.mubr.bf16.mxu1 %v7938_v40  ;;  %v6040_v40 = vld [vmem:[#allocation13 + $0x210] sm:$0xff]  }
 0x2ef   : > { %4146 = vmatmul.mubr.bf16.gmra.mrb[128].mxu0 %v8180_v2 }
 0x2f0   : > { %5055 = vmatprep.mubr.msk.bf16.mxu0 %vm7891_vm0, %v7784_v32 }
 0x2f3   : > { %5031 = vmatmul.mubr.msk.bf16.vlgmr.msra.gmra.mrb[112].mxu1 %vm8707_vm10, %v7732_v52  ;;  %v6043_v52 = vld [vmem:[#allocation13 + $0x228] sm:$0xff]  }
 0x2f4   : > { %4194 = vmatprep.mubr.bf16.mxu1 %v8009_v62  ;;  %5708 = vmatpush3.bf16.msra.mxu1 %v6038_v27 }
 0x2f5   : > { %5709 = vmatprep.subr.bf16.mxu1 %v6039_v37 }
 0x2f7   : > { %4284 = vmatmul.mubr.bf16.vlgmr.msra.gmra.mrb[132].mxu0 %v7929_v10  ;;  %v3181_v10 = vshll.u32 %v8104_v23, 16 }
 0x2f8   : > { %5058 = vmatprep.mubr.msk.bf16.mxu0 %vm7992_vm13, %v7778_v34  ;;  %5710 = vmatpush3.bf16.msra.mxu1 %v6039_v37 }
 0x2f9   : > { %5711 = vmatprep.subr.bf16.mxu1 %v6040_v40 }
 0x2fb   : > { %5034 = vmatmul.mubr.msk.bf16.gmra.mrb[116].mxu1 %vm7891_vm0, %v7784_v32  ;;  %v6044_v32 = vld [vmem:[#allocation13 + $0x230] sm:$0xff]   ;;  %vm5074_vm0 = vmpackc.low %vm8060_vm14, %vm8060_vm14 }
 0x2fc   : > { %4202 = vmatprep.mubr.bf16.mxu1 %v8097_v28  ;;  %5712 = vmatpush3.bf16.msra.mxu1 %v6040_v40 }
 0x2fd   : > { %5713 = vmatprep.subr.bf16.mxu1 %v6041_v21 }
 0x2ff   : > { %4292 = vmatmul.mubr.bf16.gmra.mrb[136].mxu0 %v7987_v48  ;;  %v3286_v48 = vrot.slane %v3181_v10, 1 }
 0x300   : > { %5061 = vmatprep.mubr.msk.bf16.mxu0 %vm8077_vm4, %v7871_v3  ;;  %5714 = vmatpush3.bf16.msra.mxu1 %v6041_v21 }
 0x301   : > { %5715 = vmatprep.subr.bf16.mxu1 %v6042_v5 }
 0x303   : > { %5037 = vmatmul.mubr.msk.bf16.gmra.mrb[120].mxu1 %vm7992_vm13, %v7778_v34  ;;  %v3178_v34 = vshrl.u32 %v8104_v23, 16 }
 0x304   : > { %4210 = vmatprep.mubr.bf16.mxu1 %v8126_v54  ;;  %5716 = vmatpush3.bf16.msra.mxu1 %v6042_v5 }
 0x305   : > { %5717 = vmatprep.subr.bf16.mxu1 %v6043_v52  ;;  %v3287_v15 = vor.u32 %v3286_v48, %v3178_v34 }
 0x307   : > { %4300 = vmatmul.mubr.bf16.gmra.mrb[140].mxu0 %v8072_v18 }
 0x308   : > { %5064 = vmatprep.mubr.msk.bf16.mxu0 %vm8111_vm9, %v7855_v30  ;;  %5718 = vmatpush3.bf16.msra.mxu1 %v6043_v52 }
 0x309   : > { %5719 = vmatprep.subr.bf16.mxu1 %v6044_v32 }
 0x30b   : > { %5040 = vmatmul.mubr.msk.bf16.gmra.mrb[124].mxu1 %vm8077_vm4, %v7871_v3  ;;  %v3180_v3 = vrot.slane %v3178_v34, 7 }
 0x30c   : > { %4218 = vmatprep.mubr.bf16.mxu1 %v8150_v9  ;;  %5720 = vmatpush3.bf16.msra.mxu1 %v6044_v32 }
 0x30d   : > { %5721 = vmatprep.subr.bf16.mxu1 %v6045_v29 }
 0x30f   : > { %4308 = vmatmul.mubr.bf16.gmra.mrb[144].mxu0 %v8102_v45 }
 0x310   : > { %5067 = vmatprep.mubr.msk.bf16.mxu0 %vm8138_vm1, %v7962_v17  ;;  %5722 = vmatpush3.bf16.msra.mxu1 %v6045_v29 }
 0x313   : > { %5043 = vmatmul.mubr.msk.bf16.gmra.mrb[128].mxu1 %vm8111_vm9, %v7855_v30  ;;  %v3110_v30 = vsel %vm6950_vm5, %v8117_v11, 0 }
 0x314   : > { %4226 = vmatprep.mubr.bf16.mxu1 %v8171_v47 }
 0x317   : > { %4316 = vmatmul.mubr.bf16.gmra.mrb[148].mxu0 %v8131_v4 }
 0x318   : > { %5070 = vmatprep.mubr.msk.bf16.mxu0 %vm8161_vm2, %v7953_v63 }
 0x31b   : > { %5046 = vmatmul.mubr.msk.bf16.gmra.mrb[132].mxu1 %vm8138_vm1, %v7962_v17  ;;  %v3183_v17 = vor.u32 %v3181_v10, %v3180_v3 }
 0x31c   : > { %4234 = vmatprep.mubr.bf16.mxu1 %v8180_v2 }
 0x31f   : > { %4324 = vmatmul.mubr.bf16.gmra.mrb[152].mxu0 %v8155_v44 }
 0x320   : > { %5073 = vmatprep.mubr.msk.bf16.mxu0 %vm5050_vm12, %v8051_v46 }
 0x323   : > { %5049 = vmatmul.mubr.msk.bf16.gmra.mrb[136].mxu1 %vm8161_vm2, %v7953_v63  ;;  %v3199_v63 = vsel %vm6923_vm6, 0, %v3183_v17 }
 0x324   : > { %4242 = vmatprep.mubr.bf16.mxu1 %v3110_v30 }
 0x327   : > { %4332 = vmatmul.mubr.bf16.gmra.mrb[156].mxu0 %v3006_v12 }
 0x328   : > { %5076 = vmatprep.mubr.msk.bf16.mxu0 %vm5074_vm0, %v8041_v38 }
 0x32b   : > { %5052 = vmatmul.mubr.msk.bf16.gmra.mrb[140].mxu1 %vm5050_vm12, %v8051_v46 }
 0x32c   : > { %5723 = vmatprep.mubr.bf16.mxu1 %v8009_v62  ;;  %v3303_v62 = vsel %vm6950_vm5, %v3287_v15, 0 }
 0x32f   : > { %4340 = vmatmul.mubr.bf16.gmra.mrb[160].mxu0 %v3199_v63 }
 0x333   : > { %5724 = vmatmul.mubr.bf16.vlgmr.msra.gmra.mrb[144].mxu1 %v8097_v28 }
 0x334   : > { %5727 = vmatprep.mubr.bf16.mxu1 %v8126_v54 }
 0x33b   : > { %5728 = vmatmul.mubr.bf16.gmra.mrb[148].mxu1 %v8150_v9 }
 0x33c   : > { %5731 = vmatprep.mubr.bf16.mxu1 %v8171_v47 }
 0x343   : > { %5732 = vmatmul.mubr.bf16.gmra.mrb[152].mxu1 %v8180_v2 }
 0x344   : > { %5735 = vmatprep.mubr.bf16.mxu1 %v3110_v30 }
 0x34b   : > { %5736 = vmatmul.mubr.bf16.gmra.mrb[156].mxu1 %v3303_v62 }
 0x386   : > { %v5415_v13 = vpop.f32.mrb[80].mxu1 }
 0x387   : > { %v5416_v58 = vpop.f32.mrb[81].mxu1 }
 0x388   : > { %v5417_v38 = vadd.f32 %v5416_v58, %v5415_v13  ;;  %v5418_v46 = vpop.f32.mrb[82].mxu1  ;;  %v5479_v0 = vpop.f32.mrb[100].mxu0 }
 0x389   : > { %v5419_v18 = vpop.f32.mrb[83].mxu1  ;;  %v5480_v60 = vpop.f32.mrb[101].mxu0 }
 0x38a   : > { %v5420_v61 = vadd.f32 %v5419_v18, %v5418_v46  ;;  %v5481_v16 = vadd.f32 %v5480_v60, %v5479_v0  ;;  %v5482_v41 = vpop.f32.mrb[102].mxu0 }
 0x38b   : > { %v5483_v20 = vpop.f32.mrb[103].mxu0 }
 0x38c   : > { %v8261_v28 = vadd.f32 %v5481_v16, %v5417_v38  ;;  %v5484_v50 = vadd.f32 %v5483_v20, %v5482_v41 }
 0x38e   : > { %v5421_v55 = vpop.f32.mrb[84].mxu1  ;;  %v8263_v27 = vadd.f32 %v5484_v50, %v5420_v61 }
 0x38f   : > { %v5422_v25 = vpop.f32.mrb[85].mxu1 }
 0x390   : > { %v5423_v45 = vadd.f32 %v5422_v25, %v5421_v55  ;;  %v5424_v51 = vpop.f32.mrb[86].mxu1 }
 0x391   : > { %v5425_v59 = vpop.f32.mrb[87].mxu1 }
 0x392   : > { %v5485_v23 = vpop.f32.mrb[104].mxu0  ;;  %v5426_v31 = vadd.f32 %v5425_v59, %v5424_v51 }
 0x393   : > { %v5486_v26 = vpop.f32.mrb[105].mxu0 }
 0x394   : > { %v5487_v7 = vadd.f32 %v5486_v26, %v5485_v23  ;;  %v5488_v53 = vpop.f32.mrb[106].mxu0 }
 0x395   : > { %v5489_v49 = vpop.f32.mrb[107].mxu0 }
 0x396   : > { %v8265_v11 = vadd.f32 %v5487_v7, %v5423_v45  ;;  %v5490_v57 = vadd.f32 %v5489_v49, %v5488_v53  ;;  %v5427_v6 = vpop.f32.mrb[88].mxu1 }
 0x397   : > { %v5428_v19 = vpop.f32.mrb[89].mxu1 }
 0x398   : > { %v8267_v54 = vadd.f32 %v5490_v57, %v5426_v31  ;;  %v5429_v4 = vadd.f32 %v5428_v19, %v5427_v6  ;;  %v5430_v35 = vpop.f32.mrb[90].mxu1 }
 0x399   : > { %v5431_v39 = vpop.f32.mrb[91].mxu1 }
 0x39a   : > { %v5491_v1 = vpop.f32.mrb[108].mxu0  ;;  %v5432_v33 = vadd.f32 %v5431_v39, %v5430_v35 }
 0x39b   : > { %v5492_v14 = vpop.f32.mrb[109].mxu0 }
 0x39c   : > { %v5493_v9 = vadd.f32 %v5492_v14, %v5491_v1  ;;  %v5494_v24 = vpop.f32.mrb[110].mxu0 }
 0x39d   : > { %v5495_v44 = vpop.f32.mrb[111].mxu0 }
 0x39e   : > { %v8269_v36 = vadd.f32 %v5493_v9, %v5429_v4  ;;  %v5496_v43 = vadd.f32 %v5495_v44, %v5494_v24  ;;  %v5433_v56 = vpop.f32.mrb[92].mxu1 }
 0x39f   : > { %v5434_v47 = vpop.f32.mrb[93].mxu1 }
 0x3a0   : > { %v8271_v8 = vadd.f32 %v5496_v43, %v5432_v33  ;;  %v5435_v22 = vadd.f32 %v5434_v47, %v5433_v56  ;;  %v5436_v12 = vpop.f32.mrb[94].mxu1 }
 0x3a1   : > { %v5437_v2 = vpop.f32.mrb[95].mxu1 }
 0x3a2   : > { %v5497_v42 = vpop.f32.mrb[112].mxu0  ;;  %v5438_v40 = vadd.f32 %v5437_v2, %v5436_v12 }
 0x3a3   : > { %v5498_v37 = vpop.f32.mrb[113].mxu0 }
 0x3a4   : > { %v5499_v21 = vadd.f32 %v5498_v37, %v5497_v42  ;;  %v5500_v5 = vpop.f32.mrb[114].mxu0 }
 0x3a5   : > { %v5501_v52 = vpop.f32.mrb[115].mxu0 }
 0x3a6   : > { %v8273_v32 = vadd.f32 %v5499_v21, %v5435_v22  ;;  %v5502_v29 = vadd.f32 %v5501_v52, %v5500_v5  ;;  %v5439_v34 = vpop.f32.mrb[96].mxu1 }
 0x3a7   : > { %v5440_v3 = vpop.f32.mrb[97].mxu1 }
 0x3a8   : > { %v8275_v30 = vadd.f32 %v5502_v29, %v5438_v40  ;;  %v5441_v10 = vadd.f32 %v5440_v3, %v5439_v34  ;;  %v5442_v17 = vpop.f32.mrb[98].mxu1 }
 0x3a9   : > { %v5443_v48 = vpop.f32.mrb[99].mxu1 }
 0x3aa   : > { %v5503_v63 = vpop.f32.mrb[116].mxu0  ;;  %v5444_v62 = vadd.f32 %v5443_v48, %v5442_v17 }
 0x3ab   : > { %v5504_v15 = vpop.f32.mrb[117].mxu0 }
 0x3ac   : > { %v5505_v13 = vadd.f32 %v5504_v15, %v5503_v63  ;;  %v5506_v58 = vpop.f32.mrb[118].mxu0 }
 0x3ad   : > { %v5507_v38 = vpop.f32.mrb[119].mxu0 }
 0x3ae   : > { %v8277_v46 = vadd.f32 %v5505_v13, %v5441_v10  ;;  %v5508_v0 = vadd.f32 %v5507_v38, %v5506_v58  ;;  %v5445_v18 = vpop.f32.mrb[100].mxu1 }
 0x3af   : > { %v5446_v61 = vpop.f32.mrb[101].mxu1 }
 0x3b0   : > { %v8279_v60 = vadd.f32 %v5508_v0, %v5444_v62  ;;  %v5447_v16 = vadd.f32 %v5446_v61, %v5445_v18  ;;  %v5448_v41 = vpop.f32.mrb[102].mxu1 }
 0x3b1   : > { %v5449_v50 = vpop.f32.mrb[103].mxu1 }
 0x3b2   : > { %v5509_v20 = vpop.f32.mrb[120].mxu0  ;;  %v5450_v25 = vadd.f32 %v5449_v50, %v5448_v41 }
 0x3b3   : > { %v5510_v55 = vpop.f32.mrb[121].mxu0 }
 0x3b4   : > { %v5511_v45 = vadd.f32 %v5510_v55, %v5509_v20  ;;  %v5512_v51 = vpop.f32.mrb[122].mxu0 }
 0x3b5   : > { %v5513_v23 = vpop.f32.mrb[123].mxu0 }
 0x3b6   : > { %v8281_v59 = vadd.f32 %v5511_v45, %v5447_v16  ;;  %v5514_v26 = vadd.f32 %v5513_v23, %v5512_v51  ;;  %v5451_v31 = vpop.f32.mrb[104].mxu1 }
 0x3b7   : > { %v5452_v53 = vpop.f32.mrb[105].mxu1 }
 0x3b8   : > { %v8283_v7 = vadd.f32 %v5514_v26, %v5450_v25  ;;  %v5453_v49 = vadd.f32 %v5452_v53, %v5451_v31  ;;  %v5454_v57 = vpop.f32.mrb[106].mxu1 }
 0x3b9   : > { %v5455_v19 = vpop.f32.mrb[107].mxu1 }
 0x3ba   : > { %v5515_v6 = vpop.f32.mrb[124].mxu0  ;;  %v5456_v35 = vadd.f32 %v5455_v19, %v5454_v57 }
 0x3bb   : > { %v5516_v4 = vpop.f32.mrb[125].mxu0 }
 0x3bc   : > { %v5517_v1 = vadd.f32 %v5516_v4, %v5515_v6  ;;  %v5518_v39 = vpop.f32.mrb[126].mxu0 }
 0x3bd   : > { %v5519_v14 = vpop.f32.mrb[127].mxu0 }
 0x3be   : > { %v8285_v33 = vadd.f32 %v5517_v1, %v5453_v49  ;;  %v5520_v9 = vadd.f32 %v5519_v14, %v5518_v39  ;;  %v5457_v24 = vpop.f32.mrb[108].mxu1 }
 0x3bf   : > { %v5458_v43 = vpop.f32.mrb[109].mxu1 }
 0x3c0   : > { %v8287_v44 = vadd.f32 %v5520_v9, %v5456_v35  ;;  %v5459_v56 = vadd.f32 %v5458_v43, %v5457_v24  ;;  %v5460_v47 = vpop.f32.mrb[110].mxu1 }
 0x3c1   : > { %v5461_v12 = vpop.f32.mrb[111].mxu1 }
 0x3c2   : > { %v5521_v22 = vpop.f32.mrb[128].mxu0  ;;  %v5462_v2 = vadd.f32 %v5461_v12, %v5460_v47 }
 0x3c3   : > { %v5522_v42 = vpop.f32.mrb[129].mxu0 }
 0x3c4   : > { %v5523_v37 = vadd.f32 %v5522_v42, %v5521_v22  ;;  %v5524_v40 = vpop.f32.mrb[130].mxu0 }
 0x3c5   : > { %v5525_v21 = vpop.f32.mrb[131].mxu0 }
 0x3c6   : > { %v8289_v5 = vadd.f32 %v5523_v37, %v5459_v56  ;;  %v5526_v52 = vadd.f32 %v5525_v21, %v5524_v40  ;;  %v5543_v29 = vpop.f32.mrb[112].mxu1 }
 0x3c7   : > { %v5544_v3 = vpop.f32.mrb[113].mxu1 }
 0x3c8   : > { %v8291_v34 = vadd.f32 %v5526_v52, %v5462_v2  ;;  %v5545_v10 = vadd.f32 %v5544_v3, %v5543_v29  ;;  %v5546_v17 = vpop.f32.mrb[114].mxu1 }
 0x3c9   : > { %v5547_v48 = vpop.f32.mrb[115].mxu1 }
 0x3ca   : > { %v5607_v63 = vpop.f32.mrb[132].mxu0  ;;  %v4189_v15 = vadd.f32 %v5545_v10, %v8261_v28  ;;  %v5548_v13 = vadd.f32 %v5547_v48, %v5546_v17 }
 0x3cb   : > { %v5608_v62 = vpop.f32.mrb[133].mxu0 }
 0x3cc   : > { %v5609_v58 = vadd.f32 %v5608_v62, %v5607_v63  ;;  %v5610_v38 = vpop.f32.mrb[134].mxu0  ;;  %v4192_v0 = vadd.f32 %v5548_v13, %v8263_v27 }
 0x3cd   : > { %v5611_v18 = vpop.f32.mrb[135].mxu0 }
 0x3ce   : > { %v5612_v61 = vadd.f32 %v5611_v18, %v5610_v38  ;;  %v8295_v16 = vadd.f32 %v5609_v58, %v4189_v15  ;;  %v5549_v41 = vpop.f32.mrb[116].mxu1 }
 0x3cf   : > { %v5550_v20 = vpop.f32.mrb[117].mxu1 }
 0x3d0   : > { %v8297_v50 = vadd.f32 %v5612_v61, %v4192_v0  ;;  %v5551_v55 = vadd.f32 %v5550_v20, %v5549_v41  ;;  %v5552_v25 = vpop.f32.mrb[118].mxu1 }
 0x3d1   : > { %v5553_v51 = vpop.f32.mrb[119].mxu1 }
 0x3d2   : > { %v5613_v45 = vpop.f32.mrb[136].mxu0  ;;  %v4197_v28 = vadd.f32 %v5551_v55, %v8265_v11  ;;  %v5554_v26 = vadd.f32 %v5553_v51, %v5552_v25 }
 0x3d3   : > { %v5614_v23 = vpop.f32.mrb[137].mxu0 }
 0x3d4   : > { %v5615_v31 = vadd.f32 %v5614_v23, %v5613_v45  ;;  %v5616_v53 = vpop.f32.mrb[138].mxu0  ;;  %v4200_v27 = vadd.f32 %v5554_v26, %v8267_v54 }
 0x3d5   : > { %v5617_v49 = vpop.f32.mrb[139].mxu0 }
 0x3d6   : > { %v5618_v57 = vadd.f32 %v5617_v49, %v5616_v53  ;;  %v8301_v6 = vadd.f32 %v5615_v31, %v4197_v28  ;;  %v5555_v19 = vpop.f32.mrb[120].mxu1 }
 0x3d7   : > { %v5556_v4 = vpop.f32.mrb[121].mxu1 }
 0x3d8   : > { %v8303_v35 = vadd.f32 %v5618_v57, %v4200_v27  ;;  %v5557_v1 = vadd.f32 %v5556_v4, %v5555_v19  ;;  %v5558_v39 = vpop.f32.mrb[122].mxu1 }
 0x3d9   : > { %v5559_v9 = vpop.f32.mrb[123].mxu1 }
 0x3da   : > { %v5619_v14 = vpop.f32.mrb[140].mxu0  ;;  %v4205_v11 = vadd.f32 %v5557_v1, %v8269_v36  ;;  %v5560_v43 = vadd.f32 %v5559_v9, %v5558_v39 }
 0x3db   : > { %v5620_v24 = vpop.f32.mrb[141].mxu0 }
 0x3dc   : > { %v5621_v56 = vadd.f32 %v5620_v24, %v5619_v14  ;;  %v5622_v47 = vpop.f32.mrb[142].mxu0  ;;  %v4208_v54 = vadd.f32 %v5560_v43, %v8271_v8 }
 0x3dd   : > { %v5623_v22 = vpop.f32.mrb[143].mxu0 }
 0x3de   : > { %v5624_v12 = vadd.f32 %v5623_v22, %v5622_v47  ;;  %v8307_v42 = vadd.f32 %v5621_v56, %v4205_v11  ;;  %v5561_v2 = vpop.f32.mrb[124].mxu1 }
 0x3df   : > { %v5562_v37 = vpop.f32.mrb[125].mxu1 }
 0x3e0   : > { %v8309_v40 = vadd.f32 %v5624_v12, %v4208_v54  ;;  %v5563_v21 = vadd.f32 %v5562_v37, %v5561_v2  ;;  %v5564_v52 = vpop.f32.mrb[126].mxu1 }
 0x3e1   : > { %v5565_v3 = vpop.f32.mrb[127].mxu1 }
 0x3e2   : > { %v5625_v29 = vpop.f32.mrb[144].mxu0  ;;  %v4213_v36 = vadd.f32 %v5563_v21, %v8273_v32  ;;  %v5566_v17 = vadd.f32 %v5565_v3, %v5564_v52 }
 0x3e3   : > { %v5626_v10 = vpop.f32.mrb[145].mxu0 }
 0x3e4   : > { %v5627_v63 = vadd.f32 %v5626_v10, %v5625_v29  ;;  %v5628_v48 = vpop.f32.mrb[146].mxu0  ;;  %v4216_v8 = vadd.f32 %v5566_v17, %v8275_v30 }
 0x3e5   : > { %v5629_v15 = vpop.f32.mrb[147].mxu0 }
 0x3e6   : > { %v5630_v62 = vadd.f32 %v5629_v15, %v5628_v48  ;;  %v8313_v13 = vadd.f32 %v5627_v63, %v4213_v36  ;;  %v5567_v58 = vpop.f32.mrb[128].mxu1 }
 0x3e7   : > { %v5568_v38 = vpop.f32.mrb[129].mxu1 }
 0x3e8   : > { %v8315_v0 = vadd.f32 %v5630_v62, %v4216_v8  ;;  %v5569_v18 = vadd.f32 %v5568_v38, %v5567_v58  ;;  %v5570_v61 = vpop.f32.mrb[130].mxu1 }
 0x3e9   : > { %v5571_v20 = vpop.f32.mrb[131].mxu1 }
 0x3ea   : > { %v5631_v41 = vpop.f32.mrb[148].mxu0  ;;  %v4221_v32 = vadd.f32 %v5569_v18, %v8277_v46  ;;  %v5572_v25 = vadd.f32 %v5571_v20, %v5570_v61 }
 0x3eb   : > { %v5632_v55 = vpop.f32.mrb[149].mxu0 }
 0x3ec   : > { %v5633_v45 = vadd.f32 %v5632_v55, %v5631_v41  ;;  %v5634_v51 = vpop.f32.mrb[150].mxu0  ;;  %v4224_v30 = vadd.f32 %v5572_v25, %v8279_v60 }
 0x3ed   : > { %v5635_v28 = vpop.f32.mrb[151].mxu0 }
 0x3ee   : > { %v5636_v23 = vadd.f32 %v5635_v28, %v5634_v51  ;;  %v8319_v26 = vadd.f32 %v5633_v45, %v4221_v32  ;;  %v5573_v31 = vpop.f32.mrb[132].mxu1  ;;  %v8342_v45 = vld [vmem:[%s8632_s16 + $0x4] ss:$0 sm:$0xff] }
 0x3ef   : > { %v5574_v53 = vpop.f32.mrb[133].mxu1 }
 0x3f0   : > { %v8321_v27 = vadd.f32 %v5636_v23, %v4224_v30  ;;  %v5575_v49 = vadd.f32 %v5574_v53, %v5573_v31  ;;  %v5576_v57 = vpop.f32.mrb[134].mxu1 }
 0x3f1   : > { %v5577_v4 = vpop.f32.mrb[135].mxu1 }
 0x3f2   : > { %v5637_v19 = vpop.f32.mrb[152].mxu0  ;;  %v4229_v46 = vadd.f32 %v5575_v49, %v8281_v59  ;;  %v5578_v39 = vadd.f32 %v5577_v4, %v5576_v57 }
 0x3f3   : > { %v5638_v1 = vpop.f32.mrb[153].mxu0 }
 0x3f4   : > { %v5639_v14 = vadd.f32 %v5638_v1, %v5637_v19  ;;  %v5640_v9 = vpop.f32.mrb[154].mxu0  ;;  %v4232_v60 = vadd.f32 %v5578_v39, %v8283_v7  ;;  %v4485_v1 = vld [vmem:[%s6807_s3] sm:$0xff] }
 0x3f5   : > { %v5641_v11 = vpop.f32.mrb[155].mxu0 }
 0x3f6   : > { %v5642_v24 = vadd.f32 %v5641_v11, %v5640_v9  ;;  %v8325_v43 = vadd.f32 %v5639_v14, %v4229_v46  ;;  %v5579_v56 = vpop.f32.mrb[136].mxu1  ;;  %v4488_v14 = vld [vmem:[%s6807_s3 + $0x18] sm:$0xff]  ;;  %v4486_v11 = vld [vmem:[%s6807_s3 + $0x8] sm:$0xff] }
 0x3f7   : > { %v5580_v47 = vpop.f32.mrb[137].mxu1 }
 0x3f8   : > { %v8327_v54 = vadd.f32 %v5642_v24, %v4232_v60  ;;  %v5581_v22 = vadd.f32 %v5580_v47, %v5579_v56  ;;  %v5582_v12 = vpop.f32.mrb[138].mxu1 }
 0x3f9   : > { %v5583_v37 = vpop.f32.mrb[139].mxu1 }
 0x3fa   : > { %v5643_v2 = vpop.f32.mrb[156].mxu0  ;;  %v4237_v59 = vadd.f32 %v5581_v22, %v8285_v33  ;;  %v5584_v52 = vadd.f32 %v5583_v37, %v5582_v12 }
 0x3fb   : > { %v5644_v21 = vpop.f32.mrb[157].mxu0 }
 0x3fc   : > { %v5645_v29 = vadd.f32 %v5644_v21, %v5643_v2  ;;  %v5646_v3 = vpop.f32.mrb[158].mxu0  ;;  %v4240_v7 = vadd.f32 %v5584_v52, %v8287_v44 }
 0x3fd   : > { %v5647_v36 = vpop.f32.mrb[159].mxu0 }
 0x3fe   : > { %v5648_v10 = vadd.f32 %v5647_v36, %v5646_v3  ;;  %v8331_v17 = vadd.f32 %v5645_v29, %v4237_v59  ;;  %v5585_v63 = vpop.f32.mrb[140].mxu1  ;;  %v4491_v3 = vld [vmem:[%s6807_s3 + $0x30] sm:$0xff] }
 0x3ff   : > { %v5586_v48 = vpop.f32.mrb[141].mxu1 }
 0x400   : > { %v8333_v8 = vadd.f32 %v5648_v10, %v4240_v7  ;;  %v5587_v15 = vadd.f32 %v5586_v48, %v5585_v63  ;;  %v5588_v62 = vpop.f32.mrb[142].mxu1  ;;  %v4489_v10 = vld [vmem:[%s6807_s3 + $0x20] sm:$0xff]  ;;  %v4492_v48 = vld [vmem:[%s6807_s3 + $0x38] sm:$0xff] }
 0x401   : > { %v5589_v38 = vpop.f32.mrb[143].mxu1 }
 0x402   : > { %v5649_v58 = vpop.f32.mrb[160].mxu0  ;;  %v4245_v33 = vadd.f32 %v5587_v15, %v8289_v5  ;;  %v5590_v61 = vadd.f32 %v5589_v38, %v5588_v62 }
 0x403   : > { %v5650_v18 = vpop.f32.mrb[161].mxu0 }
 0x404   : > { %v5651_v41 = vadd.f32 %v5650_v18, %v5649_v58  ;;  %v5652_v20 = vpop.f32.mrb[162].mxu0  ;;  %v4248_v44 = vadd.f32 %v5590_v61, %v8291_v34  ;;  %v8350_v34 = vld [vmem:[%s8632_s16 + $0x5] ss:$0 sm:$0xff]  ;;  %v4490_v58 = vld [vmem:[%s6807_s3 + $0x28] sm:$0xff] }
 0x405   : > { %v5653_v32 = vpop.f32.mrb[163].mxu0 }
 0x406   : > { %v5654_v55 = vadd.f32 %v5653_v32, %v5652_v20  ;;  %v8337_v25 = vadd.f32 %v5651_v41, %v4245_v33  ;;  %v5725_v51 = vpop.f32.mrb[144].mxu1 }
 0x407   : > { %v4391_v5 = vadd.f32 %v5725_v51, %v8301_v6  ;;  %v4382_v30 = vpop.f32.mrb[145].mxu1  ;;  %v4487_v6 = vld [vmem:[%s6807_s3 + $0x10] sm:$0xff] }
 0x408   : > { %v8345_v28 = vadd.f32 %v5654_v55, %v4248_v44  ;;  %v4383_v23 = vadd.f32 %v4382_v30, %v8295_v16  ;;  %v5726_v31 = vpop.f32.mrb[146].mxu1  ;;  %v4495_v30 = vld [vmem:[%s6807_s3 + $0x50] sm:$0xff] }
 0x409   : > { %v4451_v53 = vmul.f32 %v8342_v45, %v4391_v5  ;;  %v4394_v49 = vadd.f32 %v5726_v31, %v8303_v35  ;;  %v4385_v57 = vpop.f32.mrb[147].mxu1 }
 0x40a   : > { %v4449_v19 = vmul.f32 %v8342_v45, %v4383_v23  ;;  %v4386_v4 = vadd.f32 %v4385_v57, %v8297_v50  ;;  %v4496_v57 = vld [vmem:[%s6807_s3 + $0x58] sm:$0xff] }
 0x40b   : > { %v4471_v46 = vadd.f32 %v8350_v34, %v4451_v53  ;;  %v4452_v39 = vmul.f32 %v8342_v45, %v4394_v49  ;;  %v4493_v53 = vld [vmem:[%s6807_s3 + $0x40] sm:$0xff] }
 0x40c   : > { %v4469_v16 = vadd.f32 %v8350_v34, %v4449_v19  ;;  %v4450_v9 = vmul.f32 %v8342_v45, %v4386_v4  ;;  %v4494_v4 = vld [vmem:[%s6807_s3 + $0x48] sm:$0xff] }
 0x40d   : > { %v4503_v60 = vadd.f32 %v4487_v6, %v4471_v46  ;;  %v4472_v35 = vadd.f32 %v8350_v34, %v4452_v39 }
 0x40e   : > { %v4501_v24 = vadd.f32 %v4485_v1, %v4469_v16  ;;  %v4470_v56 = vadd.f32 %v8350_v34, %v4450_v9  ;;  %v5729_v47 = vpop.f32.mrb[148].mxu1 }
 0x40f   : > { %4519 = vst [vmem:[%s8369_s11 + $0x10] sm:$0xff] %v4503_v60  ;;  %v4504_v50 = vadd.f32 %v4488_v14, %v4472_v35  ;;  %v4407_v22 = vadd.f32 %v5729_v47, %v8313_v13  ;;  %v4398_v12 = vpop.f32.mrb[149].mxu1 }
 0x410   : > { %4517 = vst [vmem:[%s8369_s11] sm:$0xff] %v4501_v24  ;;  %v4502_v2 = vadd.f32 %v4486_v11, %v4470_v56  ;;  %v4399_v37 = vadd.f32 %v4398_v12, %v8307_v42  ;;  %v5730_v59 = vpop.f32.mrb[150].mxu1 }
 0x411   : > { %4520 = vst [vmem:[%s8369_s11 + $0x18] sm:$0xff] %v4504_v50  ;;  %v4455_v21 = vmul.f32 %v8342_v45, %v4407_v22  ;;  %v4410_v52 = vadd.f32 %v5730_v59, %v8315_v0  ;;  %v4401_v29 = vpop.f32.mrb[151].mxu1 }
 0x412   : > { %4518 = vst [vmem:[%s8369_s11 + $0x8] sm:$0xff] %v4502_v2  ;;  %v4453_v7 = vmul.f32 %v8342_v45, %v4399_v37  ;;  %v4402_v13 = vadd.f32 %v4401_v29, %v8309_v40 }
 0x413   : > { %v4475_v36 = vadd.f32 %v8350_v34, %v4455_v21  ;;  %v4456_v42 = vmul.f32 %v8342_v45, %v4410_v52 }
 0x414   : > { %v4473_v63 = vadd.f32 %v8350_v34, %v4453_v7  ;;  %v4454_v0 = vmul.f32 %v8342_v45, %v4402_v13 }
 0x415   : > { %v4507_v15 = vadd.f32 %v4491_v3, %v4475_v36  ;;  %v4476_v62 = vadd.f32 %v8350_v34, %v4456_v42 }
 0x416   : > { %v4505_v38 = vadd.f32 %v4489_v10, %v4473_v63  ;;  %v4474_v40 = vadd.f32 %v8350_v34, %v4454_v0  ;;  %v5733_v33 = vpop.f32.mrb[152].mxu1 }
 0x417   : > { %4523 = vst [vmem:[%s8369_s11 + $0x30] sm:$0xff] %v4507_v15  ;;  %v4508_v18 = vadd.f32 %v4492_v48, %v4476_v62  ;;  %v4423_v61 = vadd.f32 %v5733_v33, %v8325_v43  ;;  %v4414_v41 = vpop.f32.mrb[153].mxu1 }
 0x418   : > { %4521 = vst [vmem:[%s8369_s11 + $0x20] sm:$0xff] %v4505_v38  ;;  %v4506_v20 = vadd.f32 %v4490_v58, %v4474_v40  ;;  %v4415_v44 = vadd.f32 %v4414_v41, %v8319_v26  ;;  %v5734_v32 = vpop.f32.mrb[154].mxu1 }
 0x419   : > { %4524 = vst [vmem:[%s8369_s11 + $0x38] sm:$0xff] %v4508_v18  ;;  %v4459_v55 = vmul.f32 %v8342_v45, %v4423_v61  ;;  %v4426_v51 = vadd.f32 %v5734_v32, %v8327_v54  ;;  %v4417_v5 = vpop.f32.mrb[155].mxu1 }
 0x41a   : > { %4522 = vst [vmem:[%s8369_s11 + $0x28] sm:$0xff] %v4506_v20  ;;  %v4457_v23 = vmul.f32 %v8342_v45, %v4415_v44  ;;  %v4418_v43 = vadd.f32 %v4417_v5, %v8321_v27 }
 0x41b   : > { %v4479_v31 = vadd.f32 %v8350_v34, %v4459_v55  ;;  %v4460_v26 = vmul.f32 %v8342_v45, %v4426_v51 }
 0x41c   : > { %v4477_v49 = vadd.f32 %v8350_v34, %v4457_v23  ;;  %v4458_v54 = vmul.f32 %v8342_v45, %v4418_v43 }
 0x41d   : > { %v4511_v6 = vadd.f32 %v4495_v30, %v4479_v31  ;;  %v4480_v19 = vadd.f32 %v8350_v34, %v4460_v26 }
 0x41e   : > { %v4509_v46 = vadd.f32 %v4493_v53, %v4477_v49  ;;  %v4478_v27 = vadd.f32 %v8350_v34, %v4458_v54  ;;  %v5737_v1 = vpop.f32.mrb[156].mxu1 }
 0x41f   : > { %4527 = vst [vmem:[%s8369_s11 + $0x50] sm:$0xff] %v4511_v6  ;;  %v4512_v39 = vadd.f32 %v4496_v57, %v4480_v19  ;;  %v4439_v16 = vadd.f32 %v5737_v1, %v8337_v25  ;;  %v4430_v14 = vpop.f32.mrb[157].mxu1  ;;  %v4499_v25 = vld [vmem:[%s6807_s3 + $0x70] sm:$0xff] }
 0x420   : > { %4525 = vst [vmem:[%s8369_s11 + $0x40] sm:$0xff] %v4509_v46  ;;  %v4510_v9 = vadd.f32 %v4494_v4, %v4478_v27  ;;  %v4431_v60 = vadd.f32 %v4430_v14, %v8331_v17  ;;  %v5738_v35 = vpop.f32.mrb[158].mxu1  ;;  %v4497_v17 = vld [vmem:[%s6807_s3 + $0x60] sm:$0xff] }
 0x421   : > { %4528 = vst [vmem:[%s8369_s11 + $0x58] sm:$0xff] %v4512_v39  ;;  %v4463_v11 = vmul.f32 %v8342_v45, %v4439_v16  ;;  %v4442_v24 = vadd.f32 %v5738_v35, %v8345_v28  ;;  %v4433_v56 = vpop.f32.mrb[159].mxu1  ;;  %v4500_v28 = vld [vmem:[%s6807_s3 + $0x78] sm:$0xff] }
 0x422   : > { %4526 = vst [vmem:[%s8369_s11 + $0x48] sm:$0xff] %v4510_v9  ;;  %v4461_v47 = vmul.f32 %v8342_v45, %v4431_v60  ;;  %v4434_v50 = vadd.f32 %v4433_v56, %v8333_v8  ;;  %v4498_v8 = vld [vmem:[%s6807_s3 + $0x68] sm:$0xff]  ;;  %s4534_s3 = scalar_lea.sflag [#allocation7], %s6801_s30 }
 0x423   : > { %v4483_v22 = vadd.f32 %v8350_v34, %v4463_v11  ;;  %v4464_v12 = vmul.f32 %v8342_v45, %v4442_v24 }
 0x424   : > { %v4481_v2 = vadd.f32 %v8350_v34, %v4461_v47  ;;  %v4462_v37 = vmul.f32 %v8342_v45, %v4434_v50 }
 0x425   : > { %v4515_v59 = vadd.f32 %v4499_v25, %v4483_v22  ;;  %v4484_v21 = vadd.f32 %v8350_v34, %v4464_v12 }
 0x426   : > { %v4513_v52 = vadd.f32 %v4497_v17, %v4481_v2  ;;  %v4482_v29 = vadd.f32 %v8350_v34, %v4462_v37 }
 0x427   : > { %4531 = vst [vmem:[%s8369_s11 + $0x70] sm:$0xff] %v4515_v59  ;;  %v4516_v3 = vadd.f32 %v4500_v28, %v4484_v21 }
 0x428   : > { %4529 = vst [vmem:[%s8369_s11 + $0x60] sm:$0xff] %v4513_v52  ;;  %v4514_v45 = vadd.f32 %v4498_v8, %v4482_v29 }
 0x429   : > { %4532 = vst [vmem:[%s8369_s11 + $0x78] sm:$0xff] %v4516_v3 }
 0x42a   : > { %4530 = vst [vmem:[%s8369_s11 + $0x68] sm:$0xff] %v4514_v45 }
 0x42b   : > { %6205 = shalt.err (!%p6202_p5)
}
 0x42c   : > { %s6206_s12 = scalar_lea.hbm %s8441_s13, 2048  ;;  %s6210_s4 = scalar_lea.hbm %s8710_s14, 8192 }
 0x42d   : > { %p6207_p6 = scmp.ne.s32.totalorder %s8441_s13, %s6206_s12  ;;  %p6211_p3 = scmp.lt.u32.totalorder %s8441_s13, %s8710_s14 }
 0x42e   : > { %p6212_p7 = scmp.lt.u32.totalorder %s6210_s4, %s6206_s12  ;;  %p6214_p10 = scmp.lt.u32.totalorder %s6206_s12, %s8441_s13 }
 0x42f   : > { %p6208_p9 = pnand %p6207_p6, %p8711_p12 }
 0x430   : > { %p6213_p4 = por %p6212_p7, %p6211_p3 }
 0x431   : > { %p6209_p11 = pneg %p6208_p9 }
 0x432   : > { %p6215_p8 = por %p6214_p10, %p6213_p4 }
 0x434   : > { %p6216_p0 = pnand %p6215_p8, %p6209_p11 }
 0x436   : > { %6219 = shalt.err (!%p6216_p0)
}
 0x437   : > { %s6362_s18 = smov 128   ;;  %s6363_s22 = smov 8  }
 0x438   : > { %5753 = dma.vmem_to_hbm [thread:$0]  (%p8711_p12), %s8435_s17, 2048, %s8441_s13, %s4534_s3, %s6362_s18, %s6362_s18, %s6363_s22  }
 0x439 PF: > { %p5781_p13 = scmp.ge.s32.totalorder %s6350_s10, 2  ;;  %s4565_s8 = sand.u32 1, %s6322_s27  }
 0x43a   : > { %p8712_p1 = scmp.ne.s32.totalorder %s8599_s23, 0  ;;  %s4566_s9 = scalar_lea.sflag [#allocation7], %s4565_s8 }
 0x43c   : > { %p5773_p2 = pnand %p5781_p13, %p8712_p1 }
 0x43e   : > { %6293 = dma.done.wait (!%p5773_p2), %s4566_s9, 2048  }
 0x43f   : > { %6295 = vsyncadd (!%p5773_p2), %s4566_s9, 4294965248  ;;  %s26_s10 = sadd.s32 1, %s6350_s10   ;;  %s8714_s2 = sld [smem:[#allocation21_spill]] }
 0x440   : > { %p8474_p5 = scmp.ge.s32.totalorder %s26_s10, 6   ;;  %s8715_s22 = sld [smem:[#allocation22_spill]] }
 0x441   : > { %s8716_s30 = sld [smem:[#allocation23_spill]]  ;;  %s8717_s17 = smov %s6559_s24 }
 0x442   : > { %s8718_s13 = sld [smem:[#allocation33_spill]]  ;;  %s8719_s3 = sld [smem:[#allocation26_spill]] }
 0x443   : > { %s8720_s1 = sld [smem:[#allocation27_spill]]  ;;  %s8721_s8 = sld [smem:[#allocation29_spill]] }
 0x444   : > { %s8722_s9 = sld [smem:[#allocation30_spill]]  ;;  %s8725_s23 = smov %s8749_s7 }
 0x445   : > { %s8724_s21 = smov %s8714_s2  ;;  %s8727_s25 = smov %s6318_s26 }
 0x446   : > { %s8728_s26 = smov %s8717_s17  ;;  %s8729_s27 = smov %s6326_s28 }
 0x447   : > { %s8726_s24 = smov %s8716_s30  ;;  %s8730_s28 = smov %s6330_s29 }
 0x448   : > { %s8731_s29 = smov %s8718_s13  ;;  %s8732_s30 = smov %s8719_s3 }
 0x449   : > { %s8733_s7 = smov %s8720_s1  ;;  %25 = sbr.rel (!%p8474_p5) target bundleno = 21 (0x15), region = 125 }
 0x450   :  { %4571 = vsyncpa [#allocation6], 1 }
 0x451   :  { %4573 = vsyncpa [#allocation6 + $0x1], 1 }
 0x452   :  { %4574 = vsyncpa [#allocation9], 1 }
 0x453   :  { %4576 = vsyncpa [#allocation9 + $0x1], 1 }
 0x454   :  { %4577 = vsyncpa [#allocation12], 1 }
 0x455   :  { %4578 = vsyncpa [#allocation7], 1 }
 0x456   :  { %4580 = vsyncpa [#allocation7 + $0x1], 1 }

</bundles_post_ra>
